<compile_context>
chip_gen: v7x
topology: tpu7x:2x2x1
jax: 0.10.0
libtpu: 0.0.40
codegen_flags: <defaults>
</compile_context>

<pallas_src>
import jax
import jax.numpy as jnp
from jax import lax
from jax.experimental import pallas as pl
from jax.experimental.pallas import tpu as pltpu

K = 5                     # conv kernel size
C1_OUT = 6
C2_OUT = 16
H1 = W1 = 32              # conv1 spatial
H2 = W2 = 16              # conv2 spatial (after pool1)
H3 = W3 = 8               # after pool2
FC1_IN, FC1_OUT = 1024, 120
FC2_OUT = 84


def _vmem():
    return pl.BlockSpec(memory_space=pltpu.MemorySpace.VMEM)


# ---------------------------------------------------------------------------
# Fused kernel: everything is MXU matmuls + elementwise VPU ops.
# Row layout of 2-D activations: row = n*H + y ; lane = c*W + x.
# ---------------------------------------------------------------------------
def lenet5_kernel(x_ref,
                  shift1_ref, band1_ref, b1_ref,
                  sce1_ref, sco1_ref, sre1_ref, sro1_ref,
                  shift2_ref, band2_ref, b2_ref,
                  sce2_ref, sco2_ref, sre2_ref, sro2_ref,
                  flat_sel_ref, w1b_ref, fb1_ref, w2_ref, fb2_ref,
                  out_ref):
    def mm(a, b):
        return jnp.dot(a, b, preferred_element_type=jnp.float32)

    x2 = x_ref[...]                                                   # (N*32, 32)

    # --- conv1 (1->6, 5x5, pad=2) + ReLU -----------------------------------
    acc1 = None
    for ky in range(K):
        t = mm(shift1_ref[ky], x2)                                    # (N*32, 32)
        t = mm(t, band1_ref[ky])                                      # (N*32, 192)
        acc1 = t if acc1 is None else acc1 + t
    a1 = jnp.maximum(acc1 + b1_ref[...], 0.0)                         # (N*32, 192)

    # --- maxpool1 2x2 stride 2 (exact 0/1 selection matmuls) ----------------
    c1 = jnp.maximum(mm(a1, sce1_ref[...]), mm(a1, sco1_ref[...]))    # (N*32, 96)
    p1 = jnp.maximum(mm(sre1_ref[...], c1), mm(sro1_ref[...], c1))    # (N*16, 96)

    # --- conv2 (6->16, 5x5, pad=2) + ReLU -----------------------------------
    acc2 = None
    for ky in range(K):
        t = mm(shift2_ref[ky], p1)                                    # (N*16, 96)
        t = mm(t, band2_ref[ky])                                      # (N*16, 256)
        acc2 = t if acc2 is None else acc2 + t
    a2 = jnp.maximum(acc2 + b2_ref[...], 0.0)                         # (N*16, 256)

    # --- maxpool2 2x2 stride 2 ----------------------------------------------
    c2 = jnp.maximum(mm(a2, sce2_ref[...]), mm(a2, sco2_ref[...]))    # (N*16, 128)
    p2 = jnp.maximum(mm(sre2_ref[...], c2), mm(sro2_ref[...], c2))    # (N*8, 128)

    # --- NCHW flatten + fc1 + ReLU, folded into 8 blocked matmuls -----------
    f1 = None
    for y in range(H3):
        rows = mm(flat_sel_ref[y], p2)                                # (N, 128)
        t = mm(rows, w1b_ref[y])                                      # (N, 120)
        f1 = t if f1 is None else f1 + t
    f1 = jnp.maximum(f1 + fb1_ref[...], 0.0)                          # (N, 120)

    # --- fc2 + log-softmax ----------------------------------------------------
    logits = mm(f1, w2_ref[...]) + fb2_ref[...]                       # (N, 84)
    m = jnp.max(logits, axis=-1, keepdims=True)
    s = logits - m
    lse = jnp.log(jnp.sum(jnp.exp(s), axis=-1, keepdims=True))
    out_ref[...] = (s - lse).astype(out_ref.dtype)


# ---------------------------------------------------------------------------
# One-time (init) construction of all layout / weight matrices.
# ---------------------------------------------------------------------------
def _make_band(w, width):
    """Banded 'same'-conv weight blocks: (K, Cin*width, Cout*width)."""
    cout, cin, k, _ = w.shape
    xin = jnp.arange(width)[:, None]
    xo = jnp.arange(width)[None, :]
    kx = xin - xo + k // 2
    valid = (kx >= 0) & (kx < k)
    kxc = jnp.clip(kx, 0, k - 1)
    wb = w[:, :, :, kxc] * valid[None, None, None].astype(w.dtype)    # (Cout,Cin,K,Win,Wout)
    wb = jnp.transpose(wb, (2, 1, 3, 0, 4))                           # (K,Cin,Win,Cout,Wout)
    return wb.reshape(k, cin * width, cout * width)


def _make_shift(batch, h, k=K):
    """Per-image vertical tap shifts (zero-padded): (K, batch*h, batch*h)."""
    ky = jnp.arange(k)[:, None, None]
    ro = jnp.arange(batch * h)[None, :, None]
    ri = jnp.arange(batch * h)[None, None, :]
    same_img = (ro // h) == (ri // h)
    src = (ro % h) + ky - k // 2
    return (same_img & (src == (ri % h))).astype(jnp.float32)


def _make_col_select(channels, width, parity):
    """(channels*width, channels*(width//2)) column-pair selector."""
    wo = width // 2
    li = jnp.arange(channels * width)[:, None]
    lo = jnp.arange(channels * wo)[None, :]
    return (((li // width) == (lo // wo))
            & ((li % width) == 2 * (lo % wo) + parity)).astype(jnp.float32)


def _make_row_select(batch, h, parity):
    """(batch*(h//2), batch*h) row-pair selector."""
    ho = h // 2
    ro = jnp.arange(batch * ho)[:, None]
    ri = jnp.arange(batch * h)[None, :]
    return (((ro // ho) == (ri // h))
            & ((ri % h) == 2 * (ro % ho) + parity)).astype(jnp.float32)


def _make_flat_select(batch, h):
    """(h, batch, batch*h): flat_sel[y] picks row (n*h + y) for every n."""
    y = jnp.arange(h)[:, None, None]
    n = jnp.arange(batch)[None, :, None]
    r = jnp.arange(batch * h)[None, None, :]
    return (r == n * h + y).astype(jnp.float32)


def prepare_params(params, batch):
    """Hoist every weight/layout transform out of the per-call forward."""
    p = {}
    p["shift1"] = _make_shift(batch, H1)                              # (5, N*32, N*32)
    p["band1"] = _make_band(params["conv1_w"], W1)                    # (5, 32, 192)
    p["b1row"] = jnp.repeat(params["conv1_b"], W1)[None, :]           # (1, 192)
    p["sce1"] = _make_col_select(C1_OUT, W1, 0)                       # (192, 96)
    p["sco1"] = _make_col_select(C1_OUT, W1, 1)
    p["sre1"] = _make_row_select(batch, H1, 0)                        # (N*16, N*32)
    p["sro1"] = _make_row_select(batch, H1, 1)
    p["shift2"] = _make_shift(batch, H2)                              # (5, N*16, N*16)
    p["band2"] = _make_band(params["conv2_w"], W2)                    # (5, 96, 256)
    p["b2row"] = jnp.repeat(params["conv2_b"], W2)[None, :]           # (1, 256)
    p["sce2"] = _make_col_select(C2_OUT, W2, 0)                       # (256, 128)
    p["sco2"] = _make_col_select(C2_OUT, W2, 1)
    p["sre2"] = _make_row_select(batch, H2, 0)                        # (N*8, N*16)
    p["sro2"] = _make_row_select(batch, H2, 1)
    p["flat_sel"] = _make_flat_select(batch, H3)                      # (8, N, N*8)
    # fc1 weight re-blocked so the torch NCHW flatten folds into 8 matmuls:
    #   w1b[y, co*8 + x, j] = fc1_w[j, co*64 + y*8 + x]
    w1 = params["fc1_w"].reshape(FC1_OUT, C2_OUT, H3, W3)
    p["w1b"] = jnp.transpose(w1, (2, 1, 3, 0)).reshape(H3, C2_OUT * W3, FC1_OUT)
    p["fb1"] = params["fc1_b"][None, :]                               # (1, 120)
    p["w2"] = params["fc2_w"].T                                       # (120, 84)
    p["fb2"] = params["fc2_b"][None, :]                               # (1, 84)
    return p


# ---------------------------------------------------------------------------
# Forward wrapper: one pallas_call, whole-array VMEM blocks (batch=2 -> ~2 MiB).
# For large batches, tile the row dimension with a "parallel" grid axis instead.
# ---------------------------------------------------------------------------
def lenet5_forward(x, prep):
    n = x.shape[0]
    x2 = x.reshape(n * H1, W1).astype(jnp.float32)    # NCHW with Cin=1: free reshape
    args = (x2,
            prep["shift1"], prep["band1"], prep["b1row"],
            prep["sce1"], prep["sco1"], prep["sre1"], prep["sro1"],
            prep["shift2"], prep["band2"], prep["b2row"],
            prep["sce2"], prep["sco2"], prep["sre2"], prep["sro2"],
            prep["flat_sel"], prep["w1b"], prep["fb1"], prep["w2"], prep["fb2"])
    return pl.pallas_call(
        lenet5_kernel,
        out_shape=jax.ShapeDtypeStruct((n, FC2_OUT), jnp.float32),
        in_specs=[_vmem()] * len(args),
        out_specs=_vmem(),
    )(*args)


def init_params(key):
    ks = jax.random.split(key, 8)

    def u(k, shape, fan_in):
        bound = 1.0 / jnp.sqrt(jnp.float32(fan_in))
        return jax.random.uniform(k, shape, jnp.float32, -bound, bound)

    return {
        "conv1_w": u(ks[0], (6, 1, 5, 5), 1 * 25),
        "conv1_b": u(ks[1], (6,), 1 * 25),
        "conv2_w": u(ks[2], (16, 6, 5, 5), 6 * 25),
        "conv2_b": u(ks[3], (16,), 6 * 25),
        "fc1_w": u(ks[4], (120, 1024), 1024),
        "fc1_b": u(ks[5], (120,), 1024),
        "fc2_w": u(ks[6], (84, 120), 120),
        "fc2_b": u(ks[7], (84,), 120),
    }


def ref_forward(x, params):
    """Plain-JAX (XLA) port of the PyTorch module, for correctness checking."""
    dn = ("NCHW", "OIHW", "NCHW")
    h = lax.conv_general_dilated(x, params["conv1_w"], (1, 1), ((2, 2), (2, 2)),
                                 dimension_numbers=dn)
    h = jax.nn.relu(h + params["conv1_b"][None, :, None, None])
    h = lax.reduce_window(h, -jnp.inf, lax.max, (1, 1, 2, 2), (1, 1, 2, 2), "VALID")
    h = lax.conv_general_dilated(h, params["conv2_w"], (1, 1), ((2, 2), (2, 2)),
                                 dimension_numbers=dn)
    h = jax.nn.relu(h + params["conv2_b"][None, :, None, None])
    h = lax.reduce_window(h, -jnp.inf, lax.max, (1, 1, 2, 2), (1, 1, 2, 2), "VALID")
    h = h.reshape(x.shape[0], -1)
    h = jax.nn.relu(h @ params["fc1_w"].T + params["fc1_b"])
    logits = h @ params["fc2_w"].T + params["fc2_b"]
    return jax.nn.log_softmax(logits, axis=1)


if __name__ == "__main__":
    key = jax.random.PRNGKey(0)
    k_in, k_par = jax.random.split(key)
    # fc1 expects 1024 = 16 * 8 * 8 features -> input must be (N, 1, 32, 32).
    x = jax.random.normal(k_in, (2, 1, 32, 32), dtype=jnp.float32)
    params = init_params(k_par)
    prep = prepare_params(params, batch=x.shape[0])   # one-time layout work

    out = jax.block_until_ready(jax.jit(lenet5_forward)(x, prep))
    assert out.shape == (x.shape[0], FC2_OUT)
    # log-softmax rows normalize to probability 1.
    assert jnp.allclose(jnp.sum(jnp.exp(out), axis=1), 1.0, atol=1e-4)
    # matches the plain-JAX port of the PyTorch module.
    ref = jax.block_until_ready(jax.jit(ref_forward)(x, params))
    assert jnp.allclose(out, ref, atol=3e-2, rtol=3e-2), float(jnp.max(jnp.abs(out - ref)))
    print("KERNEL_OK")
</pallas_src>

<mosaic_0001>
module attributes {stable_mosaic.version = 11 : i64} {
  func.func @lenet5_kernel(%arg0: memref<64x32xf32, #tpu.memory_space<vmem>>, %arg1: memref<5x64x64xf32, #tpu.memory_space<vmem>>, %arg2: memref<5x32x192xf32, #tpu.memory_space<vmem>>, %arg3: memref<1x192xf32, #tpu.memory_space<vmem>>, %arg4: memref<192x96xf32, #tpu.memory_space<vmem>>, %arg5: memref<192x96xf32, #tpu.memory_space<vmem>>, %arg6: memref<32x64xf32, #tpu.memory_space<vmem>>, %arg7: memref<32x64xf32, #tpu.memory_space<vmem>>, %arg8: memref<5x32x32xf32, #tpu.memory_space<vmem>>, %arg9: memref<5x96x256xf32, #tpu.memory_space<vmem>>, %arg10: memref<1x256xf32, #tpu.memory_space<vmem>>, %arg11: memref<256x128xf32, #tpu.memory_space<vmem>>, %arg12: memref<256x128xf32, #tpu.memory_space<vmem>>, %arg13: memref<16x32xf32, #tpu.memory_space<vmem>>, %arg14: memref<16x32xf32, #tpu.memory_space<vmem>>, %arg15: memref<8x2x16xf32, #tpu.memory_space<vmem>>, %arg16: memref<8x128x120xf32, #tpu.memory_space<vmem>>, %arg17: memref<1x120xf32, #tpu.memory_space<vmem>>, %arg18: memref<120x84xf32, #tpu.memory_space<vmem>>, %arg19: memref<1x84xf32, #tpu.memory_space<vmem>>, %arg20: memref<2x84xf32, #tpu.memory_space<vmem>>) attributes {dimension_semantics = [], scalar_prefetch = 0 : i64, scratch_operands = 0 : i64, tpu.core_type = #tpu.core_type<tc>} {
    %c0 = arith.constant 0 : index
    %c0_0 = arith.constant 0 : index
    %0 = vector.load %arg0[%c0, %c0_0] : memref<64x32xf32, #tpu.memory_space<vmem>>, vector<64x32xf32>
    %c0_1 = arith.constant 0 : index
    %c0_2 = arith.constant 0 : index
    %c0_3 = arith.constant 0 : index
    %1 = vector.load %arg1[%c0_1, %c0_2, %c0_3] : memref<5x64x64xf32, #tpu.memory_space<vmem>>, vector<1x64x64xf32>
    %2 = vector.shape_cast %1 : vector<1x64x64xf32> to vector<64x64xf32>
    %cst = arith.constant dense<0.000000e+00> : vector<64x32xf32>
    %3 = tpu.matmul %2, %0, %cst {dimension_numbers = #tpu.dot_dimension_numbers<[1], [0], [0], [1], [0, 0, 1, 1], [], []>} : vector<64x64xf32>, vector<64x32xf32>, vector<64x32xf32> -> vector<64x32xf32>
    %c0_4 = arith.constant 0 : index
    %c0_5 = arith.constant 0 : index
    %c0_6 = arith.constant 0 : index
    %4 = vector.load %arg2[%c0_4, %c0_5, %c0_6] : memref<5x32x192xf32, #tpu.memory_space<vmem>>, vector<1x32x192xf32>
    %5 = vector.shape_cast %4 : vector<1x32x192xf32> to vector<32x192xf32>
    %cst_7 = arith.constant dense<0.000000e+00> : vector<64x192xf32>
    %6 = tpu.matmul %3, %5, %cst_7 {dimension_numbers = #tpu.dot_dimension_numbers<[1], [0], [0], [1], [0, 0, 1, 1], [], []>} : vector<64x32xf32>, vector<32x192xf32>, vector<64x192xf32> -> vector<64x192xf32>
    %c1 = arith.constant 1 : index
    %c0_8 = arith.constant 0 : index
    %c0_9 = arith.constant 0 : index
    %7 = vector.load %arg1[%c1, %c0_8, %c0_9] : memref<5x64x64xf32, #tpu.memory_space<vmem>>, vector<1x64x64xf32>
    %8 = vector.shape_cast %7 : vector<1x64x64xf32> to vector<64x64xf32>
    %cst_10 = arith.constant dense<0.000000e+00> : vector<64x32xf32>
    %9 = tpu.matmul %8, %0, %cst_10 {dimension_numbers = #tpu.dot_dimension_numbers<[1], [0], [0], [1], [0, 0, 1, 1], [], []>} : vector<64x64xf32>, vector<64x32xf32>, vector<64x32xf32> -> vector<64x32xf32>
    %c1_11 = arith.constant 1 : index
    %c0_12 = arith.constant 0 : index
    %c0_13 = arith.constant 0 : index
    %10 = vector.load %arg2[%c1_11, %c0_12, %c0_13] : memref<5x32x192xf32, #tpu.memory_space<vmem>>, vector<1x32x192xf32>
    %11 = vector.shape_cast %10 : vector<1x32x192xf32> to vector<32x192xf32>
    %cst_14 = arith.constant dense<0.000000e+00> : vector<64x192xf32>
    %12 = tpu.matmul %9, %11, %cst_14 {dimension_numbers = #tpu.dot_dimension_numbers<[1], [0], [0], [1], [0, 0, 1, 1], [], []>} : vector<64x32xf32>, vector<32x192xf32>, vector<64x192xf32> -> vector<64x192xf32>
    %13 = arith.addf %6, %12 : vector<64x192xf32>
    %c2 = arith.constant 2 : index
    %c0_15 = arith.constant 0 : index
    %c0_16 = arith.constant 0 : index
    %14 = vector.load %arg1[%c2, %c0_15, %c0_16] : memref<5x64x64xf32, #tpu.memory_space<vmem>>, vector<1x64x64xf32>
    %15 = vector.shape_cast %14 : vector<1x64x64xf32> to vector<64x64xf32>
    %cst_17 = arith.constant dense<0.000000e+00> : vector<64x32xf32>
    %16 = tpu.matmul %15, %0, %cst_17 {dimension_numbers = #tpu.dot_dimension_numbers<[1], [0], [0], [1], [0, 0, 1, 1], [], []>} : vector<64x64xf32>, vector<64x32xf32>, vector<64x32xf32> -> vector<64x32xf32>
    %c2_18 = arith.constant 2 : index
    %c0_19 = arith.constant 0 : index
    %c0_20 = arith.constant 0 : index
    %17 = vector.load %arg2[%c2_18, %c0_19, %c0_20] : memref<5x32x192xf32, #tpu.memory_space<vmem>>, vector<1x32x192xf32>
    %18 = vector.shape_cast %17 : vector<1x32x192xf32> to vector<32x192xf32>
    %cst_21 = arith.constant dense<0.000000e+00> : vector<64x192xf32>
    %19 = tpu.matmul %16, %18, %cst_21 {dimension_numbers = #tpu.dot_dimension_numbers<[1], [0], [0], [1], [0, 0, 1, 1], [], []>} : vector<64x32xf32>, vector<32x192xf32>, vector<64x192xf32> -> vector<64x192xf32>
    %20 = arith.addf %13, %19 : vector<64x192xf32>
    %c3 = arith.constant 3 : index
    %c0_22 = arith.constant 0 : index
    %c0_23 = arith.constant 0 : index
    %21 = vector.load %arg1[%c3, %c0_22, %c0_23] : memref<5x64x64xf32, #tpu.memory_space<vmem>>, vector<1x64x64xf32>
    %22 = vector.shape_cast %21 : vector<1x64x64xf32> to vector<64x64xf32>
    %cst_24 = arith.constant dense<0.000000e+00> : vector<64x32xf32>
    %23 = tpu.matmul %22, %0, %cst_24 {dimension_numbers = #tpu.dot_dimension_numbers<[1], [0], [0], [1], [0, 0, 1, 1], [], []>} : vector<64x64xf32>, vector<64x32xf32>, vector<64x32xf32> -> vector<64x32xf32>
    %c3_25 = arith.constant 3 : index
    %c0_26 = arith.constant 0 : index
    %c0_27 = arith.constant 0 : index
    %24 = vector.load %arg2[%c3_25, %c0_26, %c0_27] : memref<5x32x192xf32, #tpu.memory_space<vmem>>, vector<1x32x192xf32>
    %25 = vector.shape_cast %24 : vector<1x32x192xf32> to vector<32x192xf32>
    %cst_28 = arith.constant dense<0.000000e+00> : vector<64x192xf32>
    %26 = tpu.matmul %23, %25, %cst_28 {dimension_numbers = #tpu.dot_dimension_numbers<[1], [0], [0], [1], [0, 0, 1, 1], [], []>} : vector<64x32xf32>, vector<32x192xf32>, vector<64x192xf32> -> vector<64x192xf32>
    %27 = arith.addf %20, %26 : vector<64x192xf32>
    %c4 = arith.constant 4 : index
    %c0_29 = arith.constant 0 : index
    %c0_30 = arith.constant 0 : index
    %28 = vector.load %arg1[%c4, %c0_29, %c0_30] : memref<5x64x64xf32, #tpu.memory_space<vmem>>, vector<1x64x64xf32>
    %29 = vector.shape_cast %28 : vector<1x64x64xf32> to vector<64x64xf32>
    %cst_31 = arith.constant dense<0.000000e+00> : vector<64x32xf32>
    %30 = tpu.matmul %29, %0, %cst_31 {dimension_numbers = #tpu.dot_dimension_numbers<[1], [0], [0], [1], [0, 0, 1, 1], [], []>} : vector<64x64xf32>, vector<64x32xf32>, vector<64x32xf32> -> vector<64x32xf32>
    %c4_32 = arith.constant 4 : index
    %c0_33 = arith.constant 0 : index
    %c0_34 = arith.constant 0 : index
    %31 = vector.load %arg2[%c4_32, %c0_33, %c0_34] : memref<5x32x192xf32, #tpu.memory_space<vmem>>, vector<1x32x192xf32>
    %32 = vector.shape_cast %31 : vector<1x32x192xf32> to vector<32x192xf32>
    %cst_35 = arith.constant dense<0.000000e+00> : vector<64x192xf32>
    %33 = tpu.matmul %30, %32, %cst_35 {dimension_numbers = #tpu.dot_dimension_numbers<[1], [0], [0], [1], [0, 0, 1, 1], [], []>} : vector<64x32xf32>, vector<32x192xf32>, vector<64x192xf32> -> vector<64x192xf32>
    %34 = arith.addf %27, %33 : vector<64x192xf32>
    %c0_36 = arith.constant 0 : index
    %c0_37 = arith.constant 0 : index
    %35 = vector.load %arg3[%c0_36, %c0_37] : memref<1x192xf32, #tpu.memory_space<vmem>>, vector<1x192xf32>
    %36 = vector.broadcast %35 : vector<1x192xf32> to vector<64x192xf32>
    %37 = arith.addf %34, %36 : vector<64x192xf32>
    %cst_38 = arith.constant 0.000000e+00 : f32
    %38 = vector.broadcast %cst_38 : f32 to vector<64x192xf32>
    %39 = arith.maximumf %37, %38 : vector<64x192xf32>
    %c0_39 = arith.constant 0 : index
    %c0_40 = arith.constant 0 : index
    %40 = vector.load %arg4[%c0_39, %c0_40] : memref<192x96xf32, #tpu.memory_space<vmem>>, vector<192x96xf32>
    %cst_41 = arith.constant dense<0.000000e+00> : vector<64x96xf32>
    %41 = tpu.matmul %39, %40, %cst_41 {dimension_numbers = #tpu.dot_dimension_numbers<[1], [0], [0], [1], [0, 0, 1, 1], [], []>} : vector<64x192xf32>, vector<192x96xf32>, vector<64x96xf32> -> vector<64x96xf32>
    %c0_42 = arith.constant 0 : index
    %c0_43 = arith.constant 0 : index
    %42 = vector.load %arg5[%c0_42, %c0_43] : memref<192x96xf32, #tpu.memory_space<vmem>>, vector<192x96xf32>
    %cst_44 = arith.constant dense<0.000000e+00> : vector<64x96xf32>
    %43 = tpu.matmul %39, %42, %cst_44 {dimension_numbers = #tpu.dot_dimension_numbers<[1], [0], [0], [1], [0, 0, 1, 1], [], []>} : vector<64x192xf32>, vector<192x96xf32>, vector<64x96xf32> -> vector<64x96xf32>
    %44 = arith.maximumf %41, %43 : vector<64x96xf32>
    %c0_45 = arith.constant 0 : index
    %c0_46 = arith.constant 0 : index
    %45 = vector.load %arg6[%c0_45, %c0_46] : memref<32x64xf32, #tpu.memory_space<vmem>>, vector<32x64xf32>
    %cst_47 = arith.constant dense<0.000000e+00> : vector<32x96xf32>
    %46 = tpu.matmul %45, %44, %cst_47 {dimension_numbers = #tpu.dot_dimension_numbers<[1], [0], [0], [1], [0, 0, 1, 1], [], []>} : vector<32x64xf32>, vector<64x96xf32>, vector<32x96xf32> -> vector<32x96xf32>
    %c0_48 = arith.constant 0 : index
    %c0_49 = arith.constant 0 : index
    %47 = vector.load %arg7[%c0_48, %c0_49] : memref<32x64xf32, #tpu.memory_space<vmem>>, vector<32x64xf32>
    %cst_50 = arith.constant dense<0.000000e+00> : vector<32x96xf32>
    %48 = tpu.matmul %47, %44, %cst_50 {dimension_numbers = #tpu.dot_dimension_numbers<[1], [0], [0], [1], [0, 0, 1, 1], [], []>} : vector<32x64xf32>, vector<64x96xf32>, vector<32x96xf32> -> vector<32x96xf32>
    %49 = arith.maximumf %46, %48 : vector<32x96xf32>
    %c0_51 = arith.constant 0 : index
    %c0_52 = arith.constant 0 : index
    %c0_53 = arith.constant 0 : index
    %50 = vector.load %arg8[%c0_51, %c0_52, %c0_53] : memref<5x32x32xf32, #tpu.memory_space<vmem>>, vector<1x32x32xf32>
    %51 = vector.shape_cast %50 : vector<1x32x32xf32> to vector<32x32xf32>
    %cst_54 = arith.constant dense<0.000000e+00> : vector<32x96xf32>
    %52 = tpu.matmul %51, %49, %cst_54 {dimension_numbers = #tpu.dot_dimension_numbers<[1], [0], [0], [1], [0, 0, 1, 1], [], []>} : vector<32x32xf32>, vector<32x96xf32>, vector<32x96xf32> -> vector<32x96xf32>
    %c0_55 = arith.constant 0 : index
    %c0_56 = arith.constant 0 : index
    %c0_57 = arith.constant 0 : index
    %53 = vector.load %arg9[%c0_55, %c0_56, %c0_57] : memref<5x96x256xf32, #tpu.memory_space<vmem>>, vector<1x96x256xf32>
    %54 = vector.shape_cast %53 : vector<1x96x256xf32> to vector<96x256xf32>
    %cst_58 = arith.constant dense<0.000000e+00> : vector<32x256xf32>
    %55 = tpu.matmul %52, %54, %cst_58 {dimension_numbers = #tpu.dot_dimension_numbers<[1], [0], [0], [1], [0, 0, 1, 1], [], []>} : vector<32x96xf32>, vector<96x256xf32>, vector<32x256xf32> -> vector<32x256xf32>
    %c1_59 = arith.constant 1 : index
    %c0_60 = arith.constant 0 : index
    %c0_61 = arith.constant 0 : index
    %56 = vector.load %arg8[%c1_59, %c0_60, %c0_61] : memref<5x32x32xf32, #tpu.memory_space<vmem>>, vector<1x32x32xf32>
    %57 = vector.shape_cast %56 : vector<1x32x32xf32> to vector<32x32xf32>
    %cst_62 = arith.constant dense<0.000000e+00> : vector<32x96xf32>
    %58 = tpu.matmul %57, %49, %cst_62 {dimension_numbers = #tpu.dot_dimension_numbers<[1], [0], [0], [1], [0, 0, 1, 1], [], []>} : vector<32x32xf32>, vector<32x96xf32>, vector<32x96xf32> -> vector<32x96xf32>
    %c1_63 = arith.constant 1 : index
    %c0_64 = arith.constant 0 : index
    %c0_65 = arith.constant 0 : index
    %59 = vector.load %arg9[%c1_63, %c0_64, %c0_65] : memref<5x96x256xf32, #tpu.memory_space<vmem>>, vector<1x96x256xf32>
    %60 = vector.shape_cast %59 : vector<1x96x256xf32> to vector<96x256xf32>
    %cst_66 = arith.constant dense<0.000000e+00> : vector<32x256xf32>
    %61 = tpu.matmul %58, %60, %cst_66 {dimension_numbers = #tpu.dot_dimension_numbers<[1], [0], [0], [1], [0, 0, 1, 1], [], []>} : vector<32x96xf32>, vector<96x256xf32>, vector<32x256xf32> -> vector<32x256xf32>
    %62 = arith.addf %55, %61 : vector<32x256xf32>
    %c2_67 = arith.constant 2 : index
    %c0_68 = arith.constant 0 : index
    %c0_69 = arith.constant 0 : index
    %63 = vector.load %arg8[%c2_67, %c0_68, %c0_69] : memref<5x32x32xf32, #tpu.memory_space<vmem>>, vector<1x32x32xf32>
    %64 = vector.shape_cast %63 : vector<1x32x32xf32> to vector<32x32xf32>
    %cst_70 = arith.constant dense<0.000000e+00> : vector<32x96xf32>
    %65 = tpu.matmul %64, %49, %cst_70 {dimension_numbers = #tpu.dot_dimension_numbers<[1], [0], [0], [1], [0, 0, 1, 1], [], []>} : vector<32x32xf32>, vector<32x96xf32>, vector<32x96xf32> -> vector<32x96xf32>
    %c2_71 = arith.constant 2 : index
    %c0_72 = arith.constant 0 : index
    %c0_73 = arith.constant 0 : index
    %66 = vector.load %arg9[%c2_71, %c0_72, %c0_73] : memref<5x96x256xf32, #tpu.memory_space<vmem>>, vector<1x96x256xf32>
    %67 = vector.shape_cast %66 : vector<1x96x256xf32> to vector<96x256xf32>
    %cst_74 = arith.constant dense<0.000000e+00> : vector<32x256xf32>
    %68 = tpu.matmul %65, %67, %cst_74 {dimension_numbers = #tpu.dot_dimension_numbers<[1], [0], [0], [1], [0, 0, 1, 1], [], []>} : vector<32x96xf32>, vector<96x256xf32>, vector<32x256xf32> -> vector<32x256xf32>
    %69 = arith.addf %62, %68 : vector<32x256xf32>
    %c3_75 = arith.constant 3 : index
    %c0_76 = arith.constant 0 : index
    %c0_77 = arith.constant 0 : index
    %70 = vector.load %arg8[%c3_75, %c0_76, %c0_77] : memref<5x32x32xf32, #tpu.memory_space<vmem>>, vector<1x32x32xf32>
    %71 = vector.shape_cast %70 : vector<1x32x32xf32> to vector<32x32xf32>
    %cst_78 = arith.constant dense<0.000000e+00> : vector<32x96xf32>
    %72 = tpu.matmul %71, %49, %cst_78 {dimension_numbers = #tpu.dot_dimension_numbers<[1], [0], [0], [1], [0, 0, 1, 1], [], []>} : vector<32x32xf32>, vector<32x96xf32>, vector<32x96xf32> -> vector<32x96xf32>
    %c3_79 = arith.constant 3 : index
    %c0_80 = arith.constant 0 : index
    %c0_81 = arith.constant 0 : index
    %73 = vector.load %arg9[%c3_79, %c0_80, %c0_81] : memref<5x96x256xf32, #tpu.memory_space<vmem>>, vector<1x96x256xf32>
    %74 = vector.shape_cast %73 : vector<1x96x256xf32> to vector<96x256xf32>
    %cst_82 = arith.constant dense<0.000000e+00> : vector<32x256xf32>
    %75 = tpu.matmul %72, %74, %cst_82 {dimension_numbers = #tpu.dot_dimension_numbers<[1], [0], [0], [1], [0, 0, 1, 1], [], []>} : vector<32x96xf32>, vector<96x256xf32>, vector<32x256xf32> -> vector<32x256xf32>
    %76 = arith.addf %69, %75 : vector<32x256xf32>
    %c4_83 = arith.constant 4 : index
    %c0_84 = arith.constant 0 : index
    %c0_85 = arith.constant 0 : index
    %77 = vector.load %arg8[%c4_83, %c0_84, %c0_85] : memref<5x32x32xf32, #tpu.memory_space<vmem>>, vector<1x32x32xf32>
    %78 = vector.shape_cast %77 : vector<1x32x32xf32> to vector<32x32xf32>
    %cst_86 = arith.constant dense<0.000000e+00> : vector<32x96xf32>
    %79 = tpu.matmul %78, %49, %cst_86 {dimension_numbers = #tpu.dot_dimension_numbers<[1], [0], [0], [1], [0, 0, 1, 1], [], []>} : vector<32x32xf32>, vector<32x96xf32>, vector<32x96xf32> -> vector<32x96xf32>
    %c4_87 = arith.constant 4 : index
    %c0_88 = arith.constant 0 : index
    %c0_89 = arith.constant 0 : index
    %80 = vector.load %arg9[%c4_87, %c0_88, %c0_89] : memref<5x96x256xf32, #tpu.memory_space<vmem>>, vector<1x96x256xf32>
    %81 = vector.shape_cast %80 : vector<1x96x256xf32> to vector<96x256xf32>
    %cst_90 = arith.constant dense<0.000000e+00> : vector<32x256xf32>
    %82 = tpu.matmul %79, %81, %cst_90 {dimension_numbers = #tpu.dot_dimension_numbers<[1], [0], [0], [1], [0, 0, 1, 1], [], []>} : vector<32x96xf32>, vector<96x256xf32>, vector<32x256xf32> -> vector<32x256xf32>
    %83 = arith.addf %76, %82 : vector<32x256xf32>
    %c0_91 = arith.constant 0 : index
    %c0_92 = arith.constant 0 : index
    %84 = vector.load %arg10[%c0_91, %c0_92] : memref<1x256xf32, #tpu.memory_space<vmem>>, vector<1x256xf32>
    %85 = vector.broadcast %84 : vector<1x256xf32> to vector<32x256xf32>
    %86 = arith.addf %83, %85 : vector<32x256xf32>
    %cst_93 = arith.constant 0.000000e+00 : f32
    %87 = vector.broadcast %cst_93 : f32 to vector<32x256xf32>
    %88 = arith.maximumf %86, %87 : vector<32x256xf32>
    %c0_94 = arith.constant 0 : index
    %c0_95 = arith.constant 0 : index
    %89 = vector.load %arg11[%c0_94, %c0_95] : memref<256x128xf32, #tpu.memory_space<vmem>>, vector<256x128xf32>
    %cst_96 = arith.constant dense<0.000000e+00> : vector<32x128xf32>
    %90 = tpu.matmul %88, %89, %cst_96 {dimension_numbers = #tpu.dot_dimension_numbers<[1], [0], [0], [1], [0, 0, 1, 1], [], []>} : vector<32x256xf32>, vector<256x128xf32>, vector<32x128xf32> -> vector<32x128xf32>
    %c0_97 = arith.constant 0 : index
    %c0_98 = arith.constant 0 : index
    %91 = vector.load %arg12[%c0_97, %c0_98] : memref<256x128xf32, #tpu.memory_space<vmem>>, vector<256x128xf32>
    %cst_99 = arith.constant dense<0.000000e+00> : vector<32x128xf32>
    %92 = tpu.matmul %88, %91, %cst_99 {dimension_numbers = #tpu.dot_dimension_numbers<[1], [0], [0], [1], [0, 0, 1, 1], [], []>} : vector<32x256xf32>, vector<256x128xf32>, vector<32x128xf32> -> vector<32x128xf32>
    %93 = arith.maximumf %90, %92 : vector<32x128xf32>
    %c0_100 = arith.constant 0 : index
    %c0_101 = arith.constant 0 : index
    %94 = vector.load %arg13[%c0_100, %c0_101] : memref<16x32xf32, #tpu.memory_space<vmem>>, vector<16x32xf32>
    %cst_102 = arith.constant dense<0.000000e+00> : vector<16x128xf32>
    %95 = tpu.matmul %94, %93, %cst_102 {dimension_numbers = #tpu.dot_dimension_numbers<[1], [0], [0], [1], [0, 0, 1, 1], [], []>} : vector<16x32xf32>, vector<32x128xf32>, vector<16x128xf32> -> vector<16x128xf32>
    %c0_103 = arith.constant 0 : index
    %c0_104 = arith.constant 0 : index
    %96 = vector.load %arg14[%c0_103, %c0_104] : memref<16x32xf32, #tpu.memory_space<vmem>>, vector<16x32xf32>
    %cst_105 = arith.constant dense<0.000000e+00> : vector<16x128xf32>
    %97 = tpu.matmul %96, %93, %cst_105 {dimension_numbers = #tpu.dot_dimension_numbers<[1], [0], [0], [1], [0, 0, 1, 1], [], []>} : vector<16x32xf32>, vector<32x128xf32>, vector<16x128xf32> -> vector<16x128xf32>
    %98 = arith.maximumf %95, %97 : vector<16x128xf32>
    %c0_106 = arith.constant 0 : index
    %c0_107 = arith.constant 0 : index
    %c0_108 = arith.constant 0 : index
    %99 = vector.load %arg15[%c0_106, %c0_107, %c0_108] : memref<8x2x16xf32, #tpu.memory_space<vmem>>, vector<1x2x16xf32>
    %100 = vector.shape_cast %99 : vector<1x2x16xf32> to vector<2x16xf32>
    %cst_109 = arith.constant dense<0.000000e+00> : vector<2x128xf32>
    %101 = tpu.matmul %100, %98, %cst_109 {dimension_numbers = #tpu.dot_dimension_numbers<[1], [0], [0], [1], [0, 0, 1, 1], [], []>} : vector<2x16xf32>, vector<16x128xf32>, vector<2x128xf32> -> vector<2x128xf32>
    %c0_110 = arith.constant 0 : index
    %c0_111 = arith.constant 0 : index
    %c0_112 = arith.constant 0 : index
    %102 = vector.load %arg16[%c0_110, %c0_111, %c0_112] : memref<8x128x120xf32, #tpu.memory_space<vmem>>, vector<1x128x120xf32>
    %103 = vector.shape_cast %102 : vector<1x128x120xf32> to vector<128x120xf32>
    %cst_113 = arith.constant dense<0.000000e+00> : vector<2x120xf32>
    %104 = tpu.matmul %101, %103, %cst_113 {dimension_numbers = #tpu.dot_dimension_numbers<[1], [0], [0], [1], [0, 0, 1, 1], [], []>} : vector<2x128xf32>, vector<128x120xf32>, vector<2x120xf32> -> vector<2x120xf32>
    %c1_114 = arith.constant 1 : index
    %c0_115 = arith.constant 0 : index
    %c0_116 = arith.constant 0 : index
    %105 = vector.load %arg15[%c1_114, %c0_115, %c0_116] : memref<8x2x16xf32, #tpu.memory_space<vmem>>, vector<1x2x16xf32>
    %106 = vector.shape_cast %105 : vector<1x2x16xf32> to vector<2x16xf32>
    %cst_117 = arith.constant dense<0.000000e+00> : vector<2x128xf32>
    %107 = tpu.matmul %106, %98, %cst_117 {dimension_numbers = #tpu.dot_dimension_numbers<[1], [0], [0], [1], [0, 0, 1, 1], [], []>} : vector<2x16xf32>, vector<16x128xf32>, vector<2x128xf32> -> vector<2x128xf32>
    %c1_118 = arith.constant 1 : index
    %c0_119 = arith.constant 0 : index
    %c0_120 = arith.constant 0 : index
    %108 = vector.load %arg16[%c1_118, %c0_119, %c0_120] : memref<8x128x120xf32, #tpu.memory_space<vmem>>, vector<1x128x120xf32>
    %109 = vector.shape_cast %108 : vector<1x128x120xf32> to vector<128x120xf32>
    %cst_121 = arith.constant dense<0.000000e+00> : vector<2x120xf32>
    %110 = tpu.matmul %107, %109, %cst_121 {dimension_numbers = #tpu.dot_dimension_numbers<[1], [0], [0], [1], [0, 0, 1, 1], [], []>} : vector<2x128xf32>, vector<128x120xf32>, vector<2x120xf32> -> vector<2x120xf32>
    %111 = arith.addf %104, %110 : vector<2x120xf32>
    %c2_122 = arith.constant 2 : index
    %c0_123 = arith.constant 0 : index
    %c0_124 = arith.constant 0 : index
    %112 = vector.load %arg15[%c2_122, %c0_123, %c0_124] : memref<8x2x16xf32, #tpu.memory_space<vmem>>, vector<1x2x16xf32>
    %113 = vector.shape_cast %112 : vector<1x2x16xf32> to vector<2x16xf32>
    %cst_125 = arith.constant dense<0.000000e+00> : vector<2x128xf32>
    %114 = tpu.matmul %113, %98, %cst_125 {dimension_numbers = #tpu.dot_dimension_numbers<[1], [0], [0], [1], [0, 0, 1, 1], [], []>} : vector<2x16xf32>, vector<16x128xf32>, vector<2x128xf32> -> vector<2x128xf32>
    %c2_126 = arith.constant 2 : index
    %c0_127 = arith.constant 0 : index
    %c0_128 = arith.constant 0 : index
    %115 = vector.load %arg16[%c2_126, %c0_127, %c0_128] : memref<8x128x120xf32, #tpu.memory_space<vmem>>, vector<1x128x120xf32>
    %116 = vector.shape_cast %115 : vector<1x128x120xf32> to vector<128x120xf32>
    %cst_129 = arith.constant dense<0.000000e+00> : vector<2x120xf32>
    %117 = tpu.matmul %114, %116, %cst_129 {dimension_numbers = #tpu.dot_dimension_numbers<[1], [0], [0], [1], [0, 0, 1, 1], [], []>} : vector<2x128xf32>, vector<128x120xf32>, vector<2x120xf32> -> vector<2x120xf32>
    %118 = arith.addf %111, %117 : vector<2x120xf32>
    %c3_130 = arith.constant 3 : index
    %c0_131 = arith.constant 0 : index
    %c0_132 = arith.constant 0 : index
    %119 = vector.load %arg15[%c3_130, %c0_131, %c0_132] : memref<8x2x16xf32, #tpu.memory_space<vmem>>, vector<1x2x16xf32>
    %120 = vector.shape_cast %119 : vector<1x2x16xf32> to vector<2x16xf32>
    %cst_133 = arith.constant dense<0.000000e+00> : vector<2x128xf32>
    %121 = tpu.matmul %120, %98, %cst_133 {dimension_numbers = #tpu.dot_dimension_numbers<[1], [0], [0], [1], [0, 0, 1, 1], [], []>} : vector<2x16xf32>, vector<16x128xf32>, vector<2x128xf32> -> vector<2x128xf32>
    %c3_134 = arith.constant 3 : index
    %c0_135 = arith.constant 0 : index
    %c0_136 = arith.constant 0 : index
    %122 = vector.load %arg16[%c3_134, %c0_135, %c0_136] : memref<8x128x120xf32, #tpu.memory_space<vmem>>, vector<1x128x120xf32>
    %123 = vector.shape_cast %122 : vector<1x128x120xf32> to vector<128x120xf32>
    %cst_137 = arith.constant dense<0.000000e+00> : vector<2x120xf32>
    %124 = tpu.matmul %121, %123, %cst_137 {dimension_numbers = #tpu.dot_dimension_numbers<[1], [0], [0], [1], [0, 0, 1, 1], [], []>} : vector<2x128xf32>, vector<128x120xf32>, vector<2x120xf32> -> vector<2x120xf32>
    %125 = arith.addf %118, %124 : vector<2x120xf32>
    %c4_138 = arith.constant 4 : index
    %c0_139 = arith.constant 0 : index
    %c0_140 = arith.constant 0 : index
    %126 = vector.load %arg15[%c4_138, %c0_139, %c0_140] : memref<8x2x16xf32, #tpu.memory_space<vmem>>, vector<1x2x16xf32>
    %127 = vector.shape_cast %126 : vector<1x2x16xf32> to vector<2x16xf32>
    %cst_141 = arith.constant dense<0.000000e+00> : vector<2x128xf32>
    %128 = tpu.matmul %127, %98, %cst_141 {dimension_numbers = #tpu.dot_dimension_numbers<[1], [0], [0], [1], [0, 0, 1, 1], [], []>} : vector<2x16xf32>, vector<16x128xf32>, vector<2x128xf32> -> vector<2x128xf32>
    %c4_142 = arith.constant 4 : index
    %c0_143 = arith.constant 0 : index
    %c0_144 = arith.constant 0 : index
    %129 = vector.load %arg16[%c4_142, %c0_143, %c0_144] : memref<8x128x120xf32, #tpu.memory_space<vmem>>, vector<1x128x120xf32>
    %130 = vector.shape_cast %129 : vector<1x128x120xf32> to vector<128x120xf32>
    %cst_145 = arith.constant dense<0.000000e+00> : vector<2x120xf32>
    %131 = tpu.matmul %128, %130, %cst_145 {dimension_numbers = #tpu.dot_dimension_numbers<[1], [0], [0], [1], [0, 0, 1, 1], [], []>} : vector<2x128xf32>, vector<128x120xf32>, vector<2x120xf32> -> vector<2x120xf32>
    %132 = arith.addf %125, %131 : vector<2x120xf32>
    %c5 = arith.constant 5 : index
    %c0_146 = arith.constant 0 : index
    %c0_147 = arith.constant 0 : index
    %133 = vector.load %arg15[%c5, %c0_146, %c0_147] : memref<8x2x16xf32, #tpu.memory_space<vmem>>, vector<1x2x16xf32>
    %134 = vector.shape_cast %133 : vector<1x2x16xf32> to vector<2x16xf32>
    %cst_148 = arith.constant dense<0.000000e+00> : vector<2x128xf32>
    %135 = tpu.matmul %134, %98, %cst_148 {dimension_numbers = #tpu.dot_dimension_numbers<[1], [0], [0], [1], [0, 0, 1, 1], [], []>} : vector<2x16xf32>, vector<16x128xf32>, vector<2x128xf32> -> vector<2x128xf32>
    %c5_149 = arith.constant 5 : index
    %c0_150 = arith.constant 0 : index
    %c0_151 = arith.constant 0 : index
    %136 = vector.load %arg16[%c5_149, %c0_150, %c0_151] : memref<8x128x120xf32, #tpu.memory_space<vmem>>, vector<1x128x120xf32>
    %137 = vector.shape_cast %136 : vector<1x128x120xf32> to vector<128x120xf32>
    %cst_152 = arith.constant dense<0.000000e+00> : vector<2x120xf32>
    %138 = tpu.matmul %135, %137, %cst_152 {dimension_numbers = #tpu.dot_dimension_numbers<[1], [0], [0], [1], [0, 0, 1, 1], [], []>} : vector<2x128xf32>, vector<128x120xf32>, vector<2x120xf32> -> vector<2x120xf32>
    %139 = arith.addf %132, %138 : vector<2x120xf32>
    %c6 = arith.constant 6 : index
    %c0_153 = arith.constant 0 : index
    %c0_154 = arith.constant 0 : index
    %140 = vector.load %arg15[%c6, %c0_153, %c0_154] : memref<8x2x16xf32, #tpu.memory_space<vmem>>, vector<1x2x16xf32>
    %141 = vector.shape_cast %140 : vector<1x2x16xf32> to vector<2x16xf32>
    %cst_155 = arith.constant dense<0.000000e+00> : vector<2x128xf32>
    %142 = tpu.matmul %141, %98, %cst_155 {dimension_numbers = #tpu.dot_dimension_numbers<[1], [0], [0], [1], [0, 0, 1, 1], [], []>} : vector<2x16xf32>, vector<16x128xf32>, vector<2x128xf32> -> vector<2x128xf32>
    %c6_156 = arith.constant 6 : index
    %c0_157 = arith.constant 0 : index
    %c0_158 = arith.constant 0 : index
    %143 = vector.load %arg16[%c6_156, %c0_157, %c0_158] : memref<8x128x120xf32, #tpu.memory_space<vmem>>, vector<1x128x120xf32>
    %144 = vector.shape_cast %143 : vector<1x128x120xf32> to vector<128x120xf32>
    %cst_159 = arith.constant dense<0.000000e+00> : vector<2x120xf32>
    %145 = tpu.matmul %142, %144, %cst_159 {dimension_numbers = #tpu.dot_dimension_numbers<[1], [0], [0], [1], [0, 0, 1, 1], [], []>} : vector<2x128xf32>, vector<128x120xf32>, vector<2x120xf32> -> vector<2x120xf32>
    %146 = arith.addf %139, %145 : vector<2x120xf32>
    %c7 = arith.constant 7 : index
    %c0_160 = arith.constant 0 : index
    %c0_161 = arith.constant 0 : index
    %147 = vector.load %arg15[%c7, %c0_160, %c0_161] : memref<8x2x16xf32, #tpu.memory_space<vmem>>, vector<1x2x16xf32>
    %148 = vector.shape_cast %147 : vector<1x2x16xf32> to vector<2x16xf32>
    %cst_162 = arith.constant dense<0.000000e+00> : vector<2x128xf32>
    %149 = tpu.matmul %148, %98, %cst_162 {dimension_numbers = #tpu.dot_dimension_numbers<[1], [0], [0], [1], [0, 0, 1, 1], [], []>} : vector<2x16xf32>, vector<16x128xf32>, vector<2x128xf32> -> vector<2x128xf32>
    %c7_163 = arith.constant 7 : index
    %c0_164 = arith.constant 0 : index
    %c0_165 = arith.constant 0 : index
    %150 = vector.load %arg16[%c7_163, %c0_164, %c0_165] : memref<8x128x120xf32, #tpu.memory_space<vmem>>, vector<1x128x120xf32>
    %151 = vector.shape_cast %150 : vector<1x128x120xf32> to vector<128x120xf32>
    %cst_166 = arith.constant dense<0.000000e+00> : vector<2x120xf32>
    %152 = tpu.matmul %149, %151, %cst_166 {dimension_numbers = #tpu.dot_dimension_numbers<[1], [0], [0], [1], [0, 0, 1, 1], [], []>} : vector<2x128xf32>, vector<128x120xf32>, vector<2x120xf32> -> vector<2x120xf32>
    %153 = arith.addf %146, %152 : vector<2x120xf32>
    %c0_167 = arith.constant 0 : index
    %c0_168 = arith.constant 0 : index
    %154 = vector.load %arg17[%c0_167, %c0_168] : memref<1x120xf32, #tpu.memory_space<vmem>>, vector<1x120xf32>
    %155 = vector.broadcast %154 : vector<1x120xf32> to vector<2x120xf32>
    %156 = arith.addf %153, %155 : vector<2x120xf32>
    %cst_169 = arith.constant 0.000000e+00 : f32
    %157 = vector.broadcast %cst_169 : f32 to vector<2x120xf32>
    %158 = arith.maximumf %156, %157 : vector<2x120xf32>
    %c0_170 = arith.constant 0 : index
    %c0_171 = arith.constant 0 : index
    %159 = vector.load %arg18[%c0_170, %c0_171] : memref<120x84xf32, #tpu.memory_space<vmem>>, vector<120x84xf32>
    %cst_172 = arith.constant dense<0.000000e+00> : vector<2x84xf32>
    %160 = tpu.matmul %158, %159, %cst_172 {dimension_numbers = #tpu.dot_dimension_numbers<[1], [0], [0], [1], [0, 0, 1, 1], [], []>} : vector<2x120xf32>, vector<120x84xf32>, vector<2x84xf32> -> vector<2x84xf32>
    %c0_173 = arith.constant 0 : index
    %c0_174 = arith.constant 0 : index
    %161 = vector.load %arg19[%c0_173, %c0_174] : memref<1x84xf32, #tpu.memory_space<vmem>>, vector<1x84xf32>
    %162 = vector.broadcast %161 : vector<1x84xf32> to vector<2x84xf32>
    %163 = arith.addf %160, %162 : vector<2x84xf32>
    %cst_175 = arith.constant dense<0xFF800000> : vector<2xf32>
    %164 = vector.multi_reduction <maximumf>, %163, %cst_175 [1] : vector<2x84xf32> to vector<2xf32>
    %165 = vector.shape_cast %164 : vector<2xf32> to vector<2x1xf32>
    %166 = vector.broadcast %165 : vector<2x1xf32> to vector<2x84xf32>
    %167 = arith.subf %163, %166 : vector<2x84xf32>
    %168 = math.exp %167 : vector<2x84xf32>
    %cst_176 = arith.constant dense<0.000000e+00> : vector<2xf32>
    %169 = vector.multi_reduction <add>, %168, %cst_176 [1] : vector<2x84xf32> to vector<2xf32>
    %170 = vector.shape_cast %169 : vector<2xf32> to vector<2x1xf32>
    %171 = math.log %170 : vector<2x1xf32>
    %172 = vector.broadcast %171 : vector<2x1xf32> to vector<2x84xf32>
    %173 = arith.subf %167, %172 : vector<2x84xf32>
    %c0_177 = arith.constant 0 : index
    %c0_178 = arith.constant 0 : index
    %174 = vector.load %arg20[%c0_177, %c0_178] : memref<2x84xf32, #tpu.memory_space<vmem>>, vector<2x84xf32>
    tpu.vector_store %arg20[%c0_177, %c0_178], %173 {strides = array<i32>} : memref<2x84xf32, #tpu.memory_space<vmem>>, vector<2x84xf32>,
    return
  }
}

</mosaic_0001>

<bundles_post_ra>
// kernel: lenet5_forward.1
= control target key start
LH: loop header
LB: loop body
LE: loop exit
PB: predicated region body
PF: predicated region fallthrough
CT: control target
= control target key end

     0   :  { %s9844_s0 = inlined_call_operand.vmem [shape: f32[64,32], index: 0, kind: input, shape index: {}]   ;;  %s9845_s1 = inlined_call_operand.vmem [shape: f32[5,64,64], index: 1, kind: input, shape index: {}]   ;;  %s9846_s2 = inlined_call_operand.vmem [shape: f32[5,32,192], index: 2, kind: input, shape index: {}]   ;;  %s9847_s3 = inlined_call_operand.vmem [shape: f32[1,192], index: 3, kind: input, shape index: {}]   ;;  %s9848_s4 = inlined_call_operand.hbm [shape: f32[192,96], index: 4, kind: input, shape index: {}]   ;;  %s9849_s5 = inlined_call_operand.hbm [shape: f32[192,96], index: 5, kind: input, shape index: {}]   ;;  %s9850_s6 = inlined_call_operand.vmem [shape: f32[32,64], index: 6, kind: input, shape index: {}]   ;;  %s9851_s7 = inlined_call_operand.hbm [shape: f32[32,64], index: 7, kind: input, shape index: {}]   ;;  %s9852_s8 = inlined_call_operand.hbm [shape: f32[5,32,32], index: 8, kind: input, shape index: {}]   ;;  %s9853_s9 = inlined_call_operand.vmem [shape: f32[5,96,256], index: 9, kind: input, shape index: {}]   ;;  %s9854_s10 = inlined_call_operand.vmem [shape: f32[1,256], index: 10, kind: input, shape index: {}]   ;;  %s9855_s11 = inlined_call_operand.vmem [shape: f32[256,128], index: 11, kind: input, shape index: {}]   ;;  %s9856_s12 = inlined_call_operand.vmem [shape: f32[256,128], index: 12, kind: input, shape index: {}]   ;;  %s9857_s13 = inlined_call_operand.vmem [shape: f32[16,32], index: 13, kind: input, shape index: {}]   ;;  %s9858_s14 = inlined_call_operand.vmem [shape: f32[16,32], index: 14, kind: input, shape index: {}]   ;;  %s9859_s15 = inlined_call_operand.hbm [shape: f32[8,2,16], index: 15, kind: input, shape index: {}]   ;;  %s9860_s16 = inlined_call_operand.vmem [shape: f32[8,128,120], index: 16, kind: input, shape index: {}]   ;;  %s9861_s17 = inlined_call_operand.vmem [shape: f32[1,120], index: 17, kind: input, shape index: {}]   ;;  %s9862_s18 = inlined_call_operand.vmem [shape: f32[120,84], index: 18, kind: input, shape index: {}]   ;;  %s9863_s19 = inlined_call_operand.vmem [shape: f32[1,84], index: 19, kind: input, shape index: {}]   ;;  %s9864_s20 = inlined_call_operand.hbm [shape: f32[2,84], index: 20, kind: output, shape index: {}]  }
   0x1   :  { %9870 = sst [smem:[#allocation16_spill]] %s9844_s0 }
   0x2   :  { %9871 = sst [smem:[#allocation17_spill]] %s9845_s1 }
   0x3   :  { %9872 = sst [smem:[#allocation18_spill]] %s9846_s2 }
   0x4   :  { %9873 = sst [smem:[#allocation19_spill]] %s9847_s3 }
   0x5   :  { %9874 = sst [smem:[#allocation20_spill]] %s9848_s4 }
   0x6   :  { %9875 = sst [smem:[#allocation21_spill]] %s9864_s20 }
   0x7   :  { %25 = vsyncpa [#allocation3], 0 }
   0x8   :  { %26 = vsyncpa [#allocation6], 0 }
   0x9   :  { %27 = vsyncpa [#allocation9], 0 }
   0xa   :  { %28 = vsyncpa [#allocation4], 0  ;;  %s7634_s1 = smov [#allocation5]   ;;  %s7635_s23 = smov [#allocation8]  }
   0xb   :  { %s54_s22 = sshll.u32 %s7634_s1, 4  ;;  %s80_s24 = sshll.u32 %s7635_s23, 4  ;;  %s55_s22 = int_to_ptr.vmem [resolvable:$true] %s54_s22  ;;  %s7752_s24 = int_to_ptr.vmem [resolvable:$true] %s80_s24 }
   0xc   :  { %s7494_s3 = scalar_lea.hbm %s9849_s5, 3072 }
   0xd   :  { %p7495_p0 = scmp.ne.s32.totalorder %s9849_s5, %s7494_s3  ;;  %p7498_p1 = scmp.lt.u32.totalorder %s7494_s3, %s9849_s5 }
   0xf   :  { %p7500_p2 = pnand %p7498_p1, %p7495_p0 }
  0x11   :  { %7503 = shalt.err (!%p7500_p2)
}
  0x12   :  { %s7504_s29 = scalar_lea.vmem %s55_s22, 3072  ;;  %p7509_p4 = scmp.lt.s32.totalorder %s55_s22, %s55_s22 }
  0x13   :  { %p7505_p3 = scmp.ne.s32.totalorder %s55_s22, %s7504_s29  ;;  %p7510_p5 = scmp.lt.s32.totalorder %s7504_s29, %s7504_s29 }
  0x15   :  { %p7511_p6 = por %p7510_p5, %p7509_p4 }
  0x17   :  { %p7512_p7 = pnand %p7511_p6, %p7505_p3 }
  0x19   :  { %7515 = shalt.err (!%p7512_p7)
}
  0x1a   :  { %s7636_s30 = smov 128   ;;  %s7637_s0 = smov 8  }
  0x1b   :  { %60 = dma.hbm_to_vmem [thread:$0]  %s9849_s5, 3072, %s55_s22, [#allocation6], %s7636_s30, %s7636_s30, %s7637_s0  }
  0x1c   :  { %s7516_s25 = scalar_lea.hbm %s9852_s8, 2560 }
  0x1d   :  { %p7517_p8 = scmp.ne.s32.totalorder %s9852_s8, %s7516_s25  ;;  %p7520_p9 = scmp.lt.u32.totalorder %s7516_s25, %s9852_s8 }
  0x1f   :  { %p7522_p10 = pnand %p7520_p9, %p7517_p8 }
  0x21   :  { %7525 = shalt.err (!%p7522_p10)
}
  0x22   :  { %s7526_s4 = scalar_lea.vmem %s7752_s24, 2560  ;;  %p7531_p12 = scmp.lt.s32.totalorder %s7752_s24, %s7752_s24 }
  0x23   :  { %p7527_p11 = scmp.ne.s32.totalorder %s7752_s24, %s7526_s4  ;;  %p7532_p13 = scmp.lt.s32.totalorder %s7526_s4, %s7526_s4 }
  0x25   :  { %p7533_p0 = por %p7532_p13, %p7531_p12 }
  0x27   :  { %p7534_p1 = pnand %p7533_p0, %p7527_p11 }
  0x29   :  { %7537 = shalt.err (!%p7534_p1)
}
  0x2a   :  { %86 = dma.hbm_to_vmem [thread:$0]  %s9852_s8, 2560, %s7752_s24, [#allocation9], %s7636_s30, %s7636_s30, %s7637_s0  }
  0x2b   :  { %s7638_s29 = smov [#allocation2]   ;;  %s7639_s1 = smov [#allocation7]  }
  0x2c   :  { %s42_s21 = sshll.u32 %s7638_s29, 4  ;;  %s68_s23 = sshll.u32 %s7639_s1, 4  ;;  %s43_s21 = int_to_ptr.vmem [resolvable:$true] %s42_s21  ;;  %s7789_s23 = int_to_ptr.vmem [resolvable:$true] %s68_s23 }
  0x2d   :  { %s9876_s3 = sld [smem:[#allocation20_spill]] }
  0x33   :  { %s7538_s26 = scalar_lea.hbm %s9876_s3, 3072 }
  0x34   :  { %p7539_p2 = scmp.ne.s32.totalorder %s9876_s3, %s7538_s26  ;;  %p7542_p3 = scmp.lt.u32.totalorder %s7538_s26, %s9876_s3 }
  0x36   :  { %p7544_p4 = pnand %p7542_p3, %p7539_p2 }
  0x38   :  { %7547 = shalt.err (!%p7544_p4)
}
  0x39   :  { %s7548_s8 = scalar_lea.vmem %s43_s21, 3072  ;;  %p7553_p6 = scmp.lt.s32.totalorder %s43_s21, %s43_s21 }
  0x3a   :  { %p7549_p5 = scmp.ne.s32.totalorder %s43_s21, %s7548_s8  ;;  %p7554_p7 = scmp.lt.s32.totalorder %s7548_s8, %s7548_s8 }
  0x3c   :  { %p7555_p8 = por %p7554_p7, %p7553_p6 }
  0x3e   :  { %p7556_p9 = pnand %p7555_p8, %p7549_p5 }
  0x40   :  { %7559 = shalt.err (!%p7556_p9)
}
  0x41   :  { %48 = dma.hbm_to_vmem [thread:$0]  %s9876_s3, 3072, %s43_s21, [#allocation3], %s7636_s30, %s7636_s30, %s7637_s0  }
  0x42   :  { %s7560_s20 = scalar_lea.hbm %s9851_s7, 512 }
  0x43   :  { %p7561_p10 = scmp.ne.s32.totalorder %s9851_s7, %s7560_s20  ;;  %p7564_p11 = scmp.lt.u32.totalorder %s7560_s20, %s9851_s7 }
  0x45   :  { %p7566_p12 = pnand %p7564_p11, %p7561_p10 }
  0x47   :  { %7569 = shalt.err (!%p7566_p12)
}
  0x48   :  { %s7570_s27 = scalar_lea.vmem %s7789_s23, 512  ;;  %p7575_p0 = scmp.lt.s32.totalorder %s7789_s23, %s7789_s23 }
  0x49   :  { %p7571_p13 = scmp.ne.s32.totalorder %s7789_s23, %s7570_s27  ;;  %p7576_p1 = scmp.lt.s32.totalorder %s7570_s27, %s7570_s27 }
  0x4b   :  { %p7577_p2 = por %p7576_p1, %p7575_p0 }
  0x4d   :  { %p7578_p3 = pnand %p7577_p2, %p7571_p13 }
  0x4f   :  { %7581 = shalt.err (!%p7578_p3)
}
  0x50   :  { %74 = dma.hbm_to_vmem [thread:$0]  %s9851_s7, 512, %s7789_s23, [#allocation6], %s7636_s30, %s7636_s30, %s7637_s0  }
  0x51   :  { %s7640_s28 = smov [#allocation10]   ;;  %s7582_s5 = scalar_lea.hbm %s9859_s15, 256 }
  0x52   :  { %s104_s4 = sshll.u32 %s7640_s28, 4  ;;  %p7583_p4 = scmp.ne.s32.totalorder %s9859_s15, %s7582_s5  ;;  %s105_s4 = int_to_ptr.vmem [resolvable:$true] %s104_s4 }
  0x53   :  { %p7586_p5 = scmp.lt.u32.totalorder %s7582_s5, %s9859_s15 }
  0x55   :  { %p7588_p6 = pnand %p7586_p5, %p7583_p4 }
  0x57   :  { %7591 = shalt.err (!%p7588_p6)
}
  0x58   :  { %s7592_s2 = scalar_lea.vmem %s105_s4, 256  ;;  %p7597_p8 = scmp.lt.s32.totalorder %s105_s4, %s105_s4 }
  0x59   :  { %p7593_p7 = scmp.ne.s32.totalorder %s105_s4, %s7592_s2  ;;  %p7598_p9 = scmp.lt.s32.totalorder %s7592_s2, %s7592_s2 }
  0x5b   :  { %p7599_p10 = por %p7598_p9, %p7597_p8 }
  0x5d   :  { %p7600_p11 = pnand %p7599_p10, %p7593_p7 }
  0x5f   :  { %7603 = shalt.err (!%p7600_p11)
}
  0x60   :  { %s7641_s7 = smov 32   ;;  %s7642_s30 = smov 2  }
  0x61   :  { %110 = dma.hbm_to_vmem [thread:$0]  %s9859_s15, 256, %s105_s4, [#allocation9], %s7641_s7, %s7641_s7, %s7642_s30  }
  0x62   :  { %7626 = dma.done.wait [#allocation3], 3072  }
  0x63   :  { %7627 = vsyncadd [#allocation3], 4294964224 }
  0x64   :  { %7628 = dma.done.wait [#allocation6], 3584  }
  0x65   :  { %7629 = vsyncadd [#allocation6], 4294963712 }
  0x66   :  { %7630 = dma.done.wait [#allocation9], 2816  }
  0x67   :  { %7631 = vsyncadd [#allocation9], 4294964480  ;;  %s9877_s27 = sld [smem:[#allocation16_spill]]  ;;  %vm150_vm0 = vcmask 523264   ;;  %s9878_s2 = sld [smem:[#allocation17_spill]]  ;;  %vm435_vm1 = vcmask 261120  }
  0x68   :  { %s9879_s5 = sld [smem:[#allocation18_spill]]  ;;  %s9880_s29 = sld [smem:[#allocation19_spill]]  ;;  %vm2402_vm2 = vcmask 785408   ;;  %vm7645_vm3 = vmmov 0   ;;  %vm3748_vm4 = vcmask 130048   ;;  %vm5079_vm5 = vcmask 982016  }
  0x69   :  { %vm5153_vm6 = vcmask 680960  }
  0x6d   :  { %v134_v0 = vld [vmem:[%s9877_s27] sm:$0xff]  ;;  %v135_v1 = vld [vmem:[%s9877_s27 + $0x8] sm:$0xff]  ;;  %v136_v2 = vld [vmem:[%s9877_s27 + $0x10] sm:$0xff] }
  0x6e   :  { %v7847_v3 = vpack.c.bf16 %v135_v1, %v134_v0  ;;  %v137_v4 = vld [vmem:[%s9877_s27 + $0x18] sm:$0xff]  ;;  %v138_v6 = vld [vmem:[%s9877_s27 + $0x20] sm:$0xff]  ;;  %v139_v7 = vld [vmem:[%s9877_s27 + $0x28] sm:$0xff]  ;;  %v7643_v0 = vmov 0.0  }
  0x6f   :  { %v7852_v5 = vpack.c.bf16 %v137_v4, %v136_v2  ;;  %v5192_v8 = vld [vmem:[%s9878_s2 + $0x40] sm:$0xff]  ;;  %v7868_v9 = vpack.c.bf16 %v139_v7, %v138_v6  ;;  %v140_v11 = vld [vmem:[%s9877_s27 + $0x30] sm:$0xff]  ;;  %v141_v12 = vld [vmem:[%s9877_s27 + $0x38] sm:$0xff] }
  0x70   :  { %6697 = vmatprep.subr.bf16.mxu1 %v7847_v3  ;;  %6079 = vmatprep.mubr.msk.f32.mxu1 %vm150_vm0, %v5192_v8  ;;  %v142_v10 = vld [vmem:[%s9878_s2] sm:$0xff]  ;;  %v7884_v13 = vpack.c.bf16 %v141_v12, %v140_v11  ;;  %v5193_v14 = vld [vmem:[%s9878_s2 + $0x48] sm:$0xff]  ;;  %v5194_v15 = vld [vmem:[%s9878_s2 + $0x50] sm:$0xff] }
  0x71   :  { %6699 = vmatpush3.bf16.msra.mxu1 %v7847_v3  ;;  %6681 = vmatprep.subr.bf16.mxu0 %v7847_v3  ;;  %v143_v16 = vld [vmem:[%s9878_s2 + $0x8] sm:$0xff]  ;;  %v5211_v18 = vld [vmem:[%s9879_s5 + $0x58] sm:$0xff]  ;;  %v5208_v19 = vld [vmem:[%s9879_s5 + $0x40] sm:$0xff] }
  0x72   :  { %6701 = vmatprep.subr.bf16.mxu1 %v7852_v5  ;;  %6683 = vmatpush3.bf16.msra.mxu0 %v7847_v3  ;;  %v5209_v17 = vld [vmem:[%s9879_s5 + $0x48] sm:$0xff]  ;;  %v5210_v21 = vld [vmem:[%s9879_s5 + $0x50] sm:$0xff]  ;;  %v5215_v23 = vld [vmem:[%s9879_s5 + $0x78] sm:$0xff] }
  0x73   :  { %6685 = vmatprep.subr.bf16.mxu0 %v7852_v5  ;;  %6051 = vmatprep.mubr.msk.f32.mxu0 %vm150_vm0, %v142_v10  ;;  %v6712_v20 = vpack.c.bf16 %v5211_v18, %v5209_v17  ;;  %v5213_v22 = vld [vmem:[%s9879_s5 + $0x68] sm:$0xff]  ;;  %v144_v24 = vld [vmem:[%s9878_s2 + $0x10] sm:$0xff]  ;;  %v6714_v25 = vpack.c.bf16 %v5210_v21, %v5208_v19  ;;  %v5212_v27 = vld [vmem:[%s9879_s5 + $0x60] sm:$0xff] }
  0x74   :  { %v6716_v26 = vpack.c.bf16 %v5215_v23, %v5213_v22  ;;  %v5214_v28 = vld [vmem:[%s9879_s5 + $0x70] sm:$0xff]  ;;  %v5195_v29 = vld [vmem:[%s9878_s2 + $0x58] sm:$0xff]  ;;  %v5196_v30 = vld [vmem:[%s9878_s2 + $0x60] sm:$0xff] }
  0x75   :  { %6703 = vmatpush3.bf16.msra.mxu1 %v7852_v5  ;;  %v145_v31 = vld [vmem:[%s9878_s2 + $0x18] sm:$0xff]  ;;  %v146_v32 = vld [vmem:[%s9878_s2 + $0x20] sm:$0xff]  ;;  %v6718_v33 = vpack.c.bf16 %v5214_v28, %v5212_v27  ;;  %v5197_v34 = vld [vmem:[%s9878_s2 + $0x68] sm:$0xff] }
  0x76   :  { %6705 = vmatprep.subr.bf16.mxu1 %v7868_v9  ;;  %6687 = vmatpush3.bf16.msra.mxu0 %v7852_v5  ;;  %v5198_v35 = vld [vmem:[%s9878_s2 + $0x70] sm:$0xff]  ;;  %v147_v36 = vld [vmem:[%s9878_s2 + $0x28] sm:$0xff]  ;;  %v5199_v38 = vld [vmem:[%s9878_s2 + $0x78] sm:$0xff] }
  0x77   :  { %6689 = vmatprep.subr.bf16.mxu0 %v7868_v9  ;;  %v148_v37 = vld [vmem:[%s9878_s2 + $0x30] sm:$0xff]  ;;  %v149_v39 = vld [vmem:[%s9878_s2 + $0x38] sm:$0xff]  ;;  %v5232_v40 = vld [vmem:[%s9878_s2 + $0x80] sm:$0xff] }
  0x78   :  { %v5233_v41 = vld [vmem:[%s9878_s2 + $0x88] sm:$0xff]  ;;  %v5234_v42 = vld [vmem:[%s9878_s2 + $0x90] sm:$0xff]  ;;  %v5235_v43 = vld [vmem:[%s9878_s2 + $0x98] sm:$0xff] }
  0x79   :  { %6707 = vmatpush3.bf16.msra.mxu1 %v7868_v9  ;;  %v5236_v44 = vld [vmem:[%s9878_s2 + $0xa0] sm:$0xff]  ;;  %v5237_v45 = vld [vmem:[%s9878_s2 + $0xa8] sm:$0xff]  ;;  %v5238_v46 = vld [vmem:[%s9878_s2 + $0xb0] sm:$0xff] }
  0x7a   :  { %6709 = vmatprep.subr.bf16.mxu1 %v7884_v13  ;;  %6691 = vmatpush3.bf16.msra.mxu0 %v7868_v9  ;;  %v5239_v47 = vld [vmem:[%s9878_s2 + $0xb8] sm:$0xff]  ;;  %v5264_v48 = vld [vmem:[%s9878_s2 + $0xc0] sm:$0xff]  ;;  %v5265_v49 = vld [vmem:[%s9878_s2 + $0xc8] sm:$0xff] }
  0x7b   :  { %6693 = vmatprep.subr.bf16.mxu0 %v7884_v13  ;;  %v5266_v50 = vld [vmem:[%s9878_s2 + $0xd0] sm:$0xff]  ;;  %v5267_v51 = vld [vmem:[%s9878_s2 + $0xd8] sm:$0xff]  ;;  %v5268_v52 = vld [vmem:[%s9878_s2 + $0xe0] sm:$0xff] }
  0x7c   :  { %v5269_v53 = vld [vmem:[%s9878_s2 + $0xe8] sm:$0xff]  ;;  %v5270_v54 = vld [vmem:[%s9878_s2 + $0xf0] sm:$0xff]  ;;  %v5271_v55 = vld [vmem:[%s9878_s2 + $0xf8] sm:$0xff] }
  0x7d   :  { %6711 = vmatpush3.bf16.msra.mxu1 %v7884_v13  ;;  %v5296_v56 = vld [vmem:[%s9878_s2 + $0x100] sm:$0xff]  ;;  %v5297_v57 = vld [vmem:[%s9878_s2 + $0x108] sm:$0xff]  ;;  %v5298_v58 = vld [vmem:[%s9878_s2 + $0x110] sm:$0xff] }
  0x7e   :  { %6695 = vmatpush3.bf16.msra.mxu0 %v7884_v13  ;;  %6729 = vmatprep.subr.bf16.mxu1 %v7847_v3  ;;  %v5299_v59 = vld [vmem:[%s9878_s2 + $0x118] sm:$0xff]  ;;  %v5300_v60 = vld [vmem:[%s9878_s2 + $0x120] sm:$0xff]  ;;  %v5301_v61 = vld [vmem:[%s9878_s2 + $0x128] sm:$0xff] }
  0x7f   :  { %6713 = vmatprep.subr.bf16.mxu0 %v6712_v20  ;;  %v5302_v62 = vld [vmem:[%s9878_s2 + $0x130] sm:$0xff]  ;;  %v5303_v63 = vld [vmem:[%s9878_s2 + $0x138] sm:$0xff]  ;;  %v281_v1 = vld [vmem:[%s9879_s5 + $0x8] sm:$0xff] }
  0x80   :  { %6080 = vmatmul.mubr.msk.f32.vlgmr.msra.gmra.mrb[0].mxu1 %vm150_vm0, %v5193_v14  ;;  %v283_v2 = vld [vmem:[%s9879_s5 + $0x18] sm:$0xff]  ;;  %v280_v4 = vld [vmem:[%s9879_s5] sm:$0xff]  ;;  %v285_v6 = vld [vmem:[%s9879_s5 + $0x28] sm:$0xff] }
  0x81   :  { %6082 = vmatprep.mubr.msk.f32.mxu1 %vm150_vm0, %v5194_v15  ;;  %6052 = vmatmul.mubr.msk.f32.vlgmr.msra.gmra.mrb[0].mxu0 %vm150_vm0, %v143_v16  ;;  %v287_v7 = vld [vmem:[%s9879_s5 + $0x38] sm:$0xff]  ;;  %v284_v11 = vld [vmem:[%s9879_s5 + $0x20] sm:$0xff]  ;;  %v286_v12 = vld [vmem:[%s9879_s5 + $0x30] sm:$0xff] }
  0x82   :  { %6054 = vmatprep.mubr.msk.f32.mxu0 %vm150_vm0, %v144_v24  ;;  %6731 = vmatpush3.bf16.msra.mxu1 %v7847_v3  ;;  %v6724_v10 = vpack.c.bf16 %v287_v7, %v285_v6  ;;  %v5249_v15 = vld [vmem:[%s9879_s5 + $0x88] sm:$0xff]  ;;  %v5251_v16 = vld [vmem:[%s9879_s5 + $0x98] sm:$0xff]  ;;  %v6726_v18 = vpack.c.bf16 %v286_v12, %v284_v11 }
  0x83   :  { %6733 = vmatprep.subr.bf16.mxu1 %v7852_v5  ;;  %6715 = vmatpush1.bf16.msra.mxu0 %v6714_v25  ;;  %v6744_v20 = vpack.c.bf16 %v5251_v16, %v5249_v15 }
  0x84   :  { %6083 = vmatmul.mubr.msk.f32.gmra.mrb[2].mxu1 %vm150_vm0, %v5195_v29  ;;  %6717 = vmatprep.subr.bf16.mxu0 %v6716_v26 }
  0x85   :  { %6085 = vmatprep.mubr.msk.f32.mxu1 %vm150_vm0, %v5196_v30  ;;  %6055 = vmatmul.mubr.msk.f32.gmra.mrb[2].mxu0 %vm150_vm0, %v145_v31 }
  0x86   :  { %6057 = vmatprep.mubr.msk.f32.mxu0 %vm150_vm0, %v146_v32  ;;  %6735 = vmatpush3.bf16.msra.mxu1 %v7852_v5 }
  0x87   :  { %6737 = vmatprep.subr.bf16.mxu1 %v7868_v9  ;;  %6719 = vmatpush1.bf16.msra.mxu0 %v6718_v33 }
  0x88   :  { %6086 = vmatmul.mubr.msk.f32.gmra.mrb[4].mxu1 %vm150_vm0, %v5197_v34 }
  0x89   :  { %6088 = vmatprep.mubr.msk.f32.mxu1 %vm150_vm0, %v5198_v35  ;;  %6058 = vmatmul.mubr.msk.f32.gmra.mrb[4].mxu0 %vm150_vm0, %v147_v36 }
  0x8a   :  { %6060 = vmatprep.mubr.msk.f32.mxu0 %vm150_vm0, %v148_v37  ;;  %6739 = vmatpush3.bf16.msra.mxu1 %v7868_v9 }
  0x8b   :  { %6741 = vmatprep.subr.bf16.mxu1 %v7884_v13 }
  0x8c   :  { %6089 = vmatmul.mubr.msk.f32.gmra.mrb[6].mxu1 %vm150_vm0, %v5199_v38  ;;  %v5248_v38 = vld [vmem:[%s9879_s5 + $0x80] sm:$0xff] }
  0x8d   :  { %6061 = vmatmul.mubr.msk.f32.gmra.mrb[6].mxu0 %vm150_vm0, %v149_v39  ;;  %6107 = vmatprep.mubr.msk.f32.mxu1 %vm150_vm0, %v5232_v40  ;;  %v5250_v39 = vld [vmem:[%s9879_s5 + $0x90] sm:$0xff]  ;;  %v5253_v40 = vld [vmem:[%s9879_s5 + $0xa8] sm:$0xff] }
  0x8e   :  { %6743 = vmatpush3.bf16.msra.mxu1 %v7884_v13  ;;  %524 = vmatprep.mubr.f32.mxu0 %v7643_v0 }
  0x8f   :  { %6753 = vmatprep.subr.bf16.mxu1 %v7847_v3 }
  0x91   :  { %6108 = vmatmul.mubr.msk.f32.vlgmr.msra.gmra.mrb[8].mxu1 %vm150_vm0, %v5233_v41  ;;  %v5255_v41 = vld [vmem:[%s9879_s5 + $0xb8] sm:$0xff] }
  0x92   :  { %6110 = vmatprep.mubr.msk.f32.mxu1 %vm150_vm0, %v5234_v42  ;;  %6755 = vmatpush3.bf16.msra.mxu1 %v7847_v3 }
  0x93   :  { %6757 = vmatprep.subr.bf16.mxu1 %v7852_v5 }
  0x95   :  { %6111 = vmatmul.mubr.msk.f32.gmra.mrb[10].mxu1 %vm150_vm0, %v5235_v43 }
  0x96   :  { %6113 = vmatprep.mubr.msk.f32.mxu1 %vm150_vm0, %v5236_v44  ;;  %6759 = vmatpush3.bf16.msra.mxu1 %v7852_v5  ;;  %v1654_v44 = vld [vmem:[#allocation2] sm:$0xff] }
  0x97   :  { %6761 = vmatprep.subr.bf16.mxu1 %v7868_v9 }
  0x99   :  { %6114 = vmatmul.mubr.msk.f32.gmra.mrb[12].mxu1 %vm150_vm0, %v5237_v45  ;;  %v1655_v45 = vld [vmem:[#allocation2 + $0x8] sm:$0xff] }
  0x9a   :  { %6116 = vmatprep.mubr.msk.f32.mxu1 %vm150_vm0, %v5238_v46  ;;  %6763 = vmatpush3.bf16.msra.mxu1 %v7868_v9  ;;  %v1656_v46 = vld [vmem:[#allocation2 + $0x10] sm:$0xff] }
  0x9b   :  { %6765 = vmatprep.subr.bf16.mxu1 %v7884_v13 }
  0x9d   :  { %6117 = vmatmul.mubr.msk.f32.gmra.mrb[14].mxu1 %vm150_vm0, %v5239_v47  ;;  %v6746_v47 = vpack.c.bf16 %v5250_v39, %v5248_v38  ;;  %v5280_v38 = vld [vmem:[%s9879_s5 + $0xc0] sm:$0xff]  ;;  %v5282_v39 = vld [vmem:[%s9879_s5 + $0xd0] sm:$0xff] }
  0x9e   :  { %6767 = vmatpush3.bf16.msra.mxu1 %v7884_v13  ;;  %6135 = vmatprep.mubr.msk.f32.mxu1 %vm150_vm0, %v5264_v48  ;;  %v7644_v48 = vmov 0.0|0.0  }
  0x9f   :  { %6777 = vmatprep.subr.bf16.mxu1 %v7847_v3 }
  0xa1   :  { %6136 = vmatmul.mubr.msk.f32.vlgmr.msra.gmra.mrb[16].mxu1 %vm150_vm0, %v5265_v49  ;;  %v6801_v49 = vpack.c.bf16 %v1655_v45, %v1654_v44 }
  0xa2   :  { %6138 = vmatprep.mubr.msk.f32.mxu1 %vm150_vm0, %v5266_v50  ;;  %6779 = vmatpush3.bf16.msra.mxu1 %v7847_v3  ;;  %v6720_v3 = vpack.c.bf16 %v283_v2, %v281_v1  ;;  %v1657_v50 = vld [vmem:[#allocation2 + $0x18] sm:$0xff] }
  0xa3   :  { %6781 = vmatprep.subr.bf16.mxu1 %v7852_v5 }
  0xa4   :  { %6721 = vmatprep.subr.bf16.mxu0 %v6720_v3  ;;  %v1660_v3 = vld [vmem:[#allocation2 + $0x30] sm:$0xff] }
  0xa5   :  { %6139 = vmatmul.mubr.msk.f32.gmra.mrb[18].mxu1 %vm150_vm0, %v5267_v51  ;;  %v6748_v51 = vpack.c.bf16 %v5255_v41, %v5253_v40  ;;  %v5287_v40 = vld [vmem:[%s9879_s5 + $0xf8] sm:$0xff] }
  0xa6   :  { %6141 = vmatprep.mubr.msk.f32.mxu1 %vm150_vm0, %v5268_v52  ;;  %6783 = vmatpush3.bf16.msra.mxu1 %v7852_v5  ;;  %v282_v5 = vld [vmem:[%s9879_s5 + $0x10] sm:$0xff]  ;;  %v5252_v52 = vld [vmem:[%s9879_s5 + $0xa0] sm:$0xff] }
  0xa7   :  { %6785 = vmatprep.subr.bf16.mxu1 %v7868_v9  ;;  %v6722_v8 = vpack.c.bf16 %v282_v5, %v280_v4  ;;  %v1661_v4 = vld [vmem:[#allocation2 + $0x38] sm:$0xff] }
  0xa8   :  { %v6810_v6 = vpack.c.bf16 %v1661_v4, %v1660_v3  ;;  %v1610_v4 = vld [vmem:[%s9880_s29] sm:$0x3] }
  0xa9   :  { %6142 = vmatmul.mubr.msk.f32.gmra.mrb[20].mxu1 %vm150_vm0, %v5269_v53  ;;  %v5254_v53 = vld [vmem:[%s9879_s5 + $0xb0] sm:$0xff] }
  0xaa   :  { %6144 = vmatprep.mubr.msk.f32.mxu1 %vm150_vm0, %v5270_v54  ;;  %6787 = vmatpush3.bf16.msra.mxu1 %v7868_v9  ;;  %v5281_v54 = vld [vmem:[%s9879_s5 + $0xc8] sm:$0xff] }
  0xab   :  { %6789 = vmatprep.subr.bf16.mxu1 %v7884_v13 }
  0xad   :  { %6145 = vmatmul.mubr.msk.f32.gmra.mrb[22].mxu1 %vm150_vm0, %v5271_v55  ;;  %v5283_v55 = vld [vmem:[%s9879_s5 + $0xd8] sm:$0xff] }
  0xae   :  { %6791 = vmatpush3.bf16.msra.mxu1 %v7884_v13  ;;  %6163 = vmatprep.mubr.msk.f32.mxu1 %vm150_vm0, %v5296_v56 }
  0xaf   :  { %6800 = vmatprep.subr.bf16.mxu1 %v7644_v48 }
  0xb1   :  { %6164 = vmatmul.mubr.msk.f32.vlgmr.msra.gmra.mrb[24].mxu1 %vm150_vm0, %v5297_v57  ;;  %v6804_v57 = vpack.c.bf16 %v1657_v50, %v1656_v46  ;;  %v1672_v46 = vld [vmem:[#allocation2 + $0x90] sm:$0xff] }
  0xb2   :  { %6166 = vmatprep.mubr.msk.f32.mxu1 %vm150_vm0, %v5298_v58  ;;  %6802 = vmatpush1.bf16.msra.mxu1 %v6801_v49  ;;  %v6770_v49 = vpack.c.bf16 %v5282_v39, %v5280_v38  ;;  %v1812_v38 = vld [vmem:[#allocation5 + $0x28] sm:$0xff] }
  0xb3   :  { %6803 = vmatprep.subr.bf16.mxu1 %v7644_v48 }
  0xb5   :  { %6167 = vmatmul.mubr.msk.f32.gmra.mrb[26].mxu1 %vm150_vm0, %v5299_v59  ;;  %v1658_v59 = vld [vmem:[#allocation2 + $0x20] sm:$0xff] }
  0xb6   :  { %6169 = vmatprep.mubr.msk.f32.mxu1 %vm150_vm0, %v5300_v60  ;;  %v1659_v60 = vld [vmem:[#allocation2 + $0x28] sm:$0xff]  ;;  %6805 = vmatpush1.bf16.msra.mxu1 %v6804_v57 }
  0xb7   :  { %v6807_v1 = vpack.c.bf16 %v1659_v60, %v1658_v59  ;;  %6806 = vmatprep.subr.bf16.mxu1 %v7644_v48  ;;  %v1675_v57 = vld [vmem:[#allocation2 + $0xa8] sm:$0xff] }
  0xb9   :  { %6170 = vmatmul.mubr.msk.f32.gmra.mrb[28].mxu1 %vm150_vm0, %v5301_v61  ;;  %v6750_v61 = vpack.c.bf16 %v5254_v53, %v5252_v52  ;;  %v5286_v52 = vld [vmem:[%s9879_s5 + $0xf0] sm:$0xff]  ;;  %v5315_v53 = vld [vmem:[%s9879_s5 + $0x118] sm:$0xff] }
  0xba   :  { %6172 = vmatprep.mubr.msk.f32.mxu1 %vm150_vm0, %v5302_v62  ;;  %v6768_v62 = vpack.c.bf16 %v5283_v55, %v5281_v54  ;;  %6808 = vmatpush1.bf16.msra.mxu1 %v6807_v1  ;;  %v1674_v55 = vld [vmem:[#allocation2 + $0xa0] sm:$0xff] }
  0xbb   :  { %6809 = vmatprep.subr.bf16.mxu1 %v7644_v48 }
  0xbd   :  { %6173 = vmatmul.mubr.msk.f32.gmra.mrb[30].mxu1 %vm150_vm0, %v5303_v63 }
  0xbe   :  { %6811 = vmatpush1.bf16.msra.mxu1 %v6810_v6 }
  0xbf   :  { %6812 = vmatprep.subr.bf16.mxu1 %v7644_v48 }
 0x153   :  { %v6081_v9 = vpop.f32.mrb[0].mxu1 }
 0x154   :  { %v387_v13 = vpop.f32.mrb[1].mxu1  ;;  %v8119_v14 = vpop.f32.mrb[0].mxu0 }
 0x155   :  { %5216 = vmatmul.mubr.msk.f32.vlgmr.msra.gmra.mrb[8].mxu0 %vm435_vm1, %v387_v13  ;;  %v241_v17 = vpop.f32.mrb[1].mxu0  ;;  %v1664_v13 = vld [vmem:[#allocation2 + $0x50] sm:$0xff] }
 0x156   :  { %530 = vmatprep.mubr.f32.mxu0 %v7643_v0  ;;  %6723 = vmatpush1.bf16.msra.mxu0 %v6722_v8  ;;  %v1662_v8 = vld [vmem:[#allocation2 + $0x40] sm:$0xff] }
 0x157   :  { %v6084_v19 = vpop.f32.mrb[2].mxu1  ;;  %6725 = vmatprep.subr.bf16.mxu0 %v6724_v10 }
 0x158   :  { %v397_v21 = vpop.f32.mrb[3].mxu1  ;;  %v8129_v22 = vpop.f32.mrb[2].mxu0 }
 0x159   :  { %5217 = vmatmul.mubr.msk.f32.gmra.mrb[10].mxu0 %vm435_vm1, %v6081_v9  ;;  %v8132_v23 = vpop.f32.mrb[3].mxu0  ;;  %v1663_v9 = vld [vmem:[#allocation2 + $0x48] sm:$0xff] }
 0x15a   :  { %536 = vmatprep.mubr.f32.mxu0 %v7643_v0  ;;  %6727 = vmatpush1.bf16.msra.mxu0 %v6726_v18  ;;  %v6813_v11 = vpack.c.bf16 %v1663_v9, %v1662_v8  ;;  %v1666_v18 = vld [vmem:[#allocation2 + $0x60] sm:$0xff] }
 0x15b   :  { %v6087_v24 = vpop.f32.mrb[4].mxu1  ;;  %6745 = vmatprep.subr.bf16.mxu0 %v6744_v20 }
 0x15c   :  { %v407_v25 = vpop.f32.mrb[5].mxu1  ;;  %v8135_v26 = vpop.f32.mrb[4].mxu0  ;;  %6814 = vmatpush1.bf16.msra.mxu1 %v6813_v11  ;;  %v1807_v11 = vld [vmem:[#allocation5] sm:$0xff] }
 0x15d   :  { %5218 = vmatmul.mubr.msk.f32.gmra.mrb[12].mxu0 %vm435_vm1, %v397_v21  ;;  %v8138_v27 = vpop.f32.mrb[5].mxu0  ;;  %6815 = vmatprep.subr.bf16.mxu1 %v7644_v48 }
 0x15e   :  { %542 = vmatprep.mubr.f32.mxu0 %v7643_v0 }
 0x15f   :  { %v6090_v28 = vpop.f32.mrb[6].mxu1 }
 0x160   :  { %v417_v29 = vpop.f32.mrb[7].mxu1  ;;  %v8141_v30 = vpop.f32.mrb[6].mxu0 }
 0x161   :  { %5219 = vmatmul.mubr.msk.f32.gmra.mrb[14].mxu0 %vm435_vm1, %v6084_v19  ;;  %v8144_v31 = vpop.f32.mrb[7].mxu0  ;;  %v1667_v19 = vld [vmem:[#allocation2 + $0x68] sm:$0xff] }
 0x162   :  { %548 = vmatprep.mubr.f32.mxu0 %v7643_v0  ;;  %v6819_v21 = vpack.c.bf16 %v1667_v19, %v1666_v18 }
 0x164   :  { %v8147_v32 = vpop.f32.mrb[8].mxu1 }
 0x165   :  { %5220 = vmatmul.mubr.msk.f32.gmra.mrb[16].mxu0 %vm435_vm1, %v407_v25  ;;  %v8150_v33 = vpop.f32.mrb[9].mxu1 }
 0x166   :  { %554 = vmatprep.mubr.f32.mxu0 %v7643_v0 }
 0x168   :  { %v8153_v34 = vpop.f32.mrb[10].mxu1 }
 0x169   :  { %5221 = vmatmul.mubr.msk.f32.gmra.mrb[18].mxu0 %vm435_vm1, %v6087_v24  ;;  %v8156_v35 = vpop.f32.mrb[11].mxu1  ;;  %v1669_v24 = vld [vmem:[#allocation2 + $0x78] sm:$0xff] }
 0x16a   :  { %560 = vmatprep.mubr.f32.mxu0 %v7643_v0 }
 0x16c   :  { %v8159_v36 = vpop.f32.mrb[12].mxu1 }
 0x16d   :  { %5222 = vmatmul.mubr.msk.f32.gmra.mrb[20].mxu0 %vm435_vm1, %v417_v29  ;;  %v8162_v37 = vpop.f32.mrb[13].mxu1  ;;  %v1671_v29 = vld [vmem:[#allocation2 + $0x88] sm:$0xff] }
 0x16e   :  { %566 = vmatprep.mubr.f32.mxu0 %v7643_v0 }
 0x170   :  { %v8177_v42 = vpop.f32.mrb[14].mxu1 }
 0x171   :  { %5223 = vmatmul.mubr.msk.f32.gmra.mrb[22].mxu0 %vm435_vm1, %v6090_v28  ;;  %v8180_v43 = vpop.f32.mrb[15].mxu1 }
 0x172   :  { %661 = vmatprep.mubr.f32.mxu0 %v7643_v0 }
 0x174   :  { %v8196_v56 = vpop.f32.mrb[16].mxu1 }
 0x175   :  { %5224 = vmatmul.mubr.msk.f32.vlgmr.msra.gmra.mrb[8].mxu0 %vm435_vm1, %v241_v17  ;;  %v8199_v58 = vpop.f32.mrb[17].mxu1 }
 0x176   :  { %667 = vmatprep.mubr.f32.mxu0 %v7643_v0  ;;  %6747 = vmatpush1.bf16.msra.mxu0 %v6746_v47  ;;  %v1673_v47 = vld [vmem:[#allocation2 + $0x98] sm:$0xff] }
 0x177   :  { %6749 = vmatprep.subr.bf16.mxu0 %v6748_v51  ;;  %v5284_v51 = vld [vmem:[%s9879_s5 + $0xe0] sm:$0xff]  ;;  %v6828_v54 = vpack.c.bf16 %v1673_v47, %v1672_v46  ;;  %v1813_v47 = vld [vmem:[#allocation5 + $0x30] sm:$0xff] }
 0x178   :  { %v8203_v63 = vpop.f32.mrb[18].mxu1  ;;  %v6774_v59 = vpack.c.bf16 %v5286_v52, %v5284_v51 }
 0x179   :  { %5225 = vmatmul.mubr.msk.f32.gmra.mrb[10].mxu0 %vm435_vm1, %v8119_v14  ;;  %v8207_v2 = vpop.f32.mrb[19].mxu1  ;;  %v1665_v14 = vld [vmem:[#allocation2 + $0x58] sm:$0xff] }
 0x17a   :  { %673 = vmatprep.mubr.f32.mxu0 %v7643_v0  ;;  %6751 = vmatpush1.bf16.msra.mxu0 %v6750_v61  ;;  %v6816_v16 = vpack.c.bf16 %v1665_v14, %v1664_v13  ;;  %v6831_v61 = vpack.c.bf16 %v1675_v57, %v1674_v55  ;;  %v1815_v57 = vld [vmem:[#allocation5 + $0x40] sm:$0xff] }
 0x17b   :  { %6769 = vmatprep.subr.bf16.mxu0 %v6768_v62  ;;  %v5318_v62 = vld [vmem:[%s9879_s5 + $0x130] sm:$0xff] }
 0x17c   :  { %v8211_v5 = vpop.f32.mrb[20].mxu1  ;;  %6817 = vmatpush1.bf16.msra.mxu1 %v6816_v16 }
 0x17d   :  { %5226 = vmatmul.mubr.msk.f32.gmra.mrb[12].mxu0 %vm435_vm1, %v8132_v23  ;;  %v8215_v7 = vpop.f32.mrb[21].mxu1  ;;  %6818 = vmatprep.subr.bf16.mxu1 %v7644_v48  ;;  %v1668_v23 = vld [vmem:[#allocation2 + $0x70] sm:$0xff] }
 0x17e   :  { %679 = vmatprep.mubr.f32.mxu0 %v7643_v0 }
 0x180   :  { %v8219_v10 = vpop.f32.mrb[22].mxu1  ;;  %6820 = vmatpush1.bf16.msra.mxu1 %v6819_v21  ;;  %v1810_v21 = vld [vmem:[#allocation5 + $0x18] sm:$0xff] }
 0x181   :  { %5227 = vmatmul.mubr.msk.f32.gmra.mrb[14].mxu0 %vm435_vm1, %v8129_v22  ;;  %v8223_v12 = vpop.f32.mrb[23].mxu1  ;;  %6821 = vmatprep.subr.bf16.mxu1 %v7644_v48 }
 0x182   :  { %685 = vmatprep.mubr.f32.mxu0 %v7643_v0 }
 0x184   :  { %v8227_v15 = vpop.f32.mrb[24].mxu1 }
 0x185   :  { %5228 = vmatmul.mubr.msk.f32.gmra.mrb[16].mxu0 %vm435_vm1, %v8138_v27  ;;  %v8231_v17 = vpop.f32.mrb[25].mxu1  ;;  %v6822_v27 = vpack.c.bf16 %v1669_v24, %v1668_v23 }
 0x186   :  { %691 = vmatprep.mubr.f32.mxu0 %v7643_v0 }
 0x187   :  { %6823 = vmatpush1.bf16.msra.mxu1 %v6822_v27 }
 0x188   :  { %v8235_v20 = vpop.f32.mrb[26].mxu1  ;;  %6824 = vmatprep.subr.bf16.mxu1 %v7644_v48 }
 0x189   :  { %5229 = vmatmul.mubr.msk.f32.gmra.mrb[18].mxu0 %vm435_vm1, %v8135_v26  ;;  %v8239_v22 = vpop.f32.mrb[27].mxu1  ;;  %v1670_v26 = vld [vmem:[#allocation2 + $0x80] sm:$0xff] }
 0x18a   :  { %697 = vmatprep.mubr.f32.mxu0 %v7643_v0  ;;  %v6825_v44 = vpack.c.bf16 %v1671_v29, %v1670_v26  ;;  %v1811_v29 = vld [vmem:[#allocation5 + $0x20] sm:$0xff] }
 0x18c   :  { %v8243_v25 = vpop.f32.mrb[28].mxu1  ;;  %6826 = vmatpush1.bf16.msra.mxu1 %v6825_v44 }
 0x18d   :  { %5230 = vmatmul.mubr.msk.f32.gmra.mrb[20].mxu0 %vm435_vm1, %v8144_v31  ;;  %v8247_v28 = vpop.f32.mrb[29].mxu1  ;;  %v5285_v31 = vld [vmem:[%s9879_s5 + $0xe8] sm:$0xff]  ;;  %6827 = vmatprep.subr.bf16.mxu1 %v7644_v48 }
 0x18e   :  { %703 = vmatprep.mubr.f32.mxu0 %v7643_v0  ;;  %v6772_v50 = vpack.c.bf16 %v5287_v40, %v5285_v31 }
 0x190   :  { %v8263_v41 = vpop.f32.mrb[30].mxu1  ;;  %6829 = vmatpush1.bf16.msra.mxu1 %v6828_v54 }
 0x191   :  { %5231 = vmatmul.mubr.msk.f32.gmra.mrb[22].mxu0 %vm435_vm1, %v8141_v30  ;;  %v8267_v45 = vpop.f32.mrb[31].mxu1  ;;  %v5313_v30 = vld [vmem:[%s9879_s5 + $0x108] sm:$0xff]  ;;  %6830 = vmatprep.subr.bf16.mxu1 %v7644_v48 }
 0x192   :  { %945 = vmatprep.mubr.f32.mxu0 %v7643_v0  ;;  %v6792_v60 = vpack.c.bf16 %v5315_v53, %v5313_v30 }
 0x194   :  { %6832 = vmatpush1.bf16.msra.mxu1 %v6831_v61 }
 0x195   :  { %5256 = vmatmul.mubr.msk.f32.vlgmr.msra.gmra.mrb[8].mxu0 %vm435_vm1, %v8150_v33  ;;  %6833 = vmatprep.subr.bf16.mxu1 %v7644_v48  ;;  %v5314_v33 = vld [vmem:[%s9879_s5 + $0x110] sm:$0xff] }
 0x196   :  { %951 = vmatprep.mubr.f32.mxu0 %v7643_v0  ;;  %6771 = vmatpush1.bf16.msra.mxu0 %v6770_v49  ;;  %v1814_v49 = vld [vmem:[#allocation5 + $0x38] sm:$0xff] }
 0x197   :  { %6773 = vmatprep.subr.bf16.mxu0 %v6772_v50  ;;  %v6846_v30 = vpack.c.bf16 %v1814_v49, %v1813_v47  ;;  %v1826_v47 = vld [vmem:[#allocation5 + $0x98] sm:$0xff] }
 0x199   :  { %5257 = vmatmul.mubr.msk.f32.gmra.mrb[10].mxu0 %vm435_vm1, %v8147_v32  ;;  %v5312_v32 = vld [vmem:[%s9879_s5 + $0x100] sm:$0xff] }
 0x19a   :  { %957 = vmatprep.mubr.f32.mxu0 %v7643_v0  ;;  %6775 = vmatpush1.bf16.msra.mxu0 %v6774_v59  ;;  %v1816_v59 = vld [vmem:[#allocation5 + $0x48] sm:$0xff] }
 0x19b   :  { %6793 = vmatprep.subr.bf16.mxu0 %v6792_v60 }
 0x19d   :  { %5258 = vmatmul.mubr.msk.f32.gmra.mrb[12].mxu0 %vm435_vm1, %v8156_v35  ;;  %v5319_v35 = vld [vmem:[%s9879_s5 + $0x138] sm:$0xff] }
 0x19e   :  { %963 = vmatprep.mubr.f32.mxu0 %v7643_v0 }
 0x1a1   :  { %5259 = vmatmul.mubr.msk.f32.gmra.mrb[14].mxu0 %vm435_vm1, %v8153_v34  ;;  %v5317_v34 = vld [vmem:[%s9879_s5 + $0x128] sm:$0xff] }
 0x1a2   :  { %969 = vmatprep.mubr.f32.mxu0 %v7643_v0 }
 0x1a5   :  { %5260 = vmatmul.mubr.msk.f32.gmra.mrb[16].mxu0 %vm435_vm1, %v8162_v37  ;;  %v6796_v37 = vpack.c.bf16 %v5319_v35, %v5317_v34 }
 0x1a6   :  { %975 = vmatprep.mubr.f32.mxu0 %v7643_v0 }
 0x1a9   :  { %5261 = vmatmul.mubr.msk.f32.gmra.mrb[18].mxu0 %vm435_vm1, %v8159_v36  ;;  %v6794_v36 = vpack.c.bf16 %v5314_v33, %v5312_v32  ;;  %v6849_v33 = vpack.c.bf16 %v1816_v59, %v1815_v57  ;;  %v1829_v57 = vld [vmem:[#allocation5 + $0xb0] sm:$0xff]  ;;  %v1830_v59 = vld [vmem:[#allocation5 + $0xb8] sm:$0xff] }
 0x1aa   :  { %981 = vmatprep.mubr.f32.mxu0 %v7643_v0 }
 0x1ad   :  { %5262 = vmatmul.mubr.msk.f32.gmra.mrb[20].mxu0 %vm435_vm1, %v8180_v43  ;;  %v5316_v43 = vld [vmem:[%s9879_s5 + $0x120] sm:$0xff] }
 0x1ae   :  { %987 = vmatprep.mubr.f32.mxu0 %v7643_v0  ;;  %v6798_v1 = vpack.c.bf16 %v5318_v62, %v5316_v43  ;;  %v1818_v43 = vld [vmem:[#allocation5 + $0x58] sm:$0xff] }
 0x1b1   :  { %5263 = vmatmul.mubr.msk.f32.gmra.mrb[22].mxu0 %vm435_vm1, %v8177_v42  ;;  %v1676_v42 = vld [vmem:[#allocation2 + $0xb0] sm:$0xff] }
 0x1b2   :  { %1245 = vmatprep.mubr.f32.mxu0 %v7643_v0 }
 0x1b5   :  { %5288 = vmatmul.mubr.msk.f32.vlgmr.msra.gmra.mrb[8].mxu0 %vm435_vm1, %v8199_v58 }
 0x1b6   :  { %1251 = vmatprep.mubr.f32.mxu0 %v7643_v0  ;;  %6795 = vmatpush1.bf16.msra.mxu0 %v6794_v36 }
 0x1b7   :  { %6797 = vmatprep.subr.bf16.mxu0 %v6796_v37  ;;  %v1817_v37 = vld [vmem:[#allocation5 + $0x50] sm:$0xff] }
 0x1b9   :  { %5289 = vmatmul.mubr.msk.f32.gmra.mrb[10].mxu0 %vm435_vm1, %v8196_v56  ;;  %v1677_v56 = vld [vmem:[#allocation2 + $0xb8] sm:$0xff] }
 0x1ba   :  { %1257 = vmatprep.mubr.f32.mxu0 %v7643_v0  ;;  %6799 = vmatpush1.bf16.msra.mxu0 %v6798_v1  ;;  %v6834_v58 = vpack.c.bf16 %v1677_v56, %v1676_v42  ;;  %v6852_v56 = vpack.c.bf16 %v1818_v43, %v1817_v37 }
 0x1bc   :  { %6835 = vmatpush1.bf16.msra.mxu1 %v6834_v58 }
 0x1bd   :  { %5290 = vmatmul.mubr.msk.f32.gmra.mrb[12].mxu0 %vm435_vm1, %v8207_v2  ;;  %6836 = vmatprep.subr.bf16.mxu1 %v7644_v48 }
 0x1be   :  { %1263 = vmatprep.mubr.f32.mxu0 %v7643_v0 }
 0x1c1   :  { %5291 = vmatmul.mubr.msk.f32.gmra.mrb[14].mxu0 %vm435_vm1, %v8203_v63  ;;  %v1612_v63 = vlaneseq }
 0x1c2   :  { %1269 = vmatprep.mubr.f32.mxu0 %v7643_v0 }
 0x1c3   :  { %v8376_v2 = vshrl.u32 %v1612_v63, 7 }
 0x1c5   :  { %5292 = vmatmul.mubr.msk.f32.gmra.mrb[16].mxu0 %vm435_vm1, %v8215_v7  ;;  %v1614_v3 = vsub.s32 0, %v8376_v2 }
 0x1c6   :  { %1275 = vmatprep.mubr.f32.mxu0 %v7643_v0 }
 0x1c7   :  { %v8385_v6 = vrot.slane %v1610_v4, %v1614_v3 }
 0x1c9   :  { %5293 = vmatmul.mubr.msk.f32.gmra.mrb[18].mxu0 %vm435_vm1, %v8211_v5  ;;  %v1618_v5 = vsub.s32 1, %v8376_v2  ;;  %v3477_v2 = vld [vmem:[%s9856_s12 + $0x98] sm:$0xff] }
 0x1ca   :  { %1281 = vmatprep.mubr.f32.mxu0 %v7643_v0 }
 0x1cb   :  { %v8389_v7 = vrot.slane %v1610_v4, %v1618_v5 }
 0x1cd   :  { %5294 = vmatmul.mubr.msk.f32.gmra.mrb[20].mxu0 %vm435_vm1, %v8223_v12  ;;  %v1808_v12 = vld [vmem:[#allocation5 + $0x8] sm:$0xff] }
 0x1ce   :  { %1287 = vmatprep.mubr.f32.mxu0 %v7643_v0  ;;  %v6837_v16 = vpack.c.bf16 %v1808_v12, %v1807_v11 }
 0x1d1   :  { %5295 = vmatmul.mubr.msk.f32.gmra.mrb[22].mxu0 %vm435_vm1, %v8219_v10 }
 0x1d2   :  { %1545 = vmatprep.mubr.f32.mxu0 %v7643_v0 }
 0x1d5   :  { %5320 = vmatmul.mubr.msk.f32.vlgmr.msra.gmra.mrb[8].mxu0 %vm435_vm1, %v8231_v17 }
 0x1d6   :  { %1551 = vmatprep.mubr.f32.mxu0 %v7643_v0 }
 0x1d9   :  { %5321 = vmatmul.mubr.msk.f32.gmra.mrb[10].mxu0 %vm435_vm1, %v8227_v15 }
 0x1da   :  { %1557 = vmatprep.mubr.f32.mxu0 %v7643_v0 }
 0x1dd   :  { %5322 = vmatmul.mubr.msk.f32.gmra.mrb[12].mxu0 %vm435_vm1, %v8239_v22 }
 0x1de   :  { %1563 = vmatprep.mubr.f32.mxu0 %v7643_v0 }
 0x1e1   :  { %5323 = vmatmul.mubr.msk.f32.gmra.mrb[14].mxu0 %vm435_vm1, %v8235_v20  ;;  %v1809_v20 = vld [vmem:[#allocation5 + $0x10] sm:$0xff] }
 0x1e2   :  { %1569 = vmatprep.mubr.f32.mxu0 %v7643_v0 }
 0x1e5   :  { %5324 = vmatmul.mubr.msk.f32.gmra.mrb[16].mxu0 %vm435_vm1, %v8247_v28 }
 0x1e6   :  { %1575 = vmatprep.mubr.f32.mxu0 %v7643_v0 }
 0x1e9   :  { %5325 = vmatmul.mubr.msk.f32.gmra.mrb[18].mxu0 %vm435_vm1, %v8243_v25  ;;  %v6840_v25 = vpack.c.bf16 %v1810_v21, %v1809_v20 }
 0x1ea   :  { %1581 = vmatprep.mubr.f32.mxu0 %v7643_v0 }
 0x1ed   :  { %5326 = vmatmul.mubr.msk.f32.gmra.mrb[20].mxu0 %vm435_vm1, %v8267_v45 }
 0x1ee   :  { %1587 = vmatprep.mubr.f32.mxu0 %v7643_v0 }
 0x1f1   :  { %5327 = vmatmul.mubr.msk.f32.gmra.mrb[22].mxu0 %vm435_vm1, %v8263_v41  ;;  %v6843_v41 = vpack.c.bf16 %v1812_v38, %v1811_v29 }
 0x2a8   :  { %v1547_v8 = vpop.f32.mrb[8].mxu0 }
 0x2a9   :  { %v8392_v9 = vadd.f32 %v8385_v6, %v1547_v8  ;;  %v1549_v10 = vpop.f32.mrb[9].mxu0  ;;  %v1819_v8 = vld [vmem:[#allocation5 + $0x60] sm:$0xff] }
 0x2aa   :  { %v8395_v13 = vadd.f32 %v8389_v7, %v1549_v10  ;;  %v1820_v10 = vld [vmem:[#allocation5 + $0x68] sm:$0xff] }
 0x2ab   :  { %v1638_v17 = vmax.f32 %v8392_v9, 0.0  ;;  %v1944_v9 = vld [vmem:[%s9850_s6] sm:$0xff] }
 0x2ac   :  { %v1639_v14 = vmax.f32 %v8395_v13, 0.0  ;;  %v1553_v15 = vpop.f32.mrb[10].mxu0  ;;  %v6870_v13 = vpack.c.bf16 %v1830_v59, %v1829_v57  ;;  %6191 = vmatprep.mubr.msk.f32.mxu0 %vm150_vm0, %v1944_v9 }
 0x2ad   :  { %v8400_v18 = vadd.f32 %v8385_v6, %v1553_v15  ;;  %v1555_v19 = vpop.f32.mrb[11].mxu0 }
 0x2ae   :  { %v8403_v22 = vadd.f32 %v8389_v7, %v1555_v19  ;;  %5328 = vmatprep.mubr.msk.f32.mxu1 %vm150_vm0, %v1639_v14 }
 0x2af   :  { %1767 = vmatmul.mubr.f32.vlgmr.msra.gmra.mrb[32].mxu1 %v1638_v17  ;;  %v1640_v27 = vmax.f32 %v8400_v18, 0.0 }
 0x2b0   :  { %v1641_v23 = vmax.f32 %v8403_v22, 0.0  ;;  %6838 = vmatpush1.bf16.msra.mxu1 %v6837_v16  ;;  %v1559_v24 = vpop.f32.mrb[12].mxu0  ;;  %v6855_v16 = vpack.c.bf16 %v1820_v10, %v1819_v8 }
 0x2b1   :  { %v8413_v28 = vadd.f32 %v8385_v6, %v1559_v24  ;;  %v1561_v26 = vpop.f32.mrb[13].mxu0  ;;  %6839 = vmatprep.subr.bf16.mxu1 %v7644_v48  ;;  %v1821_v24 = vld [vmem:[#allocation5 + $0x70] sm:$0xff] }
 0x2b2   :  { %v8417_v39 = vadd.f32 %v8389_v7, %v1561_v26  ;;  %5329 = vmatprep.mubr.msk.f32.mxu1 %vm150_vm0, %v1641_v23 }
 0x2b3   :  { %1772 = vmatmul.mubr.f32.gmra.mrb[34].mxu1 %v1640_v27  ;;  %v1642_v44 = vmax.f32 %v8413_v28, 0.0 }
 0x2b4   :  { %v1643_v31 = vmax.f32 %v8417_v39, 0.0  ;;  %6841 = vmatpush1.bf16.msra.mxu1 %v6840_v25  ;;  %v1565_v40 = vpop.f32.mrb[14].mxu0  ;;  %v1822_v25 = vld [vmem:[#allocation5 + $0x78] sm:$0xff] }
 0x2b5   :  { %v8427_v45 = vadd.f32 %v8385_v6, %v1565_v40  ;;  %v1567_v46 = vpop.f32.mrb[15].mxu0  ;;  %6842 = vmatprep.subr.bf16.mxu1 %v7644_v48  ;;  %v6858_v38 = vpack.c.bf16 %v1822_v25, %v1821_v24 }
 0x2b6   :  { %v8431_v50 = vadd.f32 %v8389_v7, %v1567_v46  ;;  %5330 = vmatprep.mubr.msk.f32.mxu1 %vm150_vm0, %v1643_v31  ;;  %v1824_v46 = vld [vmem:[#allocation5 + $0x88] sm:$0xff] }
 0x2b7   :  { %1777 = vmatmul.mubr.f32.gmra.mrb[36].mxu1 %v1642_v44  ;;  %v1644_v53 = vmax.f32 %v8427_v45, 0.0 }
 0x2b8   :  { %v1645_v51 = vmax.f32 %v8431_v50, 0.0  ;;  %6844 = vmatpush1.bf16.msra.mxu1 %v6843_v41  ;;  %v1571_v52 = vpop.f32.mrb[16].mxu0  ;;  %v1823_v41 = vld [vmem:[#allocation5 + $0x80] sm:$0xff] }
 0x2b9   :  { %v8441_v54 = vadd.f32 %v8385_v6, %v1571_v52  ;;  %v1573_v55 = vpop.f32.mrb[17].mxu0  ;;  %6845 = vmatprep.subr.bf16.mxu1 %v7644_v48  ;;  %v1827_v52 = vld [vmem:[#allocation5 + $0xa0] sm:$0xff] }
 0x2ba   :  { %v8445_v60 = vadd.f32 %v8389_v7, %v1573_v55  ;;  %5331 = vmatprep.mubr.msk.f32.mxu1 %vm150_vm0, %v1645_v51 }
 0x2bb   :  { %1782 = vmatmul.mubr.f32.gmra.mrb[38].mxu1 %v1644_v53  ;;  %v1646_v34 = vmax.f32 %v8441_v54, 0.0 }
 0x2bc   :  { %v1647_v61 = vmax.f32 %v8445_v60, 0.0  ;;  %6847 = vmatpush1.bf16.msra.mxu1 %v6846_v30  ;;  %v1577_v32 = vpop.f32.mrb[18].mxu0  ;;  %v1828_v30 = vld [vmem:[#allocation5 + $0xa8] sm:$0xff] }
 0x2bd   :  { %v8455_v35 = vadd.f32 %v8385_v6, %v1577_v32  ;;  %v1579_v36 = vpop.f32.mrb[19].mxu0  ;;  %6848 = vmatprep.subr.bf16.mxu1 %v7644_v48  ;;  %v6867_v55 = vpack.c.bf16 %v1828_v30, %v1827_v52  ;;  %v2606_v52 = vld [vmem:[#allocation8 + $0x40] sm:$0xff] }
 0x2be   :  { %v8459_v62 = vadd.f32 %v8389_v7, %v1579_v36  ;;  %5332 = vmatprep.mubr.msk.f32.mxu1 %vm150_vm0, %v1647_v61 }
 0x2bf   :  { %1787 = vmatmul.mubr.f32.gmra.mrb[40].mxu1 %v1646_v34  ;;  %v1648_v58 = vmax.f32 %v8455_v35, 0.0 }
 0x2c0   :  { %v1649_v1 = vmax.f32 %v8459_v62, 0.0  ;;  %6850 = vmatpush1.bf16.msra.mxu1 %v6849_v33  ;;  %v1583_v42 = vpop.f32.mrb[20].mxu0 }
 0x2c1   :  { %v1634_v63 = vadd.f32 %v8385_v6, %v1583_v42  ;;  %v1585_v4 = vpop.f32.mrb[21].mxu0  ;;  %6851 = vmatprep.subr.bf16.mxu1 %v7644_v48 }
 0x2c2   :  { %v1635_v11 = vadd.f32 %v8389_v7, %v1585_v4  ;;  %5333 = vmatprep.mubr.msk.f32.mxu1 %vm150_vm0, %v1649_v1 }
 0x2c3   :  { %1792 = vmatmul.mubr.f32.gmra.mrb[42].mxu1 %v1648_v58  ;;  %v1650_v19 = vmax.f32 %v1634_v63, 0.0 }
 0x2c4   :  { %v1651_v12 = vmax.f32 %v1635_v11, 0.0  ;;  %6853 = vmatpush1.bf16.msra.mxu1 %v6852_v56  ;;  %v1589_v15 = vpop.f32.mrb[22].mxu0 }
 0x2c5   :  { %v1636_v20 = vadd.f32 %v8385_v6, %v1589_v15  ;;  %v1591_v21 = vpop.f32.mrb[23].mxu0  ;;  %6854 = vmatprep.subr.bf16.mxu1 %v7644_v48  ;;  %v6861_v6 = vpack.c.bf16 %v1824_v46, %v1823_v41  ;;  %v2046_v41 = vld [vmem:[#allocation7 + $0x8] sm:$0xff]  ;;  %v1946_v46 = vld [vmem:[%s9850_s6 + $0x10] sm:$0xff] }
 0x2c6   :  { %v1637_v26 = vadd.f32 %v8389_v7, %v1591_v21  ;;  %5334 = vmatprep.mubr.msk.f32.mxu1 %vm150_vm0, %v1651_v12  ;;  %v1825_v7 = vld [vmem:[#allocation5 + $0x90] sm:$0xff] }
 0x2c7   :  { %1797 = vmatmul.mubr.f32.gmra.mrb[44].mxu1 %v1650_v19  ;;  %v1652_v40 = vmax.f32 %v1636_v20, 0.0  ;;  %v6864_v49 = vpack.c.bf16 %v1826_v47, %v1825_v7  ;;  %v1947_v7 = vld [vmem:[%s9850_s6 + $0x18] sm:$0xff] }
 0x2c8   :  { %v1653_v29 = vmax.f32 %v1637_v26, 0.0  ;;  %6856 = vmatpush1.bf16.msra.mxu1 %v6855_v16  ;;  %v2048_v47 = vld [vmem:[#allocation7 + $0x18] sm:$0xff] }
 0x2c9   :  { %6857 = vmatprep.subr.bf16.mxu1 %v7644_v48 }
 0x2ca   :  { %5335 = vmatprep.mubr.msk.f32.mxu1 %vm150_vm0, %v1653_v29 }
 0x2cb   :  { %1802 = vmatmul.mubr.f32.gmra.mrb[46].mxu1 %v1652_v40 }
 0x2cc   :  { %6859 = vmatpush1.bf16.msra.mxu1 %v6858_v38  ;;  %5336 = vmatprep.mubr.msk.f32.mxu1 %vm150_vm0, %v1639_v14  ;;  %v2045_v14 = vld [vmem:[#allocation7] sm:$0xff] }
 0x2cd   :  { %6860 = vmatprep.subr.bf16.mxu1 %v7644_v48 }
 0x2d0   :  { %6862 = vmatpush1.bf16.msra.mxu1 %v6861_v6  ;;  %v2047_v6 = vld [vmem:[#allocation7 + $0x10] sm:$0xff] }
 0x2d1   :  { %6863 = vmatprep.subr.bf16.mxu1 %v7644_v48 }
 0x2d4   :  { %6865 = vmatpush1.bf16.msra.mxu1 %v6864_v49  ;;  %v2150_v49 = vld [vmem:[#allocation8] sm:$0xff] }
 0x2d5   :  { %6866 = vmatprep.subr.bf16.mxu1 %v7644_v48 }
 0x2d8   :  { %6868 = vmatpush1.bf16.msra.mxu1 %v6867_v55 }
 0x2d9   :  { %6869 = vmatprep.subr.bf16.mxu1 %v7644_v48 }
 0x2dc   :  { %6871 = vmatpush1.bf16.msra.mxu1 %v6870_v13 }
 0x2df   :  { %1896 = vmatmul.mubr.f32.vlgmr.msra.gmra.mrb[48].mxu1 %v1638_v17 }
 0x2e0   :  { %5337 = vmatprep.mubr.msk.f32.mxu1 %vm150_vm0, %v1641_v23 }
 0x2e3   :  { %1901 = vmatmul.mubr.f32.gmra.mrb[50].mxu1 %v1640_v27 }
 0x2e4   :  { %5338 = vmatprep.mubr.msk.f32.mxu1 %vm150_vm0, %v1643_v31 }
 0x2e7   :  { %1906 = vmatmul.mubr.f32.gmra.mrb[52].mxu1 %v1642_v44 }
 0x2e8   :  { %5339 = vmatprep.mubr.msk.f32.mxu1 %vm150_vm0, %v1645_v51 }
 0x2eb   :  { %1911 = vmatmul.mubr.f32.gmra.mrb[54].mxu1 %v1644_v53 }
 0x2ec   :  { %5340 = vmatprep.mubr.msk.f32.mxu1 %vm150_vm0, %v1647_v61 }
 0x2ef   :  { %1916 = vmatmul.mubr.f32.gmra.mrb[56].mxu1 %v1646_v34 }
 0x2f0   :  { %5341 = vmatprep.mubr.msk.f32.mxu1 %vm150_vm0, %v1649_v1 }
 0x2f3   :  { %1921 = vmatmul.mubr.f32.gmra.mrb[58].mxu1 %v1648_v58 }
 0x2f4   :  { %5342 = vmatprep.mubr.msk.f32.mxu1 %vm150_vm0, %v1651_v12 }
 0x2f7   :  { %1926 = vmatmul.mubr.f32.gmra.mrb[60].mxu1 %v1650_v19 }
 0x2f8   :  { %5343 = vmatprep.mubr.msk.f32.mxu1 %vm150_vm0, %v1653_v29 }
 0x2fb   :  { %1931 = vmatmul.mubr.f32.gmra.mrb[62].mxu1 %v1652_v40  ;;  %v1945_v40 = vld [vmem:[%s9850_s6 + $0x8] sm:$0xff] }
 0x2fc   :  { %6213 = vmatprep.mubr.msk.f32.mxu1 %vm150_vm0, %v2045_v14 }
 0x382   :  { %v1768_v17 = vpop.f32.mrb[32].mxu1 }
 0x383   :  { %v1770_v18 = vpop.f32.mrb[33].mxu1 }
 0x386   :  { %v1773_v22 = vpop.f32.mrb[34].mxu1 }
 0x387   :  { %v1775_v23 = vpop.f32.mrb[35].mxu1 }
 0x38a   :  { %v1778_v27 = vpop.f32.mrb[36].mxu1 }
 0x38b   :  { %v1780_v28 = vpop.f32.mrb[37].mxu1 }
 0x38e   :  { %v1783_v39 = vpop.f32.mrb[38].mxu1 }
 0x38f   :  { %v1785_v31 = vpop.f32.mrb[39].mxu1 }
 0x390   :  { %v2151_v31 = vld [vmem:[#allocation8 + $0x8] sm:$0xff] }
 0x392   :  { %v1788_v44 = vpop.f32.mrb[40].mxu1 }
 0x393   :  { %v1790_v45 = vpop.f32.mrb[41].mxu1 }
 0x394   :  { %v2152_v45 = vld [vmem:[#allocation8 + $0x10] sm:$0xff] }
 0x396   :  { %v1793_v50 = vpop.f32.mrb[42].mxu1 }
 0x397   :  { %v1795_v51 = vpop.f32.mrb[43].mxu1 }
 0x398   :  { %v5361_v51 = vld [vmem:[%s9853_s9 + $0xc8] sm:$0xff] }
 0x39a   :  { %v1798_v53 = vpop.f32.mrb[44].mxu1 }
 0x39b   :  { %v1800_v54 = vpop.f32.mrb[45].mxu1 }
 0x39c   :  { %v2153_v54 = vld [vmem:[#allocation8 + $0x18] sm:$0xff] }
 0x39e   :  { %v1803_v60 = vpop.f32.mrb[46].mxu1 }
 0x39f   :  { %v1805_v61 = vpop.f32.mrb[47].mxu1 }
 0x3a0   :  { %v2276_v61 = vld [vmem:[#allocation8 + $0x20] sm:$0xff] }
 0x3b2   :  { %v1897_v32 = vpop.f32.mrb[48].mxu1 }
 0x3b3   :  { %v1936_v33 = vmax.f32 %v1768_v17, %v1897_v32  ;;  %v1899_v34 = vpop.f32.mrb[49].mxu1 }
 0x3b4   :  { %v5360_v34 = vld [vmem:[%s9853_s9 + $0xc0] sm:$0xff] }
 0x3b6   :  { %v1902_v35 = vpop.f32.mrb[50].mxu1 }
 0x3b7   :  { %v1937_v36 = vmax.f32 %v1773_v22, %v1902_v35  ;;  %v1904_v37 = vpop.f32.mrb[51].mxu1  ;;  %v5362_v35 = vld [vmem:[%s9853_s9 + $0xd0] sm:$0xff] }
 0x3b8   :  { %v2843_v37 = vld [vmem:[#allocation8 + $0x68] sm:$0xff] }
 0x3b9   :  { %v6872_v43 = vpack.c.bf16 %v1937_v36, %v1936_v33  ;;  %v2842_v33 = vld [vmem:[#allocation8 + $0x60] sm:$0xff]  ;;  %v2277_v36 = vld [vmem:[#allocation8 + $0x28] sm:$0xff] }
 0x3ba   :  { %v1907_v62 = vpop.f32.mrb[52].mxu1 }
 0x3bb   :  { %v1938_v1 = vmax.f32 %v1778_v27, %v1907_v62  ;;  %v1909_v42 = vpop.f32.mrb[53].mxu1  ;;  %6873 = vmatprep.subr.bf16.mxu0 %v6872_v43  ;;  %6889 = vmatprep.subr.bf16.mxu1 %v6872_v43  ;;  %v2844_v62 = vld [vmem:[#allocation8 + $0x70] sm:$0xff] }
 0x3bc   :  { %6875 = vmatpush3.bf16.msra.mxu0 %v6872_v43  ;;  %6891 = vmatpush3.bf16.msra.mxu1 %v6872_v43  ;;  %v2278_v43 = vld [vmem:[#allocation8 + $0x30] sm:$0xff]  ;;  %v5365_v42 = vld [vmem:[%s9853_s9 + $0xe8] sm:$0xff] }
 0x3be   :  { %v1912_v56 = vpop.f32.mrb[54].mxu1 }
 0x3bf   :  { %v1939_v58 = vmax.f32 %v1783_v39, %v1912_v56  ;;  %v1914_v63 = vpop.f32.mrb[55].mxu1  ;;  %v5367_v56 = vld [vmem:[%s9853_s9 + $0xf8] sm:$0xff] }
 0x3c0   :  { %v5364_v63 = vld [vmem:[%s9853_s9 + $0xe0] sm:$0xff] }
 0x3c1   :  { %v6876_v4 = vpack.c.bf16 %v1939_v58, %v1938_v1  ;;  %v6922_v1 = vpack.c.bf16 %v5362_v35, %v5360_v34  ;;  %v2279_v58 = vld [vmem:[#allocation8 + $0x38] sm:$0xff] }
 0x3c2   :  { %v1917_v8 = vpop.f32.mrb[56].mxu1 }
 0x3c3   :  { %v1940_v10 = vmax.f32 %v1788_v44, %v1917_v8  ;;  %v1919_v11 = vpop.f32.mrb[57].mxu1  ;;  %6877 = vmatprep.subr.bf16.mxu0 %v6876_v4  ;;  %6893 = vmatprep.subr.bf16.mxu1 %v6876_v4  ;;  %v2607_v44 = vld [vmem:[#allocation8 + $0x48] sm:$0xff]  ;;  %v2845_v8 = vld [vmem:[#allocation8 + $0x78] sm:$0xff] }
 0x3c4   :  { %6879 = vmatpush3.bf16.msra.mxu0 %v6876_v4  ;;  %6895 = vmatpush3.bf16.msra.mxu1 %v6876_v4  ;;  %v5366_v4 = vld [vmem:[%s9853_s9 + $0xf0] sm:$0xff]  ;;  %v5371_v11 = vld [vmem:[%s9853_s9 + $0x118] sm:$0xff] }
 0x3c6   :  { %v1922_v12 = vpop.f32.mrb[58].mxu1 }
 0x3c7   :  { %v1941_v15 = vmax.f32 %v1793_v50, %v1922_v12  ;;  %v1924_v16 = vpop.f32.mrb[59].mxu1  ;;  %v2608_v50 = vld [vmem:[#allocation8 + $0x50] sm:$0xff]  ;;  %v3078_v12 = vld [vmem:[#allocation8 + $0x80] sm:$0xff] }
 0x3c8   :  { %v6926_v16 = vpack.c.bf16 %v5366_v4, %v5364_v63 }
 0x3c9   :  { %v6880_v19 = vpack.c.bf16 %v1941_v15, %v1940_v10  ;;  %v5369_v10 = vld [vmem:[%s9853_s9 + $0x108] sm:$0xff]  ;;  %v6924_v15 = vpack.c.bf16 %v5367_v56, %v5365_v42  ;;  %v3347_v56 = vld [vmem:[%s9855_s11 + $0x30] sm:$0xff] }
 0x3ca   :  { %v1927_v20 = vpop.f32.mrb[60].mxu1 }
 0x3cb   :  { %v1942_v21 = vmax.f32 %v1798_v53, %v1927_v20  ;;  %v1929_v24 = vpop.f32.mrb[61].mxu1  ;;  %6881 = vmatprep.subr.bf16.mxu0 %v6880_v19  ;;  %6897 = vmatprep.subr.bf16.mxu1 %v6880_v19  ;;  %v5363_v53 = vld [vmem:[%s9853_s9 + $0xd8] sm:$0xff]  ;;  %v5368_v20 = vld [vmem:[%s9853_s9 + $0x100] sm:$0xff] }
 0x3cc   :  { %6883 = vmatpush3.bf16.msra.mxu0 %v6880_v19  ;;  %6899 = vmatpush3.bf16.msra.mxu1 %v6880_v19  ;;  %v6920_v32 = vpack.c.bf16 %v5363_v53, %v5361_v51  ;;  %v6928_v19 = vpack.c.bf16 %v5371_v11, %v5369_v10  ;;  %v3079_v24 = vld [vmem:[#allocation8 + $0x88] sm:$0xff]  ;;  %v3360_v51 = vld [vmem:[%s9855_s11 + $0x98] sm:$0xff] }
 0x3cd   :  { %v3366_v10 = vld [vmem:[%s9855_s11 + $0xc8] sm:$0xff] }
 0x3ce   :  { %v1932_v25 = vpop.f32.mrb[62].mxu1 }
 0x3cf   :  { %v1943_v26 = vmax.f32 %v1803_v60, %v1932_v25  ;;  %v1934_v29 = vpop.f32.mrb[63].mxu1  ;;  %v2609_v60 = vld [vmem:[#allocation8 + $0x58] sm:$0xff]  ;;  %v5373_v25 = vld [vmem:[%s9853_s9 + $0x128] sm:$0xff] }
 0x3d0   :  { %v3080_v29 = vld [vmem:[#allocation8 + $0x90] sm:$0xff] }
 0x3d1   :  { %v6884_v38 = vpack.c.bf16 %v1943_v26, %v1942_v21  ;;  %v5370_v21 = vld [vmem:[%s9853_s9 + $0x110] sm:$0xff]  ;;  %v5375_v26 = vld [vmem:[%s9853_s9 + $0x138] sm:$0xff] }
 0x3d3   :  { %6885 = vmatprep.subr.bf16.mxu0 %v6884_v38  ;;  %6901 = vmatprep.subr.bf16.mxu1 %v6884_v38 }
 0x3d4   :  { %6887 = vmatpush3.bf16.msra.mxu0 %v6884_v38  ;;  %6903 = vmatpush3.bf16.msra.mxu1 %v6884_v38  ;;  %v6930_v38 = vpack.c.bf16 %v5370_v21, %v5368_v20  ;;  %v3350_v20 = vld [vmem:[%s9855_s11 + $0x48] sm:$0xff] }
 0x3d7   :  { %6192 = vmatmul.mubr.msk.f32.vlgmr.msra.gmra.mrb[24].mxu0 %vm150_vm0, %v1945_v40  ;;  %6214 = vmatmul.mubr.msk.f32.vlgmr.msra.gmra.mrb[64].mxu1 %vm150_vm0, %v2046_v41  ;;  %v6932_v40 = vpack.c.bf16 %v5375_v26, %v5373_v25  ;;  %v5372_v41 = vld [vmem:[%s9853_s9 + $0x120] sm:$0xff]  ;;  %v2253_v25 = vld [vmem:[%s9853_s9 + $0x10] sm:$0xff]  ;;  %v2256_v26 = vld [vmem:[%s9853_s9 + $0x28] sm:$0xff] }
 0x3d8   :  { %6194 = vmatprep.mubr.msk.f32.mxu0 %vm150_vm0, %v1946_v46  ;;  %6216 = vmatprep.mubr.msk.f32.mxu1 %vm150_vm0, %v2047_v6  ;;  %v5374_v46 = vld [vmem:[%s9853_s9 + $0x130] sm:$0xff]  ;;  %v3081_v6 = vld [vmem:[#allocation8 + $0x98] sm:$0xff] }
 0x3db   :  { %6195 = vmatmul.mubr.msk.f32.gmra.mrb[26].mxu0 %vm150_vm0, %v1947_v7  ;;  %6217 = vmatmul.mubr.msk.f32.gmra.mrb[66].mxu1 %vm150_vm0, %v2048_v47  ;;  %v6934_v7 = vpack.c.bf16 %v5374_v46, %v5372_v41  ;;  %v5377_v47 = vld [vmem:[%s9853_s9 + $0x148] sm:$0xff]  ;;  %v3367_v46 = vld [vmem:[%s9855_s11 + $0xd0] sm:$0xff] }
 0x3dc   :  { %6227 = vmatprep.mubr.msk.f32.mxu0 %vm435_vm1, %v2150_v49  ;;  %6255 = vmatprep.mubr.msk.f32.mxu1 %vm435_vm1, %v2606_v52  ;;  %v5379_v49 = vld [vmem:[%s9853_s9 + $0x158] sm:$0xff] }
 0x3dd   :  { %v6936_v52 = vpack.c.bf16 %v5379_v49, %v5377_v47  ;;  %v3351_v49 = vld [vmem:[%s9855_s11 + $0x50] sm:$0xff] }
 0x4aa   :  { %v6193_v30 = vpop.f32.mrb[24].mxu0  ;;  %v6215_v55 = vpop.f32.mrb[64].mxu1 }
 0x4ab   :  { %v2147_v57 = vmax.f32 %v6193_v30, %v6215_v55  ;;  %v2026_v59 = vpop.f32.mrb[25].mxu0  ;;  %v2127_v13 = vpop.f32.mrb[65].mxu1  ;;  %v5376_v30 = vld [vmem:[%s9853_s9 + $0x140] sm:$0xff]  ;;  %v5378_v55 = vld [vmem:[%s9853_s9 + $0x150] sm:$0xff] }
 0x4ac   :  { %v2146_v9 = vmax.f32 %v2026_v59, %v2127_v13  ;;  %v5381_v59 = vld [vmem:[%s9853_s9 + $0x168] sm:$0xff]  ;;  %v5383_v13 = vld [vmem:[%s9853_s9 + $0x178] sm:$0xff] }
 0x4ae   :  { %v6904_v14 = vpack.c.bf16 %v2147_v57, %v2146_v9  ;;  %v6196_v17 = vpop.f32.mrb[26].mxu0  ;;  %v6218_v18 = vpop.f32.mrb[66].mxu1  ;;  %v6938_v57 = vpack.c.bf16 %v5378_v55, %v5376_v30  ;;  %v6940_v9 = vpack.c.bf16 %v5383_v13, %v5381_v59  ;;  %v2257_v59 = vld [vmem:[%s9853_s9 + $0x30] sm:$0xff]  ;;  %v2260_v13 = vld [vmem:[%s9853_s9 + $0x48] sm:$0xff] }
 0x4af   :  { %v2149_v22 = vmax.f32 %v6196_v17, %v6218_v18  ;;  %v2036_v23 = vpop.f32.mrb[27].mxu0  ;;  %v2137_v27 = vpop.f32.mrb[67].mxu1  ;;  %v5382_v17 = vld [vmem:[%s9853_s9 + $0x170] sm:$0xff] }
 0x4b0   :  { %v2148_v28 = vmax.f32 %v2036_v23, %v2137_v27  ;;  %6905 = vmatprep.subr.bf16.mxu0 %v6904_v14  ;;  %6969 = vmatprep.subr.bf16.mxu1 %v6904_v14  ;;  %v2254_v23 = vld [vmem:[%s9853_s9 + $0x18] sm:$0xff] }
 0x4b1   :  { %6907 = vmatpush3.bf16.msra.mxu0 %v6904_v14  ;;  %6971 = vmatpush3.bf16.msra.mxu1 %v6904_v14 }
 0x4b2   :  { %v8536_v39 = vpack.c.bf16 %v2149_v22, %v2148_v28  ;;  %v2252_v22 = vld [vmem:[%s9853_s9 + $0x8] sm:$0xff]  ;;  %v3357_v28 = vld [vmem:[%s9855_s11 + $0x80] sm:$0xff] }
 0x4b3   :  { %v6944_v27 = vpack.c.bf16 %v2254_v23, %v2252_v22  ;;  %v3369_v23 = vld [vmem:[%s9855_s11 + $0xe0] sm:$0xff] }
 0x4b4   :  { %6909 = vmatprep.subr.bf16.mxu0 %v8536_v39  ;;  %6973 = vmatprep.subr.bf16.mxu1 %v8536_v39 }
 0x4b5   :  { %6911 = vmatpush3.bf16.msra.mxu0 %v8536_v39  ;;  %6975 = vmatpush3.bf16.msra.mxu1 %v8536_v39 }
 0x4b6   :  { %6913 = vmatprep.subr.bf16.mxu0 %v6904_v14  ;;  %7001 = vmatprep.subr.bf16.mxu1 %v6904_v14 }
 0x4b8   :  { %6228 = vmatmul.mubr.msk.f32.vlgmr.msra.gmra.mrb[28].mxu0 %vm435_vm1, %v2151_v31  ;;  %6256 = vmatmul.mubr.msk.f32.vlgmr.msra.gmra.mrb[68].mxu1 %vm435_vm1, %v2607_v44  ;;  %v3341_v31 = vld [vmem:[%s9855_s11] sm:$0xff] }
 0x4b9   :  { %6915 = vmatpush3.bf16.msra.mxu0 %v6904_v14  ;;  %7003 = vmatpush3.bf16.msra.mxu1 %v6904_v14 }
 0x4ba   :  { %6917 = vmatprep.subr.bf16.mxu0 %v8536_v39  ;;  %7005 = vmatprep.subr.bf16.mxu1 %v8536_v39 }
 0x4bb   :  { %6230 = vmatprep.mubr.msk.f32.mxu0 %vm435_vm1, %v2152_v45  ;;  %6258 = vmatprep.mubr.msk.f32.mxu1 %vm435_vm1, %v2608_v50  ;;  %v3342_v45 = vld [vmem:[%s9855_s11 + $0x8] sm:$0xff]  ;;  %v3359_v50 = vld [vmem:[%s9855_s11 + $0x90] sm:$0xff] }
 0x4bc   :  { %6231 = vmatmul.mubr.msk.f32.gmra.mrb[30].mxu0 %vm435_vm1, %v2153_v54  ;;  %6259 = vmatmul.mubr.msk.f32.gmra.mrb[70].mxu1 %vm435_vm1, %v2609_v60  ;;  %v7066_v53 = vpack.c.bf16 %v3342_v45, %v3341_v31  ;;  %v7068_v54 = vpack.c.bf16 %v3360_v51, %v3359_v50  ;;  %v3343_v60 = vld [vmem:[%s9855_s11 + $0x10] sm:$0xff]  ;;  %v3353_v31 = vld [vmem:[%s9855_s11 + $0x60] sm:$0xff] }
 0x4bd   :  { %6919 = vmatpush3.bf16.msra.mxu0 %v8536_v39  ;;  %7007 = vmatpush3.bf16.msra.mxu1 %v8536_v39  ;;  %v2259_v50 = vld [vmem:[%s9853_s9 + $0x40] sm:$0xff]  ;;  %v2261_v51 = vld [vmem:[%s9853_s9 + $0x50] sm:$0xff] }
 0x4be   :  { %7033 = vmatprep.subr.bf16.mxu1 %v6904_v14  ;;  %6241 = vmatprep.mubr.msk.f32.mxu0 %vm435_vm1, %v2276_v61  ;;  %v3344_v61 = vld [vmem:[%s9855_s11 + $0x18] sm:$0xff] }
 0x4bf   :  { %6269 = vmatprep.mubr.msk.f32.mxu1 %vm435_vm1, %v2842_v33  ;;  %6921 = vmatprep.subr.bf16.mxu0 %v6920_v32  ;;  %v3361_v32 = vld [vmem:[%s9855_s11 + $0xa0] sm:$0xff]  ;;  %v3362_v33 = vld [vmem:[%s9855_s11 + $0xa8] sm:$0xff]  ;;  %v7070_v34 = vpack.c.bf16 %v3344_v61, %v3343_v60 }
 0x4c0   :  { %6242 = vmatmul.mubr.msk.f32.vlgmr.msra.gmra.mrb[32].mxu0 %vm435_vm1, %v2277_v36  ;;  %6270 = vmatmul.mubr.msk.f32.vlgmr.msra.gmra.mrb[72].mxu1 %vm435_vm1, %v2843_v37  ;;  %v7072_v35 = vpack.c.bf16 %v3362_v33, %v3361_v32  ;;  %v3345_v36 = vld [vmem:[%s9855_s11 + $0x20] sm:$0xff]  ;;  %v3346_v37 = vld [vmem:[%s9855_s11 + $0x28] sm:$0xff]  ;;  %v2266_v33 = vld [vmem:[%s9853_s9 + $0x78] sm:$0xff] }
 0x4c1   :  { %7035 = vmatpush3.bf16.msra.mxu1 %v6904_v14  ;;  %6244 = vmatprep.mubr.msk.f32.mxu0 %vm435_vm1, %v2278_v43  ;;  %v5380_v14 = vld [vmem:[%s9853_s9 + $0x160] sm:$0xff]  ;;  %v3363_v43 = vld [vmem:[%s9855_s11 + $0xb0] sm:$0xff]  ;;  %v2264_v32 = vld [vmem:[%s9853_s9 + $0x68] sm:$0xff] }
 0x4c2   :  { %7037 = vmatprep.subr.bf16.mxu1 %v8536_v39  ;;  %6272 = vmatprep.mubr.msk.f32.mxu1 %vm435_vm1, %v2844_v62  ;;  %v6942_v18 = vpack.c.bf16 %v5382_v17, %v5380_v14  ;;  %v3364_v62 = vld [vmem:[%s9855_s11 + $0xb8] sm:$0xff] }
 0x4c3   :  { %6923 = vmatpush1.bf16.msra.mxu0 %v6922_v1  ;;  %v7074_v1 = vpack.c.bf16 %v3346_v37, %v3345_v36  ;;  %v7076_v42 = vpack.c.bf16 %v3364_v62, %v3363_v43  ;;  %v6954_v36 = vpack.c.bf16 %v2261_v51, %v2259_v50  ;;  %v6956_v37 = vpack.c.bf16 %v2266_v33, %v2264_v32  ;;  %v2263_v43 = vld [vmem:[%s9853_s9 + $0x60] sm:$0xff]  ;;  %v2265_v62 = vld [vmem:[%s9853_s9 + $0x70] sm:$0xff] }
 0x4c4   :  { %6245 = vmatmul.mubr.msk.f32.gmra.mrb[34].mxu0 %vm435_vm1, %v2279_v58  ;;  %6273 = vmatmul.mubr.msk.f32.gmra.mrb[74].mxu1 %vm435_vm1, %v2845_v8  ;;  %v3348_v58 = vld [vmem:[%s9855_s11 + $0x38] sm:$0xff]  ;;  %v3365_v8 = vld [vmem:[%s9855_s11 + $0xc0] sm:$0xff] }
 0x4c5   :  { %7039 = vmatpush3.bf16.msra.mxu1 %v8536_v39  ;;  %6283 = vmatprep.mubr.msk.f32.mxu1 %vm435_vm1, %v3078_v12  ;;  %v3358_v39 = vld [vmem:[%s9855_s11 + $0x88] sm:$0xff] }
 0x4c6   :  { %6925 = vmatprep.subr.bf16.mxu0 %v6924_v15  ;;  %2479 = vmatprep.mubr.f32.mxu0 %v7643_v0  ;;  %v7064_v44 = vpack.c.bf16 %v3358_v39, %v3357_v28  ;;  %v7078_v15 = vpack.c.bf16 %v3348_v58, %v3347_v56  ;;  %v2270_v56 = vld [vmem:[%s9853_s9 + $0x98] sm:$0xff] }
 0x4c7   :  { %6927 = vmatpush1.bf16.msra.mxu0 %v6926_v16  ;;  %v7080_v16 = vpack.c.bf16 %v3366_v10, %v3365_v8  ;;  %v6958_v8 = vpack.c.bf16 %v2265_v62, %v2263_v43 }
 0x4c8   :  { %6284 = vmatmul.mubr.msk.f32.vlgmr.msra.gmra.mrb[76].mxu1 %vm435_vm1, %v3079_v24  ;;  %6929 = vmatprep.subr.bf16.mxu0 %v6928_v19  ;;  %v3349_v19 = vld [vmem:[%s9855_s11 + $0x40] sm:$0xff] }
 0x4c9   :  { %6286 = vmatprep.mubr.msk.f32.mxu1 %vm435_vm1, %v3080_v29  ;;  %7065 = vmatprep.subr.bf16.mxu1 %v7064_v44  ;;  %v2251_v24 = vld [vmem:[%s9853_s9] sm:$0xff]  ;;  %v3354_v44 = vld [vmem:[%s9855_s11 + $0x68] sm:$0xff] }
 0x4ca   :  { %7067 = vmatpush3.bf16.msra.mxu1 %v7066_v53  ;;  %v6946_v47 = vpack.c.bf16 %v2253_v25, %v2251_v24  ;;  %v2274_v24 = vld [vmem:[%s9853_s9 + $0xb8] sm:$0xff] }
 0x4cb   :  { %6931 = vmatpush1.bf16.msra.mxu0 %v6930_v38  ;;  %7069 = vmatprep.subr.bf16.mxu1 %v7068_v54 }
 0x4cc   :  { %6287 = vmatmul.mubr.msk.f32.gmra.mrb[78].mxu1 %vm435_vm1, %v3081_v6  ;;  %6933 = vmatprep.subr.bf16.mxu0 %v6932_v40  ;;  %v2258_v40 = vld [vmem:[%s9853_s9 + $0x38] sm:$0xff] }
 0x4cd   :  { %v3368_v6 = vld [vmem:[%s9855_s11 + $0xd8] sm:$0xff]  ;;  %v6948_v55 = vpack.c.bf16 %v2258_v40, %v2256_v26 }
 0x4ce   :  { %7071 = vmatpush3.bf16.msra.mxu1 %v7070_v34  ;;  %v7084_v14 = vpack.c.bf16 %v3368_v6, %v3367_v46  ;;  %v2271_v46 = vld [vmem:[%s9853_s9 + $0xa0] sm:$0xff]  ;;  %v2273_v6 = vld [vmem:[%s9853_s9 + $0xb0] sm:$0xff] }
 0x4cf   :  { %6935 = vmatpush1.bf16.msra.mxu0 %v6934_v7  ;;  %7073 = vmatprep.subr.bf16.mxu1 %v7072_v35  ;;  %v7082_v7 = vpack.c.bf16 %v3350_v20, %v3349_v19  ;;  %v7090_v35 = vpack.c.bf16 %v3354_v44, %v3353_v31  ;;  %v2272_v20 = vld [vmem:[%s9853_s9 + $0xa8] sm:$0xff]  ;;  %v5404_v31 = vld [vmem:[%s9853_s9 + $0x1c0] sm:$0xff]  ;;  %v5406_v44 = vld [vmem:[%s9853_s9 + $0x1d0] sm:$0xff] }
 0x4d0   :  { %6937 = vmatprep.subr.bf16.mxu0 %v6936_v52  ;;  %v3352_v52 = vld [vmem:[%s9855_s11 + $0x58] sm:$0xff]  ;;  %v6964_v40 = vpack.c.bf16 %v2274_v24, %v2272_v20  ;;  %v6986_v50 = vpack.c.bf16 %v5406_v44, %v5404_v31  ;;  %v5430_v20 = vld [vmem:[%s9853_s9 + $0x250] sm:$0xff]  ;;  %v5433_v24 = vld [vmem:[%s9853_s9 + $0x268] sm:$0xff] }
 0x4d1   :  { %v7086_v28 = vpack.c.bf16 %v3352_v52, %v3351_v49  ;;  %v6966_v49 = vpack.c.bf16 %v2273_v6, %v2271_v46  ;;  %v5432_v6 = vld [vmem:[%s9853_s9 + $0x260] sm:$0xff]  ;;  %v5446_v31 = vld [vmem:[%s9853_s9 + $0x2d0] sm:$0xff]  ;;  %v5449_v44 = vld [vmem:[%s9853_s9 + $0x2e8] sm:$0xff] }
 0x4d2   :  { %7075 = vmatpush3.bf16.msra.mxu1 %v7074_v1 }
 0x4d3   :  { %6939 = vmatpush1.bf16.msra.mxu0 %v6938_v57  ;;  %7077 = vmatprep.subr.bf16.mxu1 %v7076_v42  ;;  %v2255_v57 = vld [vmem:[%s9853_s9 + $0x20] sm:$0xff]  ;;  %v2268_v42 = vld [vmem:[%s9853_s9 + $0x88] sm:$0xff] }
 0x4d4   :  { %6941 = vmatprep.subr.bf16.mxu0 %v6940_v9  ;;  %v6950_v39 = vpack.c.bf16 %v2257_v59, %v2255_v57  ;;  %v6960_v10 = vpack.c.bf16 %v2270_v56, %v2268_v42  ;;  %v5401_v57 = vld [vmem:[%s9853_s9 + $0x1a8] sm:$0xff]  ;;  %v5403_v59 = vld [vmem:[%s9853_s9 + $0x1b8] sm:$0xff]  ;;  %v5416_v42 = vld [vmem:[%s9853_s9 + $0x220] sm:$0xff] }
 0x4d5   :  { %v5418_v56 = vld [vmem:[%s9853_s9 + $0x230] sm:$0xff] }
 0x4d6   :  { %7079 = vmatpush3.bf16.msra.mxu1 %v7078_v15  ;;  %v2267_v15 = vld [vmem:[%s9853_s9 + $0x80] sm:$0xff] }
 0x4d7   :  { %6943 = vmatpush1.bf16.msra.mxu0 %v6942_v18  ;;  %7081 = vmatprep.subr.bf16.mxu1 %v7080_v16  ;;  %v2262_v18 = vld [vmem:[%s9853_s9 + $0x58] sm:$0xff]  ;;  %v2269_v16 = vld [vmem:[%s9853_s9 + $0x90] sm:$0xff] }
 0x4d8   :  { %6945 = vmatprep.subr.bf16.mxu0 %v6944_v27  ;;  %v3370_v27 = vld [vmem:[%s9855_s11 + $0xe8] sm:$0xff]  ;;  %v6952_v45 = vpack.c.bf16 %v2262_v18, %v2260_v13  ;;  %v6962_v26 = vpack.c.bf16 %v2269_v16, %v2267_v15  ;;  %v5402_v18 = vld [vmem:[%s9853_s9 + $0x1b0] sm:$0xff]  ;;  %v5428_v16 = vld [vmem:[%s9853_s9 + $0x240] sm:$0xff] }
 0x4d9   :  { %v7088_v60 = vpack.c.bf16 %v3370_v27, %v3369_v23  ;;  %v5405_v23 = vld [vmem:[%s9853_s9 + $0x1c8] sm:$0xff]  ;;  %v5407_v27 = vld [vmem:[%s9853_s9 + $0x1d8] sm:$0xff] }
 0x4da   :  { %7083 = vmatpush3.bf16.msra.mxu1 %v7082_v7  ;;  %v5397_v7 = vld [vmem:[%s9853_s9 + $0x188] sm:$0xff] }
 0x4db   :  { %7085 = vmatprep.subr.bf16.mxu1 %v7084_v14  ;;  %v6980_v14 = vpack.c.bf16 %v5403_v59, %v5401_v57  ;;  %v5438_v57 = vld [vmem:[%s9853_s9 + $0x290] sm:$0xff]  ;;  %v5441_v59 = vld [vmem:[%s9853_s9 + $0x2a8] sm:$0xff] }
 0x4de   :  { %7087 = vmatpush3.bf16.msra.mxu1 %v7086_v28 }
 0x4df   :  { %7089 = vmatprep.subr.bf16.mxu1 %v7088_v60  ;;  %v5410_v60 = vld [vmem:[%s9853_s9 + $0x1f0] sm:$0xff] }
 0x4e2   :  { %7091 = vmatpush3.bf16.msra.mxu1 %v7090_v35  ;;  %v5412_v35 = vld [vmem:[%s9853_s9 + $0x200] sm:$0xff] }
 0x58b   :  { %v8693_v63 = vpop.f32.mrb[28].mxu0  ;;  %v8695_v4 = vpop.f32.mrb[68].mxu1 }
 0x58c   :  { %v8703_v11 = vpop.f32.mrb[29].mxu0  ;;  %v8705_v12 = vpop.f32.mrb[69].mxu1 }
 0x58f   :  { %v8713_v21 = vpop.f32.mrb[30].mxu0  ;;  %v8724_v29 = vpop.f32.mrb[70].mxu1 }
 0x590   :  { %v8726_v38 = vpop.f32.mrb[31].mxu0  ;;  %v8731_v41 = vpop.f32.mrb[71].mxu1 }
 0x593   :  { %v6243_v30 = vpop.f32.mrb[32].mxu0  ;;  %v8754_v9 = vpop.f32.mrb[72].mxu1 }
 0x594   :  { %v2358_v17 = vpop.f32.mrb[33].mxu0  ;;  %v8759_v22 = vpop.f32.mrb[73].mxu1 }
 0x595   :  { %5384 = vmatmul.mubr.msk.f32.vlgmr.msra.gmra.mrb[36].mxu0 %vm2402_vm2, %v2358_v17  ;;  %v5400_v17 = vld [vmem:[%s9853_s9 + $0x1a0] sm:$0xff] }
 0x596   :  { %6947 = vmatpush1.bf16.msra.mxu0 %v6946_v47  ;;  %2485 = vmatprep.mubr.f32.mxu0 %v7643_v0  ;;  %v5399_v47 = vld [vmem:[%s9853_s9 + $0x198] sm:$0xff]  ;;  %v6982_v28 = vpack.c.bf16 %v5402_v18, %v5400_v17  ;;  %v5440_v17 = vld [vmem:[%s9853_s9 + $0x2a0] sm:$0xff]  ;;  %v5442_v18 = vld [vmem:[%s9853_s9 + $0x2b0] sm:$0xff] }
 0x597   :  { %6949 = vmatprep.subr.bf16.mxu0 %v6948_v55  ;;  %v6246_v53 = vpop.f32.mrb[34].mxu0  ;;  %v8781_v54 = vpop.f32.mrb[74].mxu1  ;;  %v6976_v52 = vpack.c.bf16 %v5399_v47, %v5397_v7  ;;  %v5398_v55 = vld [vmem:[%s9853_s9 + $0x190] sm:$0xff]  ;;  %v5437_v47 = vld [vmem:[%s9853_s9 + $0x288] sm:$0xff] }
 0x598   :  { %v2368_v61 = vpop.f32.mrb[35].mxu0  ;;  %v8789_v34 = vpop.f32.mrb[75].mxu1  ;;  %v5434_v7 = vld [vmem:[%s9853_s9 + $0x270] sm:$0xff] }
 0x599   :  { %5385 = vmatmul.mubr.msk.f32.gmra.mrb[38].mxu0 %vm2402_vm2, %v6243_v30  ;;  %v5396_v30 = vld [vmem:[%s9853_s9 + $0x180] sm:$0xff] }
 0x59a   :  { %6951 = vmatpush1.bf16.msra.mxu0 %v6950_v39  ;;  %2491 = vmatprep.mubr.f32.mxu0 %v7643_v0  ;;  %v6978_v13 = vpack.c.bf16 %v5398_v55, %v5396_v30  ;;  %v6984_v39 = vpack.c.bf16 %v5407_v27, %v5405_v23  ;;  %v5436_v55 = vld [vmem:[%s9853_s9 + $0x280] sm:$0xff]  ;;  %v5445_v23 = vld [vmem:[%s9853_s9 + $0x2c8] sm:$0xff]  ;;  %v7022_v27 = vpack.c.bf16 %v5442_v18, %v5440_v17 }
 0x59b   :  { %6953 = vmatprep.subr.bf16.mxu0 %v6952_v45  ;;  %v8799_v1 = vpop.f32.mrb[76].mxu1  ;;  %v5409_v45 = vld [vmem:[%s9853_s9 + $0x1e8] sm:$0xff]  ;;  %v3313_v18 = vld [vmem:[%s9854_s10] sm:$0x3] }
 0x59c   :  { %v8807_v58 = vpop.f32.mrb[77].mxu1 }
 0x59d   :  { %5386 = vmatmul.mubr.msk.f32.gmra.mrb[40].mxu0 %vm2402_vm2, %v2368_v61  ;;  %v5413_v61 = vld [vmem:[%s9853_s9 + $0x208] sm:$0xff] }
 0x59e   :  { %6955 = vmatpush1.bf16.msra.mxu0 %v6954_v36  ;;  %2497 = vmatprep.mubr.f32.mxu0 %v7643_v0  ;;  %v5414_v36 = vld [vmem:[%s9853_s9 + $0x210] sm:$0xff] }
 0x59f   :  { %6957 = vmatprep.subr.bf16.mxu0 %v6956_v37  ;;  %v8817_v19 = vpop.f32.mrb[78].mxu1  ;;  %v5417_v37 = vld [vmem:[%s9853_s9 + $0x228] sm:$0xff]  ;;  %v6994_v43 = vpack.c.bf16 %v5414_v36, %v5412_v35  ;;  %v5467_v35 = vld [vmem:[%s9853_s9 + $0x338] sm:$0xff] }
 0x5a0   :  { %v8825_v25 = vpop.f32.mrb[79].mxu1 }
 0x5a1   :  { %5387 = vmatmul.mubr.msk.f32.gmra.mrb[42].mxu0 %vm2402_vm2, %v6246_v53  ;;  %v5408_v53 = vld [vmem:[%s9853_s9 + $0x1e0] sm:$0xff] }
 0x5a2   :  { %6959 = vmatpush1.bf16.msra.mxu0 %v6958_v8  ;;  %2580 = vmatprep.mubr.f32.mxu0 %v7643_v0  ;;  %v6990_v32 = vpack.c.bf16 %v5410_v60, %v5408_v53  ;;  %v5429_v8 = vld [vmem:[%s9853_s9 + $0x248] sm:$0xff] }
 0x5a3   :  { %6961 = vmatprep.subr.bf16.mxu0 %v6960_v10  ;;  %v6998_v10 = vpack.c.bf16 %v5418_v56, %v5416_v42  ;;  %v5461_v53 = vld [vmem:[%s9853_s9 + $0x308] sm:$0xff]  ;;  %v5471_v42 = vld [vmem:[%s9853_s9 + $0x358] sm:$0xff] }
 0x5a6   :  { %6963 = vmatpush1.bf16.msra.mxu0 %v6962_v26  ;;  %v5435_v26 = vld [vmem:[%s9853_s9 + $0x278] sm:$0xff] }
 0x5a7   :  { %6965 = vmatprep.subr.bf16.mxu0 %v6964_v40  ;;  %v7010_v40 = vpack.c.bf16 %v5430_v20, %v5428_v16  ;;  %v7012_v46 = vpack.c.bf16 %v5435_v26, %v5433_v24  ;;  %v5472_v24 = vld [vmem:[%s9853_s9 + $0x360] sm:$0xff]  ;;  %v5474_v26 = vld [vmem:[%s9853_s9 + $0x370] sm:$0xff] }
 0x5aa   :  { %6967 = vmatpush1.bf16.msra.mxu0 %v6966_v49  ;;  %v5439_v49 = vld [vmem:[%s9853_s9 + $0x298] sm:$0xff] }
 0x5ab   :  { %6977 = vmatprep.subr.bf16.mxu0 %v6976_v52  ;;  %v7014_v52 = vpack.c.bf16 %v5434_v7, %v5432_v6  ;;  %v7016_v30 = vpack.c.bf16 %v5439_v49, %v5437_v47  ;;  %v5476_v7 = vld [vmem:[%s9853_s9 + $0x380] sm:$0xff]  ;;  %v5478_v47 = vld [vmem:[%s9853_s9 + $0x390] sm:$0xff]  ;;  %v5481_v49 = vld [vmem:[%s9853_s9 + $0x3a8] sm:$0xff] }
 0x5ad   :  { %5388 = vmatmul.mubr.msk.f32.vlgmr.msra.gmra.mrb[36].mxu0 %vm2402_vm2, %v8703_v11  ;;  %v5411_v11 = vld [vmem:[%s9853_s9 + $0x1f8] sm:$0xff] }
 0x5ae   :  { %6979 = vmatpush1.bf16.msra.mxu0 %v6978_v13  ;;  %2586 = vmatprep.mubr.f32.mxu0 %v7643_v0  ;;  %v6988_v51 = vpack.c.bf16 %v5411_v11, %v5409_v45  ;;  %v7018_v13 = vpack.c.bf16 %v5438_v57, %v5436_v55  ;;  %v5480_v55 = vld [vmem:[%s9853_s9 + $0x3a0] sm:$0xff]  ;;  %v5482_v57 = vld [vmem:[%s9853_s9 + $0x3b0] sm:$0xff] }
 0x5af   :  { %6981 = vmatprep.subr.bf16.mxu0 %v6980_v14 }
 0x5b1   :  { %5389 = vmatmul.mubr.msk.f32.gmra.mrb[38].mxu0 %vm2402_vm2, %v8693_v63  ;;  %v5415_v63 = vld [vmem:[%s9853_s9 + $0x218] sm:$0xff] }
 0x5b2   :  { %6983 = vmatpush1.bf16.msra.mxu0 %v6982_v28  ;;  %2592 = vmatprep.mubr.f32.mxu0 %v7643_v0  ;;  %v6992_v33 = vpack.c.bf16 %v5415_v63, %v5413_v61  ;;  %v5460_v63 = vld [vmem:[%s9853_s9 + $0x300] sm:$0xff] }
 0x5b3   :  { %6985 = vmatprep.subr.bf16.mxu0 %v6984_v39  ;;  %v5444_v39 = vld [vmem:[%s9853_s9 + $0x2c0] sm:$0xff] }
 0x5b4   :  { %v7026_v45 = vpack.c.bf16 %v5446_v31, %v5444_v39  ;;  %v3458_v31 = vld [vmem:[%s9856_s12] sm:$0xff] }
 0x5b5   :  { %5390 = vmatmul.mubr.msk.f32.gmra.mrb[40].mxu0 %vm2402_vm2, %v8726_v38  ;;  %v5419_v38 = vld [vmem:[%s9853_s9 + $0x238] sm:$0xff] }
 0x5b6   :  { %6987 = vmatpush1.bf16.msra.mxu0 %v6986_v50  ;;  %2598 = vmatprep.mubr.f32.mxu0 %v7643_v0  ;;  %v6996_v62 = vpack.c.bf16 %v5419_v38, %v5417_v37  ;;  %v5448_v50 = vld [vmem:[%s9853_s9 + $0x2e0] sm:$0xff] }
 0x5b7   :  { %6989 = vmatprep.subr.bf16.mxu0 %v6988_v51  ;;  %v5450_v51 = vld [vmem:[%s9853_s9 + $0x2f0] sm:$0xff]  ;;  %v5464_v38 = vld [vmem:[%s9853_s9 + $0x320] sm:$0xff] }
 0x5b8   :  { %v7030_v60 = vpack.c.bf16 %v5450_v51, %v5448_v50 }
 0x5b9   :  { %5391 = vmatmul.mubr.msk.f32.gmra.mrb[42].mxu0 %vm2402_vm2, %v8713_v21  ;;  %v5431_v21 = vld [vmem:[%s9853_s9 + $0x258] sm:$0xff] }
 0x5ba   :  { %6991 = vmatpush1.bf16.msra.mxu0 %v6990_v32  ;;  %2808 = vmatprep.mubr.f32.mxu0 %v7643_v0  ;;  %v7008_v15 = vpack.c.bf16 %v5431_v21, %v5429_v8  ;;  %v5462_v32 = vld [vmem:[%s9853_s9 + $0x310] sm:$0xff]  ;;  %v5468_v21 = vld [vmem:[%s9853_s9 + $0x340] sm:$0xff] }
 0x5bb   :  { %6993 = vmatprep.subr.bf16.mxu0 %v6992_v33  ;;  %v5465_v33 = vld [vmem:[%s9853_s9 + $0x328] sm:$0xff]  ;;  %v7042_v36 = vpack.c.bf16 %v5462_v32, %v5460_v63  ;;  %v3478_v32 = vld [vmem:[%s9856_s12 + $0xa0] sm:$0xff] }
 0x5bc   :  { %v7044_v37 = vpack.c.bf16 %v5467_v35, %v5465_v33  ;;  %v3479_v33 = vld [vmem:[%s9856_s12 + $0xa8] sm:$0xff] }
 0x5be   :  { %6995 = vmatpush1.bf16.msra.mxu0 %v6994_v43  ;;  %v5466_v43 = vld [vmem:[%s9853_s9 + $0x330] sm:$0xff] }
 0x5bf   :  { %6997 = vmatprep.subr.bf16.mxu0 %v6996_v62  ;;  %v5469_v62 = vld [vmem:[%s9853_s9 + $0x348] sm:$0xff]  ;;  %v7046_v56 = vpack.c.bf16 %v5466_v43, %v5464_v38 }
 0x5c0   :  { %v7048_v8 = vpack.c.bf16 %v5471_v42, %v5469_v62  ;;  %v7104_v42 = vpack.c.bf16 %v3479_v33, %v3478_v32 }
 0x5c2   :  { %6999 = vmatpush1.bf16.msra.mxu0 %v6998_v10  ;;  %v5470_v10 = vld [vmem:[%s9853_s9 + $0x350] sm:$0xff] }
 0x5c3   :  { %7009 = vmatprep.subr.bf16.mxu0 %v7008_v15  ;;  %v5473_v15 = vld [vmem:[%s9853_s9 + $0x368] sm:$0xff]  ;;  %v7050_v16 = vpack.c.bf16 %v5470_v10, %v5468_v21  ;;  %v3480_v10 = vld [vmem:[%s9856_s12 + $0xb0] sm:$0xff] }
 0x5c5   :  { %5420 = vmatmul.mubr.msk.f32.vlgmr.msra.gmra.mrb[36].mxu0 %vm2402_vm2, %v8705_v12  ;;  %v5443_v12 = vld [vmem:[%s9853_s9 + $0x2b8] sm:$0xff] }
 0x5c6   :  { %7011 = vmatpush1.bf16.msra.mxu0 %v7010_v40  ;;  %2814 = vmatprep.mubr.f32.mxu0 %v7643_v0  ;;  %v7020_v14 = vpack.c.bf16 %v5443_v12, %v5441_v59  ;;  %v5477_v40 = vld [vmem:[%s9853_s9 + $0x388] sm:$0xff]  ;;  %v7062_v59 = vpack.c.bf16 %v5482_v57, %v5480_v55  ;;  %v3466_v57 = vld [vmem:[%s9856_s12 + $0x40] sm:$0xff] }
 0x5c7   :  { %7013 = vmatprep.subr.bf16.mxu0 %v7012_v46  ;;  %v7054_v46 = vpack.c.bf16 %v5474_v26, %v5472_v24 }
 0x5c9   :  { %5421 = vmatmul.mubr.msk.f32.gmra.mrb[38].mxu0 %vm2402_vm2, %v8695_v4  ;;  %v5447_v4 = vld [vmem:[%s9853_s9 + $0x2d8] sm:$0xff] }
 0x5ca   :  { %7015 = vmatpush1.bf16.msra.mxu0 %v7014_v52  ;;  %2820 = vmatprep.mubr.f32.mxu0 %v7643_v0  ;;  %v7024_v28 = vpack.c.bf16 %v5447_v4, %v5445_v23  ;;  %v7058_v52 = vpack.c.bf16 %v5478_v47, %v5476_v7  ;;  %v3318_v23 = vrot.slane %v3313_v18, %v1614_v3  ;;  %v3476_v3 = vld [vmem:[%s9856_s12 + $0x90] sm:$0xff]  ;;  %v3482_v47 = vld [vmem:[%s9856_s12 + $0xc0] sm:$0xff] }
 0x5cb   :  { %7017 = vmatprep.subr.bf16.mxu0 %v7016_v30  ;;  %v3322_v4 = vrot.slane %v3313_v18, %v1618_v5 }
 0x5cd   :  { %5422 = vmatmul.mubr.msk.f32.gmra.mrb[40].mxu0 %vm2402_vm2, %v8731_v41  ;;  %v5451_v41 = vld [vmem:[%s9853_s9 + $0x2f8] sm:$0xff] }
 0x5ce   :  { %7019 = vmatpush1.bf16.msra.mxu0 %v7018_v13  ;;  %2826 = vmatprep.mubr.f32.mxu0 %v7643_v0  ;;  %v7028_v11 = vpack.c.bf16 %v5451_v41, %v5449_v44  ;;  %v3459_v44 = vld [vmem:[%s9856_s12 + $0x8] sm:$0xff] }
 0x5cf   :  { %7021 = vmatprep.subr.bf16.mxu0 %v7020_v14  ;;  %v3475_v14 = vld [vmem:[%s9856_s12 + $0x88] sm:$0xff] }
 0x5d1   :  { %5423 = vmatmul.mubr.msk.f32.gmra.mrb[42].mxu0 %vm2402_vm2, %v8724_v29  ;;  %v5463_v29 = vld [vmem:[%s9853_s9 + $0x318] sm:$0xff] }
 0x5d2   :  { %7023 = vmatpush1.bf16.msra.mxu0 %v7022_v27  ;;  %3044 = vmatprep.mubr.f32.mxu0 %v7643_v0  ;;  %v7040_v61 = vpack.c.bf16 %v5463_v29, %v5461_v53  ;;  %v7100_v29 = vpack.c.bf16 %v3477_v2, %v3476_v3  ;;  %v3473_v3 = vld [vmem:[%s9856_s12 + $0x78] sm:$0xff] }
 0x5d3   :  { %7025 = vmatprep.subr.bf16.mxu0 %v7024_v28 }
 0x5d6   :  { %7027 = vmatpush1.bf16.msra.mxu0 %v7026_v45 }
 0x5d7   :  { %7029 = vmatprep.subr.bf16.mxu0 %v7028_v11  ;;  %v7098_v11 = vpack.c.bf16 %v3459_v44, %v3458_v31 }
 0x5da   :  { %7031 = vmatpush1.bf16.msra.mxu0 %v7030_v60  ;;  %v3460_v60 = vld [vmem:[%s9856_s12 + $0x10] sm:$0xff] }
 0x5db   :  { %7041 = vmatprep.subr.bf16.mxu0 %v7040_v61  ;;  %v3461_v61 = vld [vmem:[%s9856_s12 + $0x18] sm:$0xff] }
 0x5dd   :  { %5452 = vmatmul.mubr.msk.f32.vlgmr.msra.gmra.mrb[36].mxu0 %vm2402_vm2, %v8759_v22  ;;  %v5475_v22 = vld [vmem:[%s9853_s9 + $0x378] sm:$0xff] }
 0x5de   :  { %7043 = vmatpush1.bf16.msra.mxu0 %v7042_v36  ;;  %3050 = vmatprep.mubr.f32.mxu0 %v7643_v0  ;;  %v7052_v20 = vpack.c.bf16 %v5475_v22, %v5473_v15  ;;  %v3481_v15 = vld [vmem:[%s9856_s12 + $0xb8] sm:$0xff] }
 0x5df   :  { %7045 = vmatprep.subr.bf16.mxu0 %v7044_v37  ;;  %v7102_v37 = vpack.c.bf16 %v3461_v61, %v3460_v60 }
 0x5e1   :  { %5453 = vmatmul.mubr.msk.f32.gmra.mrb[38].mxu0 %vm2402_vm2, %v8754_v9  ;;  %v5479_v9 = vld [vmem:[%s9853_s9 + $0x398] sm:$0xff] }
 0x5e2   :  { %7047 = vmatpush1.bf16.msra.mxu0 %v7046_v56  ;;  %3056 = vmatprep.mubr.f32.mxu0 %v7643_v0  ;;  %v7056_v6 = vpack.c.bf16 %v5479_v9, %v5477_v40  ;;  %v3462_v56 = vld [vmem:[%s9856_s12 + $0x20] sm:$0xff]  ;;  %v7108_v9 = vpack.c.bf16 %v3481_v15, %v3480_v10 }
 0x5e3   :  { %7049 = vmatprep.subr.bf16.mxu0 %v7048_v8  ;;  %v3463_v8 = vld [vmem:[%s9856_s12 + $0x28] sm:$0xff] }
 0x5e5   :  { %5454 = vmatmul.mubr.msk.f32.gmra.mrb[40].mxu0 %vm2402_vm2, %v8789_v34  ;;  %v5483_v34 = vld [vmem:[%s9853_s9 + $0x3b8] sm:$0xff] }
 0x5e6   :  { %7051 = vmatpush1.bf16.msra.mxu0 %v7050_v16  ;;  %3062 = vmatprep.mubr.f32.mxu0 %v7643_v0  ;;  %v7060_v30 = vpack.c.bf16 %v5483_v34, %v5481_v49  ;;  %v3483_v49 = vld [vmem:[%s9856_s12 + $0xc8] sm:$0xff] }
 0x5e7   :  { %7053 = vmatprep.subr.bf16.mxu0 %v7052_v20  ;;  %v7106_v20 = vpack.c.bf16 %v3463_v8, %v3462_v56  ;;  %v7112_v55 = vpack.c.bf16 %v3483_v49, %v3482_v47  ;;  %v5495_v47 = vld [vmem:[%s9860_s16 + $0x88] sm:$0xff] }
 0x5e9   :  { %5455 = vmatmul.mubr.msk.f32.gmra.mrb[42].mxu0 %vm2402_vm2, %v8781_v54  ;;  %v3371_v54 = vld [vmem:[%s9855_s11 + $0xf0] sm:$0xff] }
 0x5ea   :  { %7055 = vmatpush1.bf16.msra.mxu0 %v7054_v46  ;;  %3280 = vmatprep.mubr.f32.mxu0 %v7643_v0  ;;  %v3464_v46 = vld [vmem:[%s9856_s12 + $0x30] sm:$0xff] }
 0x5eb   :  { %7057 = vmatprep.subr.bf16.mxu0 %v7056_v6  ;;  %v3465_v6 = vld [vmem:[%s9856_s12 + $0x38] sm:$0xff] }
 0x5ee   :  { %7059 = vmatpush1.bf16.msra.mxu0 %v7058_v52  ;;  %v7110_v52 = vpack.c.bf16 %v3465_v6, %v3464_v46  ;;  %v3662_v46 = vld [vmem:[%s9858_s14] sm:$0xff]  ;;  %v3663_v6 = vld [vmem:[%s9858_s14 + $0x8] sm:$0xff] }
 0x5ef   :  { %7061 = vmatprep.subr.bf16.mxu0 %v7060_v30 }
 0x5f2   :  { %7063 = vmatpush1.bf16.msra.mxu0 %v7062_v59  ;;  %v3467_v59 = vld [vmem:[%s9856_s12 + $0x48] sm:$0xff] }
 0x5f3   :  { %7150 = vmatprep.subr.bf16.mxu0 %v7644_v48 }
 0x5f5   :  { %5484 = vmatmul.mubr.msk.f32.vlgmr.msra.gmra.mrb[36].mxu0 %vm2402_vm2, %v8807_v58  ;;  %v3372_v58 = vld [vmem:[%s9855_s11 + $0xf8] sm:$0xff] }
 0x5f6   :  { %3286 = vmatprep.mubr.f32.mxu0 %v7643_v0  ;;  %v7092_v12 = vpack.c.bf16 %v3372_v58, %v3371_v54  ;;  %v3484_v54 = vld [vmem:[%s9856_s12 + $0xd0] sm:$0xff]  ;;  %v3485_v58 = vld [vmem:[%s9856_s12 + $0xd8] sm:$0xff] }
 0x5f8   :  { %7093 = vmatprep.subr.bf16.mxu1 %v7092_v12  ;;  %v7114_v12 = vpack.c.bf16 %v3467_v59, %v3466_v57  ;;  %v5499_v57 = vld [vmem:[%s9860_s16 + $0xa8] sm:$0xff] }
 0x5f9   :  { %5485 = vmatmul.mubr.msk.f32.gmra.mrb[38].mxu0 %vm2402_vm2, %v8799_v1  ;;  %v3355_v1 = vld [vmem:[%s9855_s11 + $0x70] sm:$0xff] }
 0x5fa   :  { %3292 = vmatprep.mubr.f32.mxu0 %v7643_v0 }
 0x5fd   :  { %5486 = vmatmul.mubr.msk.f32.gmra.mrb[40].mxu0 %vm2402_vm2, %v8825_v25  ;;  %v3356_v25 = vld [vmem:[%s9855_s11 + $0x78] sm:$0xff] }
 0x5fe   :  { %3298 = vmatprep.mubr.f32.mxu0 %v7643_v0  ;;  %v7094_v13 = vpack.c.bf16 %v3356_v25, %v3355_v1  ;;  %v7116_v1 = vpack.c.bf16 %v3485_v58, %v3484_v54  ;;  %v3468_v25 = vld [vmem:[%s9856_s12 + $0x50] sm:$0xff]  ;;  %v5501_v58 = vld [vmem:[%s9860_s16 + $0xb8] sm:$0xff] }
 0x5ff   :  { %v5500_v54 = vld [vmem:[%s9860_s16 + $0xb0] sm:$0xff] }
 0x600   :  { %7095 = vmatpush3.bf16.msra.mxu1 %v7094_v13  ;;  %v3469_v13 = vld [vmem:[%s9856_s12 + $0x58] sm:$0xff] }
 0x601   :  { %5487 = vmatmul.mubr.msk.f32.gmra.mrb[42].mxu0 %vm2402_vm2, %v8817_v19  ;;  %v3474_v19 = vld [vmem:[%s9856_s12 + $0x80] sm:$0xff] }
 0x602   :  { %v7096_v17 = vpack.c.bf16 %v3475_v14, %v3474_v19  ;;  %v3486_v19 = vld [vmem:[%s9856_s12 + $0xe0] sm:$0xff]  ;;  %v3487_v14 = vld [vmem:[%s9856_s12 + $0xe8] sm:$0xff]  ;;  %6357 = vmatprep.mubr.msk.f32.mxu0 %vm7645_vm3, %v7643_v0 }
 0x603   :  { %v7120_v18 = vpack.c.bf16 %v3487_v14, %v3486_v19  ;;  %v5504_v19 = vld [vmem:[%s9860_s16 + $0xd0] sm:$0xff]  ;;  %v5505_v14 = vld [vmem:[%s9860_s16 + $0xd8] sm:$0xff] }
 0x604   :  { %7097 = vmatprep.subr.bf16.mxu1 %v7096_v17  ;;  %v7118_v17 = vpack.c.bf16 %v3469_v13, %v3468_v25  ;;  %v5503_v25 = vld [vmem:[%s9860_s16 + $0xc8] sm:$0xff] }
 0x6c8   :  { %v3282_v27 = vpop.f32.mrb[36].mxu0 }
 0x6c9   :  { %v9124_v28 = vadd.f32 %v3318_v23, %v3282_v27  ;;  %v3284_v39 = vpop.f32.mrb[37].mxu0  ;;  %v3488_v27 = vld [vmem:[%s9856_s12 + $0xf0] sm:$0xff] }
 0x6ca   :  { %v3326_v41 = vadd.f32 %v3322_v4, %v3284_v39  ;;  %v3489_v39 = vld [vmem:[%s9856_s12 + $0xf8] sm:$0xff] }
 0x6cb   :  { %v3333_v50 = vmax.f32 %v9124_v28, 0.0  ;;  %v7124_v44 = vpack.c.bf16 %v3489_v39, %v3488_v27  ;;  %v5508_v27 = vld [vmem:[%s9860_s16 + $0xf0] sm:$0xff]  ;;  %v5509_v39 = vld [vmem:[%s9860_s16 + $0xf8] sm:$0xff] }
 0x6cc   :  { %v3334_v5 = vmax.f32 %v3326_v41, 0.0  ;;  %v3288_v45 = vpop.f32.mrb[38].mxu0  ;;  %v3472_v41 = vld [vmem:[%s9856_s12 + $0x70] sm:$0xff] }
 0x6cd   :  { %v9139_v51 = vadd.f32 %v3318_v23, %v3288_v45  ;;  %v3290_v53 = vpop.f32.mrb[39].mxu0  ;;  %v7126_v2 = vpack.c.bf16 %v3473_v3, %v3472_v41 }
 0x6ce   :  { %v9147_v63 = vadd.f32 %v3322_v4, %v3290_v53  ;;  %3437 = vmatprep.mubr.f32.mxu1 %v3334_v5 }
 0x6cf   :  { %3438 = vmatmul.mubr.f32.vlgmr.msra.gmra.mrb[80].mxu1 %v3333_v50  ;;  %v3335_v38 = vmax.f32 %v9139_v51, 0.0 }
 0x6d0   :  { %v3336_v35 = vmax.f32 %v9147_v63, 0.0  ;;  %7099 = vmatpush3.bf16.msra.mxu1 %v7098_v11  ;;  %v3294_v36 = vpop.f32.mrb[40].mxu0 }
 0x6d1   :  { %v9159_v43 = vadd.f32 %v3318_v23, %v3294_v36  ;;  %v3296_v62 = vpop.f32.mrb[41].mxu0  ;;  %7101 = vmatprep.subr.bf16.mxu1 %v7100_v29 }
 0x6d2   :  { %v9167_v21 = vadd.f32 %v3322_v4, %v3296_v62  ;;  %3442 = vmatprep.mubr.f32.mxu1 %v3336_v35 }
 0x6d3   :  { %3443 = vmatmul.mubr.f32.gmra.mrb[82].mxu1 %v3335_v38  ;;  %v3337_v24 = vmax.f32 %v9159_v43, 0.0 }
 0x6d4   :  { %v3338_v22 = vmax.f32 %v9167_v21, 0.0  ;;  %7103 = vmatpush3.bf16.msra.mxu1 %v7102_v37  ;;  %v3300_v16 = vpop.f32.mrb[42].mxu0 }
 0x6d5   :  { %v3331_v26 = vadd.f32 %v3318_v23, %v3300_v16  ;;  %v3302_v40 = vpop.f32.mrb[43].mxu0  ;;  %7105 = vmatprep.subr.bf16.mxu1 %v7104_v42  ;;  %v3470_v23 = vld [vmem:[%s9856_s12 + $0x60] sm:$0xff] }
 0x6d6   :  { %v3332_v7 = vadd.f32 %v3322_v4, %v3302_v40  ;;  %3447 = vmatprep.mubr.f32.mxu1 %v3338_v22  ;;  %v3471_v4 = vld [vmem:[%s9856_s12 + $0x68] sm:$0xff] }
 0x6d7   :  { %3448 = vmatmul.mubr.f32.gmra.mrb[84].mxu1 %v3337_v24  ;;  %v3339_v30 = vmax.f32 %v3331_v26, 0.0  ;;  %v7122_v31 = vpack.c.bf16 %v3471_v4, %v3470_v23  ;;  %v5507_v23 = vld [vmem:[%s9860_s16 + $0xe8] sm:$0xff] }
 0x6d8   :  { %v3340_v34 = vmax.f32 %v3332_v7, 0.0  ;;  %7107 = vmatpush3.bf16.msra.mxu1 %v7106_v20  ;;  %v5494_v7 = vld [vmem:[%s9860_s16 + $0x80] sm:$0xff] }
 0x6d9   :  { %7109 = vmatprep.subr.bf16.mxu1 %v7108_v9  ;;  %v3580_v9 = vld [vmem:[%s9857_s13 + $0x8] sm:$0xff]  ;;  %v7151_v49 = vpack.c.bf16 %v5495_v47, %v5494_v7  ;;  %v5514_v7 = vld [vmem:[%s9860_s16 + $0x118] sm:$0xff] }
 0x6da   :  { %3452 = vmatprep.mubr.f32.mxu1 %v3340_v34 }
 0x6db   :  { %3453 = vmatmul.mubr.f32.gmra.mrb[86].mxu1 %v3339_v30  ;;  %7152 = vmatpush3.bf16.msra.mxu0 %v7151_v49 }
 0x6dc   :  { %7111 = vmatpush3.bf16.msra.mxu1 %v7110_v52  ;;  %3554 = vmatprep.mubr.f32.mxu1 %v3334_v5  ;;  %v3579_v5 = vld [vmem:[%s9857_s13] sm:$0xff]  ;;  %v5497_v52 = vld [vmem:[%s9860_s16 + $0x98] sm:$0xff] }
 0x6dd   :  { %7113 = vmatprep.subr.bf16.mxu1 %v7112_v55  ;;  %7153 = vmatprep.subr.bf16.mxu0 %v7644_v48  ;;  %v5498_v55 = vld [vmem:[%s9860_s16 + $0xa0] sm:$0xff] }
 0x6de   :  { %v7157_v59 = vpack.c.bf16 %v5499_v57, %v5498_v55  ;;  %v4071_v57 = vld [vmem:[#allocation10 + $0x4] sm:$0x3] }
 0x6e0   :  { %7115 = vmatpush3.bf16.msra.mxu1 %v7114_v12  ;;  %v7160_v12 = vpack.c.bf16 %v5501_v58, %v5500_v54  ;;  %v5529_v54 = vld [vmem:[%s9860_s16 + $0x188] sm:$0xff] }
 0x6e1   :  { %7117 = vmatprep.subr.bf16.mxu1 %v7116_v1  ;;  %v5502_v1 = vld [vmem:[%s9860_s16 + $0xc0] sm:$0xff] }
 0x6e2   :  { %v7163_v13 = vpack.c.bf16 %v5503_v25, %v5502_v1  ;;  %v5518_v1 = vld [vmem:[%s9860_s16 + $0x138] sm:$0xff]  ;;  %v4234_v25 = vld [vmem:[#allocation10 + $0x6] sm:$0x3] }
 0x6e4   :  { %7119 = vmatpush3.bf16.msra.mxu1 %v7118_v17  ;;  %v7166_v17 = vpack.c.bf16 %v5505_v14, %v5504_v19  ;;  %v5530_v19 = vld [vmem:[%s9860_s16 + $0x190] sm:$0xff]  ;;  %v5531_v14 = vld [vmem:[%s9860_s16 + $0x198] sm:$0xff] }
 0x6e5   :  { %7121 = vmatprep.subr.bf16.mxu1 %v7120_v18  ;;  %v5506_v18 = vld [vmem:[%s9860_s16 + $0xe0] sm:$0xff] }
 0x6e6   :  { %v7169_v4 = vpack.c.bf16 %v5507_v23, %v5506_v18  ;;  %v5519_v18 = vld [vmem:[%s9860_s16 + $0x140] sm:$0xff]  ;;  %v5520_v23 = vld [vmem:[%s9860_s16 + $0x148] sm:$0xff] }
 0x6e8   :  { %7123 = vmatpush3.bf16.msra.mxu1 %v7122_v31  ;;  %v7172_v31 = vpack.c.bf16 %v5509_v39, %v5508_v27  ;;  %v5532_v27 = vld [vmem:[%s9860_s16 + $0x1a0] sm:$0xff]  ;;  %v5533_v39 = vld [vmem:[%s9860_s16 + $0x1a8] sm:$0xff] }
 0x6e9   :  { %7125 = vmatprep.subr.bf16.mxu1 %v7124_v44 }
 0x6ec   :  { %7127 = vmatpush3.bf16.msra.mxu1 %v7126_v2 }
 0x6ef   :  { %3555 = vmatmul.mubr.f32.vlgmr.msra.gmra.mrb[88].mxu1 %v3333_v50 }
 0x6f0   :  { %3559 = vmatprep.mubr.f32.mxu1 %v3336_v35 }
 0x6f3   :  { %3560 = vmatmul.mubr.f32.gmra.mrb[90].mxu1 %v3335_v38 }
 0x6f4   :  { %3564 = vmatprep.mubr.f32.mxu1 %v3338_v22 }
 0x6f7   :  { %3565 = vmatmul.mubr.f32.gmra.mrb[92].mxu1 %v3337_v24 }
 0x6f8   :  { %3569 = vmatprep.mubr.f32.mxu1 %v3340_v34  ;;  %v5496_v34 = vld [vmem:[%s9860_s16 + $0x90] sm:$0xff] }
 0x6fb   :  { %3570 = vmatmul.mubr.f32.gmra.mrb[94].mxu1 %v3339_v30  ;;  %v7154_v30 = vpack.c.bf16 %v5497_v52, %v5496_v34  ;;  %v5515_v52 = vld [vmem:[%s9860_s16 + $0x120] sm:$0xff] }
 0x6fc   :  { %6297 = vmatprep.mubr.msk.f32.mxu1 %vm435_vm1, %v3579_v5 }
 0x6fd   :  { %7155 = vmatpush3.bf16.msra.mxu0 %v7154_v30  ;;  %v5516_v30 = vld [vmem:[%s9860_s16 + $0x128] sm:$0xff] }
 0x6fe   :  { %7156 = vmatprep.subr.bf16.mxu0 %v7644_v48  ;;  %v7208_v58 = vpack.c.bf16 %v5516_v30, %v5515_v52  ;;  %v4397_v30 = vld [vmem:[#allocation10 + $0x8] sm:$0x3] }
 0x701   :  { %7158 = vmatpush3.bf16.msra.mxu0 %v7157_v59  ;;  %v5528_v59 = vld [vmem:[%s9860_s16 + $0x180] sm:$0xff] }
 0x702   :  { %7159 = vmatprep.subr.bf16.mxu0 %v7644_v48 }
 0x705   :  { %7161 = vmatpush3.bf16.msra.mxu0 %v7160_v12  ;;  %v5517_v12 = vld [vmem:[%s9860_s16 + $0x130] sm:$0xff] }
 0x706   :  { %7162 = vmatprep.subr.bf16.mxu0 %v7644_v48 }
 0x709   :  { %7164 = vmatpush3.bf16.msra.mxu0 %v7163_v13  ;;  %v7229_v13 = vpack.c.bf16 %v5529_v54, %v5528_v59  ;;  %v5551_v54 = vld [vmem:[%s9860_s16 + $0x230] sm:$0xff] }
 0x70a   :  { %7165 = vmatprep.subr.bf16.mxu0 %v7644_v48 }
 0x70d   :  { %7167 = vmatpush3.bf16.msra.mxu0 %v7166_v17  ;;  %v7211_v17 = vpack.c.bf16 %v5518_v1, %v5517_v12  ;;  %v4560_v12 = vld [vmem:[#allocation10 + $0xa] sm:$0x3] }
 0x70e   :  { %7168 = vmatprep.subr.bf16.mxu0 %v7644_v48 }
 0x711   :  { %7170 = vmatpush3.bf16.msra.mxu0 %v7169_v4  ;;  %v7232_v4 = vpack.c.bf16 %v5531_v14, %v5530_v19  ;;  %v5553_v14 = vld [vmem:[%s9860_s16 + $0x240] sm:$0xff] }
 0x712   :  { %7171 = vmatprep.subr.bf16.mxu0 %v7644_v48 }
 0x715   :  { %7173 = vmatpush3.bf16.msra.mxu0 %v7172_v31  ;;  %v7214_v31 = vpack.c.bf16 %v5520_v23, %v5519_v18  ;;  %v5566_v23 = vld [vmem:[%s9860_s16 + $0x2a0] sm:$0xff] }
 0x716   :  { %7198 = vmatprep.subr.bf16.mxu0 %v7644_v48 }
 0x7a2   :  { %v5791_v45 = vpop.f32.mrb[80].mxu1 }
 0x7a3   :  { %v5792_v11 = vpop.f32.mrb[81].mxu1 }
 0x7a4   :  { %v5793_v28 = vadd.f32 %v5792_v11, %v5791_v45 }
 0x7a6   :  { %v5794_v50 = vpop.f32.mrb[82].mxu1 }
 0x7a7   :  { %v5795_v53 = vpop.f32.mrb[83].mxu1 }
 0x7a8   :  { %v5796_v29 = vadd.f32 %v5795_v53, %v5794_v50  ;;  %v3822_v50 = vld [vmem:[%s9860_s16] sm:$0xff]  ;;  %v3823_v53 = vld [vmem:[%s9860_s16 + $0x8] sm:$0xff] }
 0x7aa   :  { %v5797_v60 = vpop.f32.mrb[84].mxu1 }
 0x7ab   :  { %v5798_v61 = vpop.f32.mrb[85].mxu1 }
 0x7ac   :  { %v5799_v51 = vadd.f32 %v5798_v61, %v5797_v60  ;;  %v7175_v60 = vpack.c.bf16 %v3823_v53, %v3822_v50  ;;  %v3824_v61 = vld [vmem:[%s9860_s16 + $0x10] sm:$0xff]  ;;  %v5524_v50 = vld [vmem:[%s9860_s16 + $0x168] sm:$0xff] }
 0x7ae   :  { %v5800_v63 = vpop.f32.mrb[86].mxu1 }
 0x7af   :  { %v5801_v32 = vpop.f32.mrb[87].mxu1 }
 0x7b0   :  { %v5802_v33 = vadd.f32 %v5801_v32, %v5800_v63  ;;  %v3826_v32 = vld [vmem:[%s9860_s16 + $0x20] sm:$0xff] }
 0x7c2   :  { %v5835_v35 = vpop.f32.mrb[88].mxu1 }
 0x7c3   :  { %v5836_v36 = vpop.f32.mrb[89].mxu1 }
 0x7c4   :  { %v5837_v37 = vadd.f32 %v5836_v36, %v5835_v35  ;;  %v3828_v36 = vld [vmem:[%s9860_s16 + $0x30] sm:$0xff] }
 0x7c6   :  { %v3575_v38 = vmax.f32 %v5793_v28, %v5837_v37  ;;  %v5838_v43 = vpop.f32.mrb[90].mxu1  ;;  %v3747_v28 = vld [vmem:[#allocation10] sm:$0x3]  ;;  %v3829_v37 = vld [vmem:[%s9860_s16 + $0x38] sm:$0xff] }
 0x7c7   :  { %v5839_v62 = vpop.f32.mrb[91].mxu1 }
 0x7c8   :  { %v5840_v42 = vadd.f32 %v5839_v62, %v5838_v43  ;;  %v3830_v43 = vld [vmem:[%s9860_s16 + $0x40] sm:$0xff]  ;;  %v3831_v62 = vld [vmem:[%s9860_s16 + $0x48] sm:$0xff] }
 0x7ca   :  { %v3576_v56 = vmax.f32 %v5796_v29, %v5840_v42  ;;  %v5841_v8 = vpop.f32.mrb[92].mxu1  ;;  %v3839_v29 = vld [vmem:[#allocation10 + $0x2] sm:$0x3]  ;;  %v7187_v42 = vpack.c.bf16 %v3831_v62, %v3830_v43  ;;  %v5526_v43 = vld [vmem:[%s9860_s16 + $0x178] sm:$0xff] }
 0x7cb   :  { %v5842_v21 = vpop.f32.mrb[93].mxu1 }
 0x7cc   :  { %v7128_v10 = vpack.c.bf16 %v3576_v56, %v3575_v38  ;;  %v5843_v15 = vadd.f32 %v5842_v21, %v5841_v8  ;;  %v7184_v38 = vpack.c.bf16 %v3829_v37, %v3828_v36  ;;  %v3832_v56 = vld [vmem:[%s9860_s16 + $0x50] sm:$0xff]  ;;  %v3833_v8 = vld [vmem:[%s9860_s16 + $0x58] sm:$0xff]  ;;  %v5541_v36 = vld [vmem:[%s9860_s16 + $0x1e8] sm:$0xff] }
 0x7cd   :  { %v7190_v21 = vpack.c.bf16 %v3833_v8, %v3832_v56  ;;  %v5543_v56 = vld [vmem:[%s9860_s16 + $0x1f8] sm:$0xff] }
 0x7ce   :  { %v3577_v22 = vmax.f32 %v5799_v51, %v5843_v15  ;;  %v5844_v16 = vpop.f32.mrb[94].mxu1  ;;  %7129 = vmatprep.subr.bf16.mxu1 %v7128_v10  ;;  %v3825_v51 = vld [vmem:[%s9860_s16 + $0x18] sm:$0xff]  ;;  %v3835_v15 = vld [vmem:[%s9860_s16 + $0x68] sm:$0xff] }
 0x7cf   :  { %v5845_v20 = vpop.f32.mrb[95].mxu1  ;;  %7131 = vmatpush3.bf16.msra.mxu1 %v7128_v10  ;;  %v7178_v63 = vpack.c.bf16 %v3825_v51, %v3824_v61 }
 0x7d0   :  { %v5846_v24 = vadd.f32 %v5845_v20, %v5844_v16  ;;  %v3836_v16 = vld [vmem:[%s9860_s16 + $0x70] sm:$0xff]  ;;  %v3837_v20 = vld [vmem:[%s9860_s16 + $0x78] sm:$0xff] }
 0x7d2   :  { %v3578_v26 = vmax.f32 %v5802_v33, %v5846_v24  ;;  %v3827_v33 = vld [vmem:[%s9860_s16 + $0x28] sm:$0xff]  ;;  %v7196_v24 = vpack.c.bf16 %v3837_v20, %v3836_v16 }
 0x7d3   :  { %v7181_v35 = vpack.c.bf16 %v3827_v33, %v3826_v32  ;;  %v5539_v32 = vld [vmem:[%s9860_s16 + $0x1d8] sm:$0xff] }
 0x7d4   :  { %v7132_v40 = vpack.c.bf16 %v3578_v26, %v3577_v22  ;;  %v5511_v26 = vld [vmem:[%s9860_s16 + $0x100] sm:$0xff] }
 0x7d6   :  { %7133 = vmatprep.subr.bf16.mxu1 %v7132_v40 }
 0x7d7   :  { %7135 = vmatpush3.bf16.msra.mxu1 %v7132_v40 }
 0x7d8   :  { %7137 = vmatprep.subr.bf16.mxu1 %v7128_v10 }
 0x7da   :  { %6298 = vmatmul.mubr.msk.f32.vlgmr.msra.gmra.mrb[96].mxu1 %vm435_vm1, %v3580_v9 }
 0x7db   :  { %7139 = vmatpush3.bf16.msra.mxu1 %v7128_v10  ;;  %6308 = vmatprep.mubr.msk.f32.mxu1 %vm435_vm1, %v3662_v46  ;;  %v3834_v10 = vld [vmem:[%s9860_s16 + $0x60] sm:$0xff] }
 0x7dc   :  { %7141 = vmatprep.subr.bf16.mxu1 %v7132_v40  ;;  %v7193_v22 = vpack.c.bf16 %v3835_v15, %v3834_v10  ;;  %v5545_v15 = vld [vmem:[%s9860_s16 + $0x200] sm:$0xff] }
 0x7df   :  { %7143 = vmatpush3.bf16.msra.mxu1 %v7132_v40  ;;  %v5512_v40 = vld [vmem:[%s9860_s16 + $0x108] sm:$0xff] }
 0x7e0   :  { %7144 = vmatprep.subr.bf16.mxu1 %v7644_v48  ;;  %v7202_v9 = vpack.c.bf16 %v5512_v40, %v5511_v26 }
 0x7e2   :  { %6309 = vmatmul.mubr.msk.f32.vlgmr.msra.gmra.mrb[98].mxu1 %vm435_vm1, %v3663_v6  ;;  %v5513_v6 = vld [vmem:[%s9860_s16 + $0x110] sm:$0xff] }
 0x7e3   :  { %6315 = vmatprep.mubr.msk.f32.mxu1 %vm7645_vm3, %v7643_v0  ;;  %v7205_v49 = vpack.c.bf16 %v5514_v7, %v5513_v6 }
 0x8ad   :  { %v6299_v44 = vpop.f32.mrb[96].mxu1 }
 0x8ae   :  { %v3653_v41 = vpop.f32.mrb[97].mxu1 }
 0x8b5   :  { %v6310_v3 = vpop.f32.mrb[98].mxu1 }
 0x8b6   :  { %v3746_v2 = vmax.f32 %v6299_v44, %v6310_v3  ;;  %v3736_v5 = vpop.f32.mrb[99].mxu1  ;;  %v5521_v44 = vld [vmem:[%s9860_s16 + $0x150] sm:$0xff]  ;;  %v7235_v3 = vpack.c.bf16 %v5533_v39, %v5532_v27 }
 0x8b7   :  { %v3745_v45 = vmax.f32 %v3653_v41, %v3736_v5  ;;  %v5522_v41 = vld [vmem:[%s9860_s16 + $0x158] sm:$0xff]  ;;  %v5555_v39 = vld [vmem:[%s9860_s16 + $0x250] sm:$0xff] }
 0x8b8   :  { %v5535_v5 = vld [vmem:[%s9860_s16 + $0x1b8] sm:$0xff] }
 0x8b9   :  { %v9318_v11 = vpack.c.bf16 %v3746_v2, %v3745_v45  ;;  %v5534_v2 = vld [vmem:[%s9860_s16 + $0x1b0] sm:$0xff]  ;;  %v7217_v45 = vpack.c.bf16 %v5522_v41, %v5521_v44 }
 0x8ba   :  { %v7238_v53 = vpack.c.bf16 %v5535_v5, %v5534_v2  ;;  %v5568_v41 = vld [vmem:[%s9860_s16 + $0x2b0] sm:$0xff] }
 0x8bb   :  { %7146 = vmatpush3.bf16.msra.mxu1 %v9318_v11 }
 0x8bc   :  { %7147 = vmatprep.subr.bf16.mxu1 %v7644_v48 }
 0x8be   :  { %6316 = vmatmul.mubr.msk.f32.vlgmr.msra.gmra.mrb[100].mxu1 %vm3748_vm4, %v3747_v28  ;;  %v5523_v28 = vld [vmem:[%s9860_s16 + $0x160] sm:$0xff] }
 0x8bf   :  { %7149 = vmatpush3.bf16.msra.mxu1 %v9318_v11  ;;  %6322 = vmatprep.mubr.msk.f32.mxu1 %vm7645_vm3, %v7643_v0  ;;  %v7220_v61 = vpack.c.bf16 %v5524_v50, %v5523_v28  ;;  %v5571_v28 = vld [vmem:[%s9860_s16 + $0x2c8] sm:$0xff] }
 0x8c0   :  { %7174 = vmatprep.subr.bf16.mxu1 %v7644_v48 }
 0x8c2   :  { %6323 = vmatmul.mubr.msk.f32.vlgmr.msra.gmra.mrb[102].mxu1 %vm3748_vm4, %v3839_v29  ;;  %v5536_v29 = vld [vmem:[%s9860_s16 + $0x1c0] sm:$0xff] }
 0x8c3   :  { %7176 = vmatpush3.bf16.msra.mxu1 %v7175_v60  ;;  %6392 = vmatprep.mubr.msk.f32.mxu1 %vm7645_vm3, %v7643_v0  ;;  %v5537_v60 = vld [vmem:[%s9860_s16 + $0x1c8] sm:$0xff] }
 0x8c4   :  { %7177 = vmatprep.subr.bf16.mxu1 %v7644_v48  ;;  %v7241_v51 = vpack.c.bf16 %v5537_v60, %v5536_v29  ;;  %v5558_v29 = vld [vmem:[%s9860_s16 + $0x268] sm:$0xff]  ;;  %v5572_v60 = vld [vmem:[%s9860_s16 + $0x2d0] sm:$0xff] }
 0x8c7   :  { %7179 = vmatpush3.bf16.msra.mxu1 %v7178_v63  ;;  %v5538_v63 = vld [vmem:[%s9860_s16 + $0x1d0] sm:$0xff] }
 0x8c8   :  { %7180 = vmatprep.subr.bf16.mxu1 %v7644_v48  ;;  %v7244_v33 = vpack.c.bf16 %v5539_v32, %v5538_v63  ;;  %v5559_v32 = vld [vmem:[%s9860_s16 + $0x270] sm:$0xff] }
 0x8cb   :  { %7182 = vmatpush3.bf16.msra.mxu1 %v7181_v35  ;;  %v5540_v35 = vld [vmem:[%s9860_s16 + $0x1e0] sm:$0xff] }
 0x8cc   :  { %7183 = vmatprep.subr.bf16.mxu1 %v7644_v48  ;;  %v7247_v37 = vpack.c.bf16 %v5541_v36, %v5540_v35  ;;  %v5574_v35 = vld [vmem:[%s9860_s16 + $0x2e0] sm:$0xff] }
 0x8cf   :  { %7185 = vmatpush3.bf16.msra.mxu1 %v7184_v38  ;;  %v5525_v38 = vld [vmem:[%s9860_s16 + $0x170] sm:$0xff] }
 0x8d0   :  { %7186 = vmatprep.subr.bf16.mxu1 %v7644_v48  ;;  %v7223_v62 = vpack.c.bf16 %v5526_v43, %v5525_v38  ;;  %v5576_v43 = vld [vmem:[%s9860_s16 + $0x2f0] sm:$0xff] }
 0x8d3   :  { %7188 = vmatpush3.bf16.msra.mxu1 %v7187_v42  ;;  %v5542_v42 = vld [vmem:[%s9860_s16 + $0x1f0] sm:$0xff] }
 0x8d4   :  { %7189 = vmatprep.subr.bf16.mxu1 %v7644_v48  ;;  %v7250_v8 = vpack.c.bf16 %v5543_v56, %v5542_v42 }
 0x8d7   :  { %7191 = vmatpush3.bf16.msra.mxu1 %v7190_v21 }
 0x8d8   :  { %7192 = vmatprep.subr.bf16.mxu1 %v7644_v48 }
 0x8db   :  { %7194 = vmatpush3.bf16.msra.mxu1 %v7193_v22  ;;  %v5546_v22 = vld [vmem:[%s9860_s16 + $0x208] sm:$0xff] }
 0x8dc   :  { %7195 = vmatprep.subr.bf16.mxu1 %v7644_v48  ;;  %v7256_v26 = vpack.c.bf16 %v5546_v22, %v5545_v15 }
 0x8df   :  { %7197 = vmatpush3.bf16.msra.mxu1 %v7196_v24 }
 0x8e0   :  { %7201 = vmatprep.subr.bf16.mxu1 %v7644_v48 }
 0x991   :  { %v3818_v46 = vpop.f32.mrb[100].mxu1 }
 0x992   :  { %v6317_v47 = vpop.f32.mrb[101].mxu1  ;;  %6393 = vmatmul.mubr.f32.vlgmr.msra.gmra.mrb[104].mxu1 %v3818_v46  ;;  %v5548_v46 = vld [vmem:[%s9860_s16 + $0x218] sm:$0xff] }
 0x993   :  { %7203 = vmatpush3.bf16.msra.mxu1 %v7202_v9  ;;  %6434 = vmatprep.mubr.msk.f32.mxu1 %vm7645_vm3, %v7643_v0  ;;  %v5547_v9 = vld [vmem:[%s9860_s16 + $0x210] sm:$0xff] }
 0x994   :  { %7204 = vmatprep.subr.bf16.mxu1 %v7644_v48  ;;  %v7259_v7 = vpack.c.bf16 %v5548_v46, %v5547_v9  ;;  %v5596_v46 = vld [vmem:[%s9860_s16 + $0x380] sm:$0xff] }
 0x995   :  { %v3909_v34 = vpop.f32.mrb[102].mxu1 }
 0x996   :  { %6358 = vmatmul.mubr.f32.vlgmr.msra.gmra.mrb[44].mxu0 %v3909_v34  ;;  %v6324_v55 = vpop.f32.mrb[103].mxu1  ;;  %v5550_v34 = vld [vmem:[%s9860_s16 + $0x228] sm:$0xff] }
 0x997   :  { %7200 = vmatpush3.bf16.msra.mxu0 %v9318_v11  ;;  %6399 = vmatprep.mubr.msk.f32.mxu0 %vm7645_vm3, %v7643_v0  ;;  %v5562_v55 = vld [vmem:[%s9860_s16 + $0x280] sm:$0xff] }
 0x998   :  { %7225 = vmatprep.subr.bf16.mxu0 %v7644_v48  ;;  %7206 = vmatpush3.bf16.msra.mxu1 %v7205_v49  ;;  %v5549_v49 = vld [vmem:[%s9860_s16 + $0x220] sm:$0xff] }
 0x999   :  { %7207 = vmatprep.subr.bf16.mxu1 %v7644_v48  ;;  %v7262_v59 = vpack.c.bf16 %v5550_v34, %v5549_v49  ;;  %v5582_v49 = vld [vmem:[%s9860_s16 + $0x318] sm:$0xff] }
 0x99a   :  { %6400 = vmatmul.mubr.msk.f32.vlgmr.msra.gmra.mrb[46].mxu0 %vm3748_vm4, %v4071_v57  ;;  %v5563_v57 = vld [vmem:[%s9860_s16 + $0x288] sm:$0xff] }
 0x99b   :  { %7227 = vmatpush3.bf16.msra.mxu0 %v9318_v11  ;;  %6441 = vmatprep.mubr.msk.f32.mxu0 %vm7645_vm3, %v7643_v0  ;;  %v7283_v1 = vpack.c.bf16 %v5563_v57, %v5562_v55  ;;  %v5598_v57 = vld [vmem:[%s9860_s16 + $0x390] sm:$0xff] }
 0x99c   :  { %7228 = vmatprep.subr.bf16.mxu0 %v7644_v48  ;;  %7209 = vmatpush3.bf16.msra.mxu1 %v7208_v58  ;;  %v5552_v58 = vld [vmem:[%s9860_s16 + $0x238] sm:$0xff] }
 0x99d   :  { %7210 = vmatprep.subr.bf16.mxu1 %v7644_v48  ;;  %v7265_v19 = vpack.c.bf16 %v5552_v58, %v5551_v54  ;;  %v5584_v54 = vld [vmem:[%s9860_s16 + $0x328] sm:$0xff] }
 0x99e   :  { %6442 = vmatmul.mubr.msk.f32.vlgmr.msra.gmra.mrb[48].mxu0 %vm3748_vm4, %v4234_v25  ;;  %v5564_v25 = vld [vmem:[%s9860_s16 + $0x290] sm:$0xff] }
 0x99f   :  { %7230 = vmatpush3.bf16.msra.mxu0 %v7229_v13  ;;  %6476 = vmatprep.mubr.msk.f32.mxu0 %vm7645_vm3, %v7643_v0  ;;  %v5565_v13 = vld [vmem:[%s9860_s16 + $0x298] sm:$0xff] }
 0x9a0   :  { %7231 = vmatprep.subr.bf16.mxu0 %v7644_v48  ;;  %7212 = vmatpush3.bf16.msra.mxu1 %v7211_v17  ;;  %v5554_v17 = vld [vmem:[%s9860_s16 + $0x248] sm:$0xff]  ;;  %v7286_v18 = vpack.c.bf16 %v5565_v13, %v5564_v25  ;;  %v5585_v13 = vld [vmem:[%s9860_s16 + $0x330] sm:$0xff] }
 0x9a1   :  { %7213 = vmatprep.subr.bf16.mxu1 %v7644_v48  ;;  %v7268_v27 = vpack.c.bf16 %v5554_v17, %v5553_v14  ;;  %v5601_v25 = vld [vmem:[%s9860_s16 + $0x3a8] sm:$0xff] }
 0x9a3   :  { %7233 = vmatpush3.bf16.msra.mxu0 %v7232_v4  ;;  %v5567_v4 = vld [vmem:[%s9860_s16 + $0x2a8] sm:$0xff] }
 0x9a4   :  { %7234 = vmatprep.subr.bf16.mxu0 %v7644_v48  ;;  %7215 = vmatpush3.bf16.msra.mxu1 %v7214_v31  ;;  %v5556_v31 = vld [vmem:[%s9860_s16 + $0x258] sm:$0xff]  ;;  %v7289_v44 = vpack.c.bf16 %v5567_v4, %v5566_v23  ;;  %v5587_v4 = vld [vmem:[%s9860_s16 + $0x340] sm:$0xff] }
 0x9a5   :  { %7216 = vmatprep.subr.bf16.mxu1 %v7644_v48  ;;  %v7271_v2 = vpack.c.bf16 %v5556_v31, %v5555_v39  ;;  %v5603_v23 = vld [vmem:[%s9860_s16 + $0x3b8] sm:$0xff] }
 0x9a7   :  { %7236 = vmatpush3.bf16.msra.mxu0 %v7235_v3  ;;  %v5569_v3 = vld [vmem:[%s9860_s16 + $0x2b8] sm:$0xff] }
 0x9a8   :  { %7237 = vmatprep.subr.bf16.mxu0 %v7644_v48  ;;  %7218 = vmatpush3.bf16.msra.mxu1 %v7217_v45  ;;  %v7292_v5 = vpack.c.bf16 %v5569_v3, %v5568_v41  ;;  %v5570_v45 = vld [vmem:[%s9860_s16 + $0x2c0] sm:$0xff]  ;;  %v5605_v41 = vld [vmem:[%s9860_s16 + $0x3c8] sm:$0xff]  ;;  %v5589_v3 = vld [vmem:[%s9860_s16 + $0x350] sm:$0xff] }
 0x9a9   :  { %7219 = vmatprep.subr.bf16.mxu1 %v7644_v48  ;;  %v7295_v50 = vpack.c.bf16 %v5571_v28, %v5570_v45  ;;  %v5606_v28 = vld [vmem:[%s9860_s16 + $0x3d0] sm:$0xff] }
 0x9ab   :  { %7239 = vmatpush3.bf16.msra.mxu0 %v7238_v53  ;;  %v5557_v53 = vld [vmem:[%s9860_s16 + $0x260] sm:$0xff] }
 0x9ac   :  { %7240 = vmatprep.subr.bf16.mxu0 %v7644_v48  ;;  %7221 = vmatpush3.bf16.msra.mxu1 %v7220_v61  ;;  %v7274_v61 = vpack.c.bf16 %v5558_v29, %v5557_v53  ;;  %v5591_v53 = vld [vmem:[%s9860_s16 + $0x360] sm:$0xff]  ;;  %v5592_v29 = vld [vmem:[%s9860_s16 + $0x368] sm:$0xff] }
 0x9ad   :  { %7222 = vmatprep.subr.bf16.mxu1 %v7644_v48 }
 0x9af   :  { %7242 = vmatpush3.bf16.msra.mxu0 %v7241_v51  ;;  %v5573_v51 = vld [vmem:[%s9860_s16 + $0x2d8] sm:$0xff] }
 0x9b0   :  { %7243 = vmatprep.subr.bf16.mxu0 %v7644_v48  ;;  %7224 = vmatpush3.bf16.msra.mxu1 %v7223_v62  ;;  %v7298_v63 = vpack.c.bf16 %v5573_v51, %v5572_v60  ;;  %v5577_v62 = vld [vmem:[%s9860_s16 + $0x2f8] sm:$0xff]  ;;  %v5593_v51 = vld [vmem:[%s9860_s16 + $0x370] sm:$0xff] }
 0x9b1   :  { %7255 = vmatprep.subr.bf16.mxu1 %v7644_v48  ;;  %v7304_v42 = vpack.c.bf16 %v5577_v62, %v5576_v43  ;;  %v5057_v62 = vld [vmem:[%s9862_s18] sm:$0xff] }
 0x9b3   :  { %7245 = vmatpush3.bf16.msra.mxu0 %v7244_v33  ;;  %v5560_v33 = vld [vmem:[%s9860_s16 + $0x278] sm:$0xff] }
 0x9b4   :  { %7246 = vmatprep.subr.bf16.mxu0 %v7644_v48  ;;  %v7277_v36 = vpack.c.bf16 %v5560_v33, %v5559_v32  ;;  %v5608_v32 = vld [vmem:[%s9860_s16 + $0x3e0] sm:$0xff] }
 0x9b7   :  { %7248 = vmatpush3.bf16.msra.mxu0 %v7247_v37  ;;  %v5575_v37 = vld [vmem:[%s9860_s16 + $0x2e8] sm:$0xff] }
 0x9b8   :  { %7249 = vmatprep.subr.bf16.mxu0 %v7644_v48  ;;  %v7301_v38 = vpack.c.bf16 %v5575_v37, %v5574_v35  ;;  %v5609_v35 = vld [vmem:[%s9860_s16 + $0x3e8] sm:$0xff]  ;;  %v5610_v37 = vld [vmem:[%s9860_s16 + $0x3f0] sm:$0xff] }
 0x9bb   :  { %7251 = vmatpush3.bf16.msra.mxu0 %v7250_v8 }
 0x9bc   :  { %7252 = vmatprep.subr.bf16.mxu0 %v7644_v48 }
 0xa65   :  { %v4066_v21 = vpop.f32.mrb[104].mxu1 }
 0xa66   :  { %v6394_v10 = vpop.f32.mrb[105].mxu1 }
 0xa69   :  { %v3996_v16 = vpop.f32.mrb[44].mxu0 }
 0xa6a   :  { %v9518_v20 = vadd.f32 %v4066_v21, %v3996_v16  ;;  %v6359_v24 = vpop.f32.mrb[45].mxu0 }
 0xa6b   :  { %v5579_v24 = vld [vmem:[%s9860_s16 + $0x300] sm:$0xff] }
 0xa6d   :  { %v4141_v40 = vpop.f32.mrb[46].mxu0 }
 0xa6e   :  { %6435 = vmatmul.mubr.f32.vlgmr.msra.gmra.mrb[106].mxu1 %v4141_v40  ;;  %v6401_v6 = vpop.f32.mrb[47].mxu0 }
 0xa6f   :  { %7257 = vmatpush3.bf16.msra.mxu1 %v7256_v26  ;;  %6518 = vmatprep.mubr.msk.f32.mxu1 %vm7645_vm3, %v7643_v0  ;;  %v5580_v26 = vld [vmem:[%s9860_s16 + $0x308] sm:$0xff] }
 0xa70   :  { %7258 = vmatprep.subr.bf16.mxu1 %v7644_v48  ;;  %v7310_v9 = vpack.c.bf16 %v5580_v26, %v5579_v24  ;;  %v5597_v6 = vld [vmem:[%s9860_s16 + $0x388] sm:$0xff] }
 0xa71   :  { %v4304_v47 = vpop.f32.mrb[48].mxu0 }
 0xa72   :  { %6477 = vmatmul.mubr.f32.vlgmr.msra.gmra.mrb[50].mxu0 %v4304_v47  ;;  %v6443_v52 = vpop.f32.mrb[49].mxu0  ;;  %v5581_v47 = vld [vmem:[%s9860_s16 + $0x310] sm:$0xff] }
 0xa73   :  { %7254 = vmatpush3.bf16.msra.mxu0 %v9318_v11  ;;  %6483 = vmatprep.mubr.msk.f32.mxu0 %vm7645_vm3, %v7643_v0  ;;  %v4886_v52 = vld [vmem:[#allocation10 + $0xe] sm:$0x3]  ;;  %v7313_v55 = vpack.c.bf16 %v5582_v49, %v5581_v47 }
 0xa74   :  { %7279 = vmatprep.subr.bf16.mxu0 %v7644_v48  ;;  %7260 = vmatpush3.bf16.msra.mxu1 %v7259_v7 }
 0xa75   :  { %7261 = vmatprep.subr.bf16.mxu1 %v7644_v48 }
 0xa76   :  { %6484 = vmatmul.mubr.msk.f32.vlgmr.msra.gmra.mrb[52].mxu0 %vm3748_vm4, %v4397_v30  ;;  %v7337_v30 = vpack.c.bf16 %v5597_v6, %v5596_v46  ;;  %v5062_v6 = vld [vmem:[%s9862_s18 + $0x28] sm:$0xff] }
 0xa77   :  { %7281 = vmatpush3.bf16.msra.mxu0 %v9318_v11  ;;  %6525 = vmatprep.mubr.msk.f32.mxu0 %vm7645_vm3, %v7643_v0 }
 0xa78   :  { %7282 = vmatprep.subr.bf16.mxu0 %v7644_v48  ;;  %7263 = vmatpush3.bf16.msra.mxu1 %v7262_v59  ;;  %v5599_v59 = vld [vmem:[%s9860_s16 + $0x398] sm:$0xff] }
 0xa79   :  { %7264 = vmatprep.subr.bf16.mxu1 %v7644_v48  ;;  %v7340_v58 = vpack.c.bf16 %v5599_v59, %v5598_v57  ;;  %v5066_v57 = vld [vmem:[%s9862_s18 + $0x48] sm:$0xff] }
 0xa7a   :  { %6526 = vmatmul.mubr.msk.f32.vlgmr.msra.gmra.mrb[54].mxu0 %vm3748_vm4, %v4560_v12 }
 0xa7b   :  { %7284 = vmatpush3.bf16.msra.mxu0 %v7283_v1  ;;  %6560 = vmatprep.mubr.msk.f32.mxu0 %vm7645_vm3, %v7643_v0  ;;  %v5600_v1 = vld [vmem:[%s9860_s16 + $0x3a0] sm:$0xff] }
 0xa7c   :  { %7285 = vmatprep.subr.bf16.mxu0 %v7644_v48  ;;  %7266 = vmatpush3.bf16.msra.mxu1 %v7265_v19  ;;  %v5586_v19 = vld [vmem:[%s9860_s16 + $0x338] sm:$0xff]  ;;  %v7343_v14 = vpack.c.bf16 %v5601_v25, %v5600_v1  ;;  %v5070_v1 = vld [vmem:[%s9862_s18 + $0x68] sm:$0xff] }
 0xa7d   :  { %7267 = vmatprep.subr.bf16.mxu1 %v7644_v48  ;;  %v7319_v17 = vpack.c.bf16 %v5586_v19, %v5585_v13  ;;  %v5071_v13 = vld [vmem:[%s9862_s18 + $0x70] sm:$0xff] }
 0xa7f   :  { %7287 = vmatpush3.bf16.msra.mxu0 %v7286_v18  ;;  %v5602_v18 = vld [vmem:[%s9860_s16 + $0x3b0] sm:$0xff] }
 0xa80   :  { %7288 = vmatprep.subr.bf16.mxu0 %v7644_v48  ;;  %7269 = vmatpush3.bf16.msra.mxu1 %v7268_v27  ;;  %v5588_v27 = vld [vmem:[%s9860_s16 + $0x348] sm:$0xff]  ;;  %v7346_v39 = vpack.c.bf16 %v5603_v23, %v5602_v18  ;;  %v5612_v18 = vld [vmem:[%s9861_s17] ss:$0 sm:$0xff]  ;;  %s7646_s17 = smov [#allocation11]  }
 0xa81   :  { %7270 = vmatprep.subr.bf16.mxu1 %v7644_v48  ;;  %v7322_v31 = vpack.c.bf16 %v5588_v27, %v5587_v4 }
 0xa83   :  { %7290 = vmatpush3.bf16.msra.mxu0 %v7289_v44  ;;  %v5604_v44 = vld [vmem:[%s9860_s16 + $0x3c0] sm:$0xff] }
 0xa84   :  { %7291 = vmatprep.subr.bf16.mxu0 %v7644_v48  ;;  %7272 = vmatpush3.bf16.msra.mxu1 %v7271_v2  ;;  %v5590_v2 = vld [vmem:[%s9860_s16 + $0x358] sm:$0xff] }
 0xa85   :  { %7273 = vmatprep.subr.bf16.mxu1 %v7644_v48  ;;  %v7325_v45 = vpack.c.bf16 %v5590_v2, %v5589_v3 }
 0xa87   :  { %7293 = vmatpush3.bf16.msra.mxu0 %v7292_v5  ;;  %v7349_v5 = vpack.c.bf16 %v5605_v41, %v5604_v44 }
 0xa88   :  { %7294 = vmatprep.subr.bf16.mxu0 %v7644_v48  ;;  %7275 = vmatpush3.bf16.msra.mxu1 %v7274_v61  ;;  %v7328_v61 = vpack.c.bf16 %v5592_v29, %v5591_v53 }
 0xa89   :  { %7276 = vmatprep.subr.bf16.mxu1 %v7644_v48 }
 0xa8b   :  { %7296 = vmatpush3.bf16.msra.mxu0 %v7295_v50  ;;  %v5607_v50 = vld [vmem:[%s9860_s16 + $0x3d8] sm:$0xff] }
 0xa8c   :  { %7297 = vmatprep.subr.bf16.mxu0 %v7644_v48  ;;  %7278 = vmatpush3.bf16.msra.mxu1 %v7277_v36  ;;  %v7352_v60 = vpack.c.bf16 %v5607_v50, %v5606_v28  ;;  %v7355_v36 = vpack.c.bf16 %v5609_v35, %v5608_v32 }
 0xa8d   :  { %7306 = vmatprep.subr.bf16.mxu1 %v7644_v48 }
 0xa8f   :  { %7299 = vmatpush3.bf16.msra.mxu0 %v7298_v63  ;;  %v5594_v63 = vld [vmem:[%s9860_s16 + $0x378] sm:$0xff] }
 0xa90   :  { %7300 = vmatprep.subr.bf16.mxu0 %v7644_v48  ;;  %v7331_v33 = vpack.c.bf16 %v5594_v63, %v5593_v51 }
 0xa93   :  { %7302 = vmatpush3.bf16.msra.mxu0 %v7301_v38  ;;  %v5611_v38 = vld [vmem:[%s9860_s16 + $0x3f8] sm:$0xff] }
 0xa94   :  { %7303 = vmatprep.subr.bf16.mxu0 %v7644_v48  ;;  %v7358_v43 = vpack.c.bf16 %v5611_v38, %v5610_v37 }
 0xa97   :  { %7305 = vmatpush3.bf16.msra.mxu0 %v7304_v42  ;;  %v5058_v42 = vld [vmem:[%s9862_s18 + $0x8] sm:$0xff] }
 0xa98   :  { %7333 = vmatprep.subr.bf16.mxu0 %v7644_v48 }
 0xb41   :  { %v4228_v56 = vpop.f32.mrb[106].mxu1 }
 0xb42   :  { %v4232_v8 = vadd.f32 %v4228_v56, %v9518_v20  ;;  %v6436_v21 = vpop.f32.mrb[107].mxu1  ;;  %v4723_v20 = vld [vmem:[#allocation10 + $0xc] sm:$0x3] }
 0xb45   :  { %v4391_v10 = vpop.f32.mrb[50].mxu0 }
 0xb46   :  { %v9641_v15 = vadd.f32 %v4391_v10, %v4232_v8  ;;  %v6478_v22 = vpop.f32.mrb[51].mxu0  ;;  %v7361_v10 = vpack.c.bf16 %v5058_v42, %v5057_v62 }
 0xb47   :  { %v5059_v22 = vld [vmem:[%s9862_s18 + $0x10] sm:$0xff] }
 0xb49   :  { %v4467_v16 = vpop.f32.mrb[52].mxu0 }
 0xb4a   :  { %6519 = vmatmul.mubr.f32.vlgmr.msra.gmra.mrb[108].mxu1 %v4467_v16  ;;  %v6485_v40 = vpop.f32.mrb[53].mxu0  ;;  %v5060_v16 = vld [vmem:[%s9862_s18 + $0x18] sm:$0xff] }
 0xb4b   :  { %7308 = vmatpush3.bf16.msra.mxu1 %v9318_v11  ;;  %6567 = vmatprep.mubr.msk.f32.mxu1 %vm7645_vm3, %v7643_v0  ;;  %v7364_v46 = vpack.c.bf16 %v5060_v16, %v5059_v22 }
 0xb4c   :  { %7309 = vmatprep.subr.bf16.mxu1 %v7644_v48 }
 0xb4d   :  { %v4630_v7 = vpop.f32.mrb[54].mxu0 }
 0xb4e   :  { %6561 = vmatmul.mubr.f32.vlgmr.msra.gmra.mrb[56].mxu0 %v4630_v7  ;;  %6568 = vmatmul.mubr.msk.f32.vlgmr.msra.gmra.mrb[110].mxu1 %vm3748_vm4, %v4723_v20  ;;  %v6527_v34 = vpop.f32.mrb[55].mxu0 }
 0xb4f   :  { %7335 = vmatpush3.bf16.msra.mxu0 %v9318_v11  ;;  %6609 = vmatprep.mubr.msk.f32.mxu0 %vm7645_vm3, %v7643_v0  ;;  %v5583_v11 = vld [vmem:[%s9860_s16 + $0x320] sm:$0xff]  ;;  %v5063_v34 = vld [vmem:[%s9862_s18 + $0x30] sm:$0xff] }
 0xb50   :  { %7311 = vmatpush3.bf16.msra.mxu1 %v7310_v9  ;;  %7336 = vmatprep.subr.bf16.mxu0 %v7644_v48  ;;  %v7316_v12 = vpack.c.bf16 %v5584_v54, %v5583_v11  ;;  %v5067_v11 = vld [vmem:[%s9862_s18 + $0x50] sm:$0xff]  ;;  %v5068_v54 = vld [vmem:[%s9862_s18 + $0x58] sm:$0xff] }
 0xb51   :  { %7312 = vmatprep.subr.bf16.mxu1 %v7644_v48  ;;  %6602 = vmatprep.mubr.msk.f32.mxu1 %vm7645_vm3, %v7643_v0 }
 0xb52   :  { %6610 = vmatmul.mubr.msk.f32.vlgmr.msra.gmra.mrb[58].mxu0 %vm3748_vm4, %v4886_v52  ;;  %v5064_v52 = vld [vmem:[%s9862_s18 + $0x38] sm:$0xff] }
 0xb53   :  { %7338 = vmatpush3.bf16.msra.mxu0 %v7337_v30  ;;  %6644 = vmatprep.mubr.msk.f32.mxu0 %vm7645_vm3, %v7643_v0  ;;  %v7370_v30 = vpack.c.bf16 %v5064_v52, %v5063_v34 }
 0xb54   :  { %7314 = vmatpush3.bf16.msra.mxu1 %v7313_v55  ;;  %7339 = vmatprep.subr.bf16.mxu0 %v7644_v48  ;;  %v5065_v55 = vld [vmem:[%s9862_s18 + $0x40] sm:$0xff] }
 0xb55   :  { %7315 = vmatprep.subr.bf16.mxu1 %v7644_v48  ;;  %v7373_v59 = vpack.c.bf16 %v5066_v57, %v5065_v55 }
 0xb57   :  { %7341 = vmatpush3.bf16.msra.mxu0 %v7340_v58  ;;  %v7376_v58 = vpack.c.bf16 %v5068_v54, %v5067_v11 }
 0xb58   :  { %7317 = vmatpush3.bf16.msra.mxu1 %v7316_v12  ;;  %7342 = vmatprep.subr.bf16.mxu0 %v7644_v48  ;;  %v5069_v12 = vld [vmem:[%s9862_s18 + $0x60] sm:$0xff] }
 0xb59   :  { %7318 = vmatprep.subr.bf16.mxu1 %v7644_v48  ;;  %v7379_v25 = vpack.c.bf16 %v5070_v1, %v5069_v12 }
 0xb5b   :  { %7344 = vmatpush3.bf16.msra.mxu0 %v7343_v14 }
 0xb5c   :  { %7320 = vmatpush3.bf16.msra.mxu1 %v7319_v17  ;;  %7345 = vmatprep.subr.bf16.mxu0 %v7644_v48 }
 0xb5d   :  { %7321 = vmatprep.subr.bf16.mxu1 %v7644_v48 }
 0xb5f   :  { %7347 = vmatpush3.bf16.msra.mxu0 %v7346_v39 }
 0xb60   :  { %7323 = vmatpush3.bf16.msra.mxu1 %v7322_v31  ;;  %7348 = vmatprep.subr.bf16.mxu0 %v7644_v48 }
 0xb61   :  { %7324 = vmatprep.subr.bf16.mxu1 %v7644_v48 }
 0xb63   :  { %7350 = vmatpush3.bf16.msra.mxu0 %v7349_v5 }
 0xb64   :  { %7326 = vmatpush3.bf16.msra.mxu1 %v7325_v45  ;;  %7351 = vmatprep.subr.bf16.mxu0 %v7644_v48 }
 0xb65   :  { %7327 = vmatprep.subr.bf16.mxu1 %v7644_v48 }
 0xb67   :  { %7353 = vmatpush3.bf16.msra.mxu0 %v7352_v60 }
 0xb68   :  { %7329 = vmatpush3.bf16.msra.mxu1 %v7328_v61  ;;  %7354 = vmatprep.subr.bf16.mxu0 %v7644_v48 }
 0xb69   :  { %7330 = vmatprep.subr.bf16.mxu1 %v7644_v48 }
 0xb6b   :  { %7356 = vmatpush3.bf16.msra.mxu0 %v7355_v36 }
 0xb6c   :  { %7332 = vmatpush3.bf16.msra.mxu1 %v7331_v33  ;;  %7357 = vmatprep.subr.bf16.mxu0 %v7644_v48 }
 0xb6d   :  { %7360 = vmatprep.subr.bf16.mxu1 %v7644_v48 }
 0xb6f   :  { %7359 = vmatpush3.bf16.msra.mxu0 %v7358_v43 }
 0xc1d   :  { %v4554_v56 = vpop.f32.mrb[108].mxu1 }
 0xc1e   :  { %v4558_v8 = vadd.f32 %v4554_v56, %v9641_v15  ;;  %v6520_v21 = vpop.f32.mrb[109].mxu1  ;;  %v5061_v15 = vld [vmem:[%s9862_s18 + $0x20] sm:$0xff]  ;;  %s5173_s18 = sshll.u32 %s7646_s17, 4  ;;  %s5174_s18 = int_to_ptr.vmem [resolvable:$true] %s5173_s18 }
 0xc1f   :  { %v7367_v49 = vpack.c.bf16 %v5062_v6, %v5061_v15  ;;  %p7609_p13 = scmp.lt.s32.totalorder %s5174_s18, %s5174_s18 }
 0xc21   :  { %v4717_v24 = vpop.f32.mrb[56].mxu0  ;;  %v4793_v26 = vpop.f32.mrb[110].mxu1 }
 0xc22   :  { %v4721_v40 = vadd.f32 %v4717_v24, %v4558_v8  ;;  %6603 = vmatmul.mubr.f32.vlgmr.msra.gmra.mrb[112].mxu1 %v4793_v26  ;;  %v6562_v20 = vpop.f32.mrb[57].mxu0  ;;  %v6569_v9 = vpop.f32.mrb[111].mxu1 }
 0xc23   :  { %7362 = vmatpush3.bf16.msra.mxu1 %v7361_v10  ;;  %6677 = vmatprep.mubr.msk.f32.mxu1 %vm7645_vm3, %v7643_v0 }
 0xc24   :  { %7363 = vmatprep.subr.bf16.mxu1 %v7644_v48 }
 0xc25   :  { %v4956_v7 = vpop.f32.mrb[58].mxu0 }
 0xc26   :  { %6645 = vmatmul.mubr.f32.vlgmr.msra.gmra.mrb[60].mxu0 %v4956_v7  ;;  %v6611_v47 = vpop.f32.mrb[59].mxu0 }
 0xc27   :  { %7365 = vmatpush3.bf16.msra.mxu1 %v7364_v46 }
 0xc28   :  { %7366 = vmatprep.subr.bf16.mxu1 %v7644_v48 }
 0xc2b   :  { %7368 = vmatpush3.bf16.msra.mxu1 %v7367_v49 }
 0xc2c   :  { %7369 = vmatprep.subr.bf16.mxu1 %v7644_v48 }
 0xc2f   :  { %7371 = vmatpush3.bf16.msra.mxu1 %v7370_v30 }
 0xc30   :  { %7372 = vmatprep.subr.bf16.mxu1 %v7644_v48 }
 0xc33   :  { %7374 = vmatpush3.bf16.msra.mxu1 %v7373_v59 }
 0xc34   :  { %7375 = vmatprep.subr.bf16.mxu1 %v7644_v48 }
 0xc37   :  { %7377 = vmatpush3.bf16.msra.mxu1 %v7376_v58 }
 0xc38   :  { %7378 = vmatprep.subr.bf16.mxu1 %v7644_v48 }
 0xc3b   :  { %7380 = vmatpush3.bf16.msra.mxu1 %v7379_v25 }
 0xc3c   :  { %6675 = vmatprep.subr.mxu1 %v7643_v0  ;;  %v5613_v0 = vld [vmem:[%s9863_s19] ss:$0 sm:$0xff]  ;;  %s7604_s19 = scalar_lea.vmem %s5174_s18, 32 }
 0xc3d   :  { %p7605_p12 = scmp.ne.s32.totalorder %s5174_s18, %s7604_s19  ;;  %p7610_p0 = scmp.lt.s32.totalorder %s7604_s19, %s7604_s19 }
 0xc3f   :  { %6676 = vmatpush3.msra.mxu1 %v5071_v13  ;;  %p7611_p1 = por %p7610_p0, %p7609_p13 }
 0xc41   :  { %p7612_p2 = pnand %p7611_p1, %p7605_p12 }
 0xcf5   :  { %v4880_v19 = vpop.f32.mrb[112].mxu1 }
 0xcf6   :  { %v4884_v14 = vadd.f32 %v4880_v19, %v4721_v40  ;;  %v6604_v48 = vpop.f32.mrb[113].mxu1 }
 0xcf9   :  { %v5043_v17 = vpop.f32.mrb[60].mxu0 }
 0xcfa   :  { %v5047_v23 = vadd.f32 %v5043_v17, %v4884_v14  ;;  %v6646_v4 = vpop.f32.mrb[61].mxu0 }
 0xcfc   :  { %v5055_v27 = vadd.f32 %v5612_v18, %v5047_v23 }
 0xcfe   :  { %v5056_v39 = vmax.f32 %v5055_v27, 0.0 }
 0xd00   :  { %6678 = vmatmul.mubr.msk.f32.vlgmr.msra.gmra.mrb[114].mxu1 %vm5079_vm5, %v5056_v39 }
 0xdd3   :  { %v5149_v31 = vpop.f32.mrb[114].mxu1 }
 0xdd4   :  { %v5150_v44 = vadd.f32 %v5613_v0, %v5149_v31  ;;  %v6679_v41 = vpop.f32.mrb[115].mxu1 }
 0xdd6   :  { %v5154_v3 = vsel %vm5153_vm6, %v5150_v44, -inf }
 0xdd7   :  { %5155 = vmax.xlane.f32.xlu0 %v5154_v3 }
 0xe64   :  { %v5156_v2 = vpop.xlane.xlu0 %5155 }
 0xe65   :  { %v5157_v5 = vsub.f32 %v5150_v44, %v5156_v2 }
 0xe67   :  { %v5158_v45 = vmul.f32 1.442695, %v5157_v5 }
 0xe69   :  { %7490 = vpow2.f32 %v5158_v45 }
 0xe73   :  { %v7491_v28 = vpop.eup %7490 }
 0xe74   :  { %v5160_v50 = vsel %vm5153_vm6, %v7491_v28, 0.0 }
 0xe75   :  { %5161 = vadd.xlane.f32.xlu0 %v5160_v50 }
 0xf02   :  { %v5162_v53 = vpop.xlane.xlu0 %5161 }
 0xf03   :  { %7492 = vlog2.f32 %v5162_v53 }
 0xf0d   :  { %v7493_v29 = vpop.eup %7492 }
 0xf0e   :  { %v5164_v60 = vmul.f32 0.6931472, %v7493_v29 }
 0xf10   :  { %v5165_v61 = vsub.f32 %v5157_v5, %v5164_v60 }
 0xf12   :  { %5166 = vst.msk [vmem:[#allocation11] sm:$0x3] %vm5153_vm6, %v5165_v61 }
 0xf13   :  { %7615 = shalt.err (!%p7612_p2)
}
 0xf14   :  { %s9881_s28 = sld [smem:[#allocation21_spill]] }
 0xf1a   :  { %s7616_s12 = scalar_lea.hbm %s9881_s28, 32 }
 0xf1b   :  { %p7617_p3 = scmp.ne.s32.totalorder %s9881_s28, %s7616_s12  ;;  %p7620_p4 = scmp.lt.u32.totalorder %s7616_s12, %s9881_s28 }
 0xf1d   :  { %p7622_p5 = pnand %p7620_p4, %p7617_p3 }
 0xf1f   :  { %7625 = shalt.err (!%p7622_p5)
}
 0xf20   :  { %5176 = dma.vmem_to_hbm [thread:$0]  %s5174_s18, 32, %s9881_s28, [#allocation4]  }
 0xf21   :  { %7632 = dma.done.wait [#allocation4], 32  }
 0xf22   :  { %7633 = vsyncadd [#allocation4], 4294967264 }
 0xf23   :  { %5180 = vsyncpa [#allocation3], 1 }
 0xf24   :  { %5181 = vsyncpa [#allocation6], 1 }
 0xf25   :  { %5182 = vsyncpa [#allocation9], 1 }
 0xf26   :  { %5183 = vsyncpa [#allocation4], 1 }

</bundles_post_ra>
